<compile_context>
chip_gen: v7x
topology: tpu7x:2x2x1
jax: 0.10.0
libtpu: 0.0.40
codegen_flags: <defaults>
</compile_context>

<pallas_src>
import functools

import jax
import jax.numpy as jnp
from jax import lax
from jax.experimental import pallas as pl
from jax.experimental.pallas import tpu as pltpu

EPS = 1e-5
LANE = 128


def _round_up(x, m):
    return (x + m - 1) // m * m


def _block_kernel(x_ref, a_ref, gamma_ref, beta_ref, w_ref, bias_ref,
                  out_ref, ysh_ref, *, H, W, Cp, Cop, cg):
    # x_ref: (1, H, W, Cp) bf16 -- one batch element, NHWC, channels lane-padded.
    HW = H * W

    # ---------------- GroupNorm statistics (single pass, f32 sums) ----------
    xf = x_ref[0].reshape(HW, Cp).astype(jnp.float32)            # (HW, Cp)
    ch_sum = jnp.sum(xf, axis=0, keepdims=True)                  # (1, Cp)
    ch_sq = jnp.sum(xf * xf, axis=0, keepdims=True)              # (1, Cp)

    inv_n = jnp.float32(1.0 / (HW * cg))
    A = a_ref[...]                                               # (Cp, Cp) same-group mask
    mean = jnp.dot(ch_sum, A, preferred_element_type=jnp.float32) * inv_n
    ex2 = jnp.dot(ch_sq, A, preferred_element_type=jnp.float32) * inv_n
    var = jnp.maximum(ex2 - mean * mean, 0.0)
    # Fold mean / rstd / gamma / beta into one per-channel affine.
    scale = lax.rsqrt(var + EPS) * gamma_ref[...]                # (1, Cp)
    shift = beta_ref[...] - mean * scale                         # (1, Cp)

    # -------- Normalize + Swish (re-read bf16 input; one f32 temp live) -----
    xn = x_ref[0].reshape(HW, Cp).astype(jnp.float32) * scale + shift
    y = (xn * jax.nn.sigmoid(xn)).astype(jnp.bfloat16).reshape(H, W, Cp)

    # ---------------- Build the shifted-activation slab (bf16) --------------
    # ysh_ref: (H+2, W, 3*Cp) bf16.  Lane block v in {0,1,2} holds the
    # activation shifted by dw = v-1 along W; rows 0 and H+1 are the zero
    # H-halo.  Each row-tap kh of the 3x3 conv is then one lane-dense matmul
    # with K = 3*Cp.
    zero_row = jnp.zeros((W, 3 * Cp), jnp.bfloat16)
    zero_col = jnp.zeros((H, 1, Cp), jnp.bfloat16)
    ysh_ref[0] = zero_row                                        # top halo row
    ysh_ref[H + 1] = zero_row                                    # bottom halo row
    # v = 0 : y[h, w-1]
    ysh_ref[1:H + 1, 0:1, 0:Cp] = zero_col
    ysh_ref[1:H + 1, 1:W, 0:Cp] = y[:, 0:W - 1, :]
    # v = 1 : y[h, w]
    ysh_ref[1:H + 1, :, Cp:2 * Cp] = y
    # v = 2 : y[h, w+1]
    ysh_ref[1:H + 1, 0:W - 1, 2 * Cp:3 * Cp] = y[:, 1:W, :]
    ysh_ref[1:H + 1, W - 1:W, 2 * Cp:3 * Cp] = zero_col

    # -------- Conv2d 3x3: 3 row-tap matmuls, traced f32 accumulator ---------
    acc = None
    for kh in range(3):                                          # static unroll
        slab = ysh_ref[kh:kh + H].reshape(HW, 3 * Cp)            # bf16 (HW, 3*Cp)
        tap = jnp.dot(slab, w_ref[kh], preferred_element_type=jnp.float32)
        acc = tap if acc is None else acc + tap                  # (HW, Cop) f32
    out_ref[0] = (acc + bias_ref[...]).reshape(H, W, Cop)        # single store


def block_forward(x_nchw, gamma, beta, w_oihw, bias, groups):
    """GroupNorm(groups) -> Swish -> Conv2d(3x3, pad=1).  NCHW in / NCHW out."""
    B, C, H, W = x_nchw.shape
    Co = w_oihw.shape[0]
    assert C % groups == 0
    cg = C // groups

    Cp = _round_up(C, LANE)        # lane-dense input channels
    Cop = _round_up(Co, LANE)      # lane-dense output channels
    # Padded channels must start on a group boundary so they form their own
    # all-zero groups and never perturb the real group statistics.
    assert Cp % cg == 0

    # NOTE: the NCHW<->NHWC transposes + channel pads below are interface
    # plumbing for the PyTorch NCHW contract; in a full network keep
    # activations NHWC / channel-padded across layers so this work disappears.
    x_nhwc = jnp.transpose(x_nchw, (0, 2, 3, 1)).astype(jnp.bfloat16)
    x_p = jnp.pad(x_nhwc, ((0, 0), (0, 0), (0, 0), (0, Cp - C)))

    gamma_p = jnp.pad(gamma.astype(jnp.float32), (0, Cp - C)).reshape(1, Cp)
    beta_p = jnp.pad(beta.astype(jnp.float32), (0, Cp - C)).reshape(1, Cp)
    bias_p = jnp.pad(bias.astype(jnp.float32), (0, Cop - Co)).reshape(1, Cop)

    # Same-group averaging matrix, precomputed once (grid-invariant input):
    #   A[i, j] = 1 iff channels i and j belong to the same group.
    cid = jnp.arange(Cp, dtype=jnp.int32) // cg
    A = (cid[:, None] == cid[None, :]).astype(jnp.float32)

    # Conv weight (Co, C, 3, 3) -> fused per-row-tap weight (3, 3*Cp, Cop), bf16:
    #   w_fused[kh, kw*Cp + c, o] = w[o, c, kh, kw]
    w_t = jnp.transpose(w_oihw, (2, 3, 1, 0))                    # (3, 3, C, Co)
    w_t = jnp.pad(w_t, ((0, 0), (0, 0), (0, Cp - C), (0, Cop - Co)))
    w_fused = w_t.reshape(3, 3 * Cp, Cop).astype(jnp.bfloat16)

    kernel = functools.partial(_block_kernel, H=H, W=W, Cp=Cp, Cop=Cop, cg=cg)

    out_p = pl.pallas_call(
        kernel,
        out_shape=jax.ShapeDtypeStruct((B, H, W, Cop), jnp.float32),
        grid_spec=pltpu.PrefetchScalarGridSpec(
            num_scalar_prefetch=0,
            grid=(B,),
            in_specs=[
                pl.BlockSpec((1, H, W, Cp), lambda b: (b, 0, 0, 0)),    # x (bf16)
                pl.BlockSpec((Cp, Cp), lambda b: (0, 0)),               # A
                pl.BlockSpec((1, Cp), lambda b: (0, 0)),                # gamma
                pl.BlockSpec((1, Cp), lambda b: (0, 0)),                # beta
                pl.BlockSpec((3, 3 * Cp, Cop), lambda b: (0, 0, 0)),    # conv W
                pl.BlockSpec((1, Cop), lambda b: (0, 0)),               # conv b
            ],
            out_specs=pl.BlockSpec((1, H, W, Cop), lambda b: (b, 0, 0, 0)),
            scratch_shapes=[pltpu.VMEM((H + 2, W, 3 * Cp), jnp.bfloat16)],
        ),
        compiler_params=pltpu.CompilerParams(
            dimension_semantics=("parallel",),
            vmem_limit_bytes=64 << 20),
    )(x_p, A, gamma_p, beta_p, w_fused, bias_p)

    # Strip the channel padding, NHWC -> NCHW (PyTorch convention).
    return jnp.transpose(out_p[..., :Co], (0, 3, 1, 2))


def _reference_forward(x_nchw, gamma, beta, w_oihw, bias, groups):
    """Pure-JAX reference: GroupNorm -> Swish -> Conv2d(3x3, pad=1), all f32."""
    B, C, H, W = x_nchw.shape
    cg = C // groups
    xg = x_nchw.reshape(B, groups, cg, H, W)
    mean = xg.mean(axis=(2, 3, 4), keepdims=True)
    var = xg.var(axis=(2, 3, 4), keepdims=True)
    xn = (xg - mean) / jnp.sqrt(var + EPS)
    xn = xn.reshape(B, C, H, W)
    xn = xn * gamma[None, :, None, None] + beta[None, :, None, None]
    y = xn * jax.nn.sigmoid(xn)
    out = jax.lax.conv_general_dilated(
        y, w_oihw, window_strides=(1, 1), padding="SAME",
        dimension_numbers=("NCHW", "OIHW", "NCHW"))
    return out + bias[None, :, None, None]


if __name__ == "__main__":
    B, C, H, W = 2, 8, 16, 16
    groups, Co = 4, 16

    key = jax.random.PRNGKey(0)
    kx, kg, kb, kw, kc = jax.random.split(key, 5)

    x = jax.random.normal(kx, (B, C, H, W), dtype=jnp.float32)
    gamma = 1.0 + 0.1 * jax.random.normal(kg, (C,), dtype=jnp.float32)
    beta = 0.1 * jax.random.normal(kb, (C,), dtype=jnp.float32)
    w_conv = 0.1 * jax.random.normal(kw, (Co, C, 3, 3), dtype=jnp.float32)
    b_conv = 0.05 * jax.random.normal(kc, (Co,), dtype=jnp.float32)

    out = block_forward(x, gamma, beta, w_conv, b_conv, groups)
    out = jax.block_until_ready(out)

    ref = _reference_forward(x, gamma, beta, w_conv, b_conv, groups)
    assert out.shape == (B, Co, H, W)
    # Accuracy contract: bf16 input activation + bf16 MXU conv operands with
    # f32 accumulation => relaxed tolerance vs. the pure-f32 reference.
    assert jnp.max(jnp.abs(out - ref)) < 7.5e-2, "mismatch vs reference"

    print("KERNEL_OK")
</pallas_src>

<mosaic_0001>
module attributes {stable_mosaic.version = 11 : i64} {
  func.func @_block_kernel(%arg0: i32, %arg1: memref<1x16x16x128xbf16, #tpu.memory_space<vmem>>, %arg2: memref<128x128xf32, #tpu.memory_space<vmem>>, %arg3: memref<1x128xf32, #tpu.memory_space<vmem>>, %arg4: memref<1x128xf32, #tpu.memory_space<vmem>>, %arg5: memref<3x384x128xbf16, #tpu.memory_space<vmem>>, %arg6: memref<1x128xf32, #tpu.memory_space<vmem>>, %arg7: memref<1x16x16x128xf32, #tpu.memory_space<vmem>>, %arg8: memref<18x16x384xbf16, #tpu.memory_space<vmem>>) attributes {dimension_semantics = [#tpu.dimension_semantics<parallel>], iteration_bounds = array<i64: 2>, scalar_prefetch = 0 : i64, scratch_operands = 1 : i64, tpu.core_type = #tpu.core_type<tc>, window_params = [{transform_indices = @transform_0, window_bounds = array<i64: 1, 16, 16, 128>}, {pipeline_mode = #tpu.pipeline_mode<synchronous>, transform_indices = @transform_1, window_bounds = array<i64: 128, 128>}, {pipeline_mode = #tpu.pipeline_mode<synchronous>, transform_indices = @transform_2, window_bounds = array<i64: 1, 128>}, {pipeline_mode = #tpu.pipeline_mode<synchronous>, transform_indices = @transform_3, window_bounds = array<i64: 1, 128>}, {pipeline_mode = #tpu.pipeline_mode<synchronous>, transform_indices = @transform_4, window_bounds = array<i64: 3, 384, 128>}, {pipeline_mode = #tpu.pipeline_mode<synchronous>, transform_indices = @transform_5, window_bounds = array<i64: 1, 128>}, {transform_indices = @transform_6, window_bounds = array<i64: 1, 16, 16, 128>}]} {
    %c0 = arith.constant 0 : index
    %c0_0 = arith.constant 0 : index
    %c0_1 = arith.constant 0 : index
    %c0_2 = arith.constant 0 : index
    %0 = vector.load %arg1[%c0, %c0_0, %c0_1, %c0_2] : memref<1x16x16x128xbf16, #tpu.memory_space<vmem>>, vector<1x16x16x128xbf16>
    %1 = vector.shape_cast %0 : vector<1x16x16x128xbf16> to vector<16x16x128xbf16>
    %2 = vector.shape_cast %1 : vector<16x16x128xbf16> to vector<256x128xbf16>
    %3 = arith.extf %2 : vector<256x128xbf16> to vector<256x128xf32>
    %cst = arith.constant dense<0.000000e+00> : vector<128xf32>
    %4 = vector.multi_reduction <add>, %3, %cst [0] : vector<256x128xf32> to vector<128xf32>
    %5 = vector.shape_cast %4 : vector<128xf32> to vector<1x128xf32>
    %6 = arith.mulf %3, %3 : vector<256x128xf32>
    %cst_3 = arith.constant dense<0.000000e+00> : vector<128xf32>
    %7 = vector.multi_reduction <add>, %6, %cst_3 [0] : vector<256x128xf32> to vector<128xf32>
    %8 = vector.shape_cast %7 : vector<128xf32> to vector<1x128xf32>
    %c0_4 = arith.constant 0 : index
    %c0_5 = arith.constant 0 : index
    %9 = vector.load %arg2[%c0_4, %c0_5] : memref<128x128xf32, #tpu.memory_space<vmem>>, vector<128x128xf32>
    %cst_6 = arith.constant dense<0.000000e+00> : vector<1x128xf32>
    %10 = tpu.matmul %5, %9, %cst_6 {dimension_numbers = #tpu.dot_dimension_numbers<[1], [0], [0], [1], [0, 0, 1, 1], [], []>} : vector<1x128xf32>, vector<128x128xf32>, vector<1x128xf32> -> vector<1x128xf32>
    %cst_7 = arith.constant 0.001953125 : f32
    %11 = vector.broadcast %cst_7 : f32 to vector<1x128xf32>
    %12 = arith.mulf %10, %11 : vector<1x128xf32>
    %cst_8 = arith.constant dense<0.000000e+00> : vector<1x128xf32>
    %13 = tpu.matmul %8, %9, %cst_8 {dimension_numbers = #tpu.dot_dimension_numbers<[1], [0], [0], [1], [0, 0, 1, 1], [], []>} : vector<1x128xf32>, vector<128x128xf32>, vector<1x128xf32> -> vector<1x128xf32>
    %cst_9 = arith.constant 0.001953125 : f32
    %14 = vector.broadcast %cst_9 : f32 to vector<1x128xf32>
    %15 = arith.mulf %13, %14 : vector<1x128xf32>
    %16 = arith.mulf %12, %12 : vector<1x128xf32>
    %17 = arith.subf %15, %16 : vector<1x128xf32>
    %cst_10 = arith.constant 0.000000e+00 : f32
    %18 = vector.broadcast %cst_10 : f32 to vector<1x128xf32>
    %19 = arith.maximumf %17, %18 : vector<1x128xf32>
    %cst_11 = arith.constant 9.99999974E-6 : f32
    %20 = vector.broadcast %cst_11 : f32 to vector<1x128xf32>
    %21 = arith.addf %19, %20 : vector<1x128xf32>
    %22 = math.rsqrt %21 : vector<1x128xf32>
    %c0_12 = arith.constant 0 : index
    %c0_13 = arith.constant 0 : index
    %23 = vector.load %arg3[%c0_12, %c0_13] : memref<1x128xf32, #tpu.memory_space<vmem>>, vector<1x128xf32>
    %24 = arith.mulf %22, %23 : vector<1x128xf32>
    %c0_14 = arith.constant 0 : index
    %c0_15 = arith.constant 0 : index
    %25 = vector.load %arg4[%c0_14, %c0_15] : memref<1x128xf32, #tpu.memory_space<vmem>>, vector<1x128xf32>
    %26 = arith.mulf %12, %24 : vector<1x128xf32>
    %27 = arith.subf %25, %26 : vector<1x128xf32>
    %c0_16 = arith.constant 0 : index
    %c0_17 = arith.constant 0 : index
    %c0_18 = arith.constant 0 : index
    %c0_19 = arith.constant 0 : index
    %28 = vector.load %arg1[%c0_16, %c0_17, %c0_18, %c0_19] : memref<1x16x16x128xbf16, #tpu.memory_space<vmem>>, vector<1x16x16x128xbf16>
    %29 = vector.shape_cast %28 : vector<1x16x16x128xbf16> to vector<16x16x128xbf16>
    %30 = vector.shape_cast %29 : vector<16x16x128xbf16> to vector<256x128xbf16>
    %31 = arith.extf %30 : vector<256x128xbf16> to vector<256x128xf32>
    %32 = vector.broadcast %24 : vector<1x128xf32> to vector<256x128xf32>
    %33 = arith.mulf %31, %32 : vector<256x128xf32>
    %34 = vector.broadcast %27 : vector<1x128xf32> to vector<256x128xf32>
    %35 = arith.addf %33, %34 : vector<256x128xf32>
    %36 = arith.negf %35 : vector<256x128xf32>
    %37 = math.exp %36 : vector<256x128xf32>
    %cst_20 = arith.constant 1.000000e+00 : f32
    %38 = vector.broadcast %cst_20 : f32 to vector<256x128xf32>
    %39 = arith.addf %38, %37 : vector<256x128xf32>
    %40 = arith.divf %38, %39 : vector<256x128xf32>
    %41 = arith.mulf %35, %40 : vector<256x128xf32>
    %42 = arith.truncf %41 : vector<256x128xf32> to vector<256x128xbf16>
    %43 = vector.shape_cast %42 : vector<256x128xbf16> to vector<16x16x128xbf16>
    %cst_21 = arith.constant 0.000000e+00 : bf16
    %44 = vector.broadcast %cst_21 : bf16 to vector<16x384xbf16>
    %cst_22 = arith.constant 0.000000e+00 : bf16
    %45 = vector.broadcast %cst_22 : bf16 to vector<16x1x128xbf16>
    %c0_23 = arith.constant 0 : index
    %c0_24 = arith.constant 0 : index
    %c0_25 = arith.constant 0 : index
    %46 = vector.load %arg8[%c0_23, %c0_24, %c0_25] : memref<18x16x384xbf16, #tpu.memory_space<vmem>>, vector<1x16x384xbf16>
    %47 = vector.shape_cast %46 : vector<1x16x384xbf16> to vector<16x384xbf16>
    %48 = vector.shape_cast %44 : vector<16x384xbf16> to vector<1x16x384xbf16>
    tpu.vector_store %arg8[%c0_23, %c0_24, %c0_25], %48 {strides = array<i32>} : memref<18x16x384xbf16, #tpu.memory_space<vmem>>, vector<1x16x384xbf16>,
    %c17 = arith.constant 17 : index
    %c0_26 = arith.constant 0 : index
    %c0_27 = arith.constant 0 : index
    %49 = vector.load %arg8[%c17, %c0_26, %c0_27] : memref<18x16x384xbf16, #tpu.memory_space<vmem>>, vector<1x16x384xbf16>
    %50 = vector.shape_cast %49 : vector<1x16x384xbf16> to vector<16x384xbf16>
    %51 = vector.shape_cast %44 : vector<16x384xbf16> to vector<1x16x384xbf16>
    tpu.vector_store %arg8[%c17, %c0_26, %c0_27], %51 {strides = array<i32>} : memref<18x16x384xbf16, #tpu.memory_space<vmem>>, vector<1x16x384xbf16>,
    %c1 = arith.constant 1 : index
    %c0_28 = arith.constant 0 : index
    %c0_29 = arith.constant 0 : index
    %52 = vector.load %arg8[%c1, %c0_28, %c0_29] : memref<18x16x384xbf16, #tpu.memory_space<vmem>>, vector<16x1x128xbf16>
    tpu.vector_store %arg8[%c1, %c0_28, %c0_29], %45 {strides = array<i32>} : memref<18x16x384xbf16, #tpu.memory_space<vmem>>, vector<16x1x128xbf16>,
    %53 = vector.extract_strided_slice %43 {offsets = [0, 0, 0], sizes = [16, 15, 128], strides = [1, 1, 1]} : vector<16x16x128xbf16> to vector<16x15x128xbf16>
    %c1_30 = arith.constant 1 : index
    %c1_31 = arith.constant 1 : index
    %c0_32 = arith.constant 0 : index
    %54 = vector.load %arg8[%c1_30, %c1_31, %c0_32] : memref<18x16x384xbf16, #tpu.memory_space<vmem>>, vector<16x15x128xbf16>
    tpu.vector_store %arg8[%c1_30, %c1_31, %c0_32], %53 {strides = array<i32>} : memref<18x16x384xbf16, #tpu.memory_space<vmem>>, vector<16x15x128xbf16>,
    %c1_33 = arith.constant 1 : index
    %c0_34 = arith.constant 0 : index
    %c128 = arith.constant 128 : index
    %55 = vector.load %arg8[%c1_33, %c0_34, %c128] : memref<18x16x384xbf16, #tpu.memory_space<vmem>>, vector<16x16x128xbf16>
    tpu.vector_store %arg8[%c1_33, %c0_34, %c128], %43 {strides = array<i32>} : memref<18x16x384xbf16, #tpu.memory_space<vmem>>, vector<16x16x128xbf16>,
    %56 = vector.extract_strided_slice %43 {offsets = [0, 1, 0], sizes = [16, 15, 128], strides = [1, 1, 1]} : vector<16x16x128xbf16> to vector<16x15x128xbf16>
    %c1_35 = arith.constant 1 : index
    %c0_36 = arith.constant 0 : index
    %c256 = arith.constant 256 : index
    %57 = vector.load %arg8[%c1_35, %c0_36, %c256] : memref<18x16x384xbf16, #tpu.memory_space<vmem>>, vector<16x15x128xbf16>
    tpu.vector_store %arg8[%c1_35, %c0_36, %c256], %56 {strides = array<i32>} : memref<18x16x384xbf16, #tpu.memory_space<vmem>>, vector<16x15x128xbf16>,
    %c1_37 = arith.constant 1 : index
    %c15 = arith.constant 15 : index
    %c256_38 = arith.constant 256 : index
    %58 = vector.load %arg8[%c1_37, %c15, %c256_38] : memref<18x16x384xbf16, #tpu.memory_space<vmem>>, vector<16x1x128xbf16>
    tpu.vector_store %arg8[%c1_37, %c15, %c256_38], %45 {strides = array<i32>} : memref<18x16x384xbf16, #tpu.memory_space<vmem>>, vector<16x1x128xbf16>,
    %c0_39 = arith.constant 0 : index
    %c0_40 = arith.constant 0 : index
    %c0_41 = arith.constant 0 : index
    %59 = vector.load %arg8[%c0_39, %c0_40, %c0_41] : memref<18x16x384xbf16, #tpu.memory_space<vmem>>, vector<16x16x384xbf16>
    %60 = vector.shape_cast %59 : vector<16x16x384xbf16> to vector<256x384xbf16>
    %c0_42 = arith.constant 0 : index
    %c0_43 = arith.constant 0 : index
    %c0_44 = arith.constant 0 : index
    %61 = vector.load %arg5[%c0_42, %c0_43, %c0_44] : memref<3x384x128xbf16, #tpu.memory_space<vmem>>, vector<1x384x128xbf16>
    %62 = vector.shape_cast %61 : vector<1x384x128xbf16> to vector<384x128xbf16>
    %cst_45 = arith.constant dense<0.000000e+00> : vector<256x128xf32>
    %63 = tpu.matmul %60, %62, %cst_45 {dimension_numbers = #tpu.dot_dimension_numbers<[1], [0], [0], [1], [0, 0, 1, 1], [], []>} : vector<256x384xbf16>, vector<384x128xbf16>, vector<256x128xf32> -> vector<256x128xf32>
    %c1_46 = arith.constant 1 : index
    %c0_47 = arith.constant 0 : index
    %c0_48 = arith.constant 0 : index
    %64 = vector.load %arg8[%c1_46, %c0_47, %c0_48] : memref<18x16x384xbf16, #tpu.memory_space<vmem>>, vector<16x16x384xbf16>
    %65 = vector.shape_cast %64 : vector<16x16x384xbf16> to vector<256x384xbf16>
    %c1_49 = arith.constant 1 : index
    %c0_50 = arith.constant 0 : index
    %c0_51 = arith.constant 0 : index
    %66 = vector.load %arg5[%c1_49, %c0_50, %c0_51] : memref<3x384x128xbf16, #tpu.memory_space<vmem>>, vector<1x384x128xbf16>
    %67 = vector.shape_cast %66 : vector<1x384x128xbf16> to vector<384x128xbf16>
    %cst_52 = arith.constant dense<0.000000e+00> : vector<256x128xf32>
    %68 = tpu.matmul %65, %67, %cst_52 {dimension_numbers = #tpu.dot_dimension_numbers<[1], [0], [0], [1], [0, 0, 1, 1], [], []>} : vector<256x384xbf16>, vector<384x128xbf16>, vector<256x128xf32> -> vector<256x128xf32>
    %69 = arith.addf %63, %68 : vector<256x128xf32>
    %c2 = arith.constant 2 : index
    %c0_53 = arith.constant 0 : index
    %c0_54 = arith.constant 0 : index
    %70 = vector.load %arg8[%c2, %c0_53, %c0_54] : memref<18x16x384xbf16, #tpu.memory_space<vmem>>, vector<16x16x384xbf16>
    %71 = vector.shape_cast %70 : vector<16x16x384xbf16> to vector<256x384xbf16>
    %c2_55 = arith.constant 2 : index
    %c0_56 = arith.constant 0 : index
    %c0_57 = arith.constant 0 : index
    %72 = vector.load %arg5[%c2_55, %c0_56, %c0_57] : memref<3x384x128xbf16, #tpu.memory_space<vmem>>, vector<1x384x128xbf16>
    %73 = vector.shape_cast %72 : vector<1x384x128xbf16> to vector<384x128xbf16>
    %cst_58 = arith.constant dense<0.000000e+00> : vector<256x128xf32>
    %74 = tpu.matmul %71, %73, %cst_58 {dimension_numbers = #tpu.dot_dimension_numbers<[1], [0], [0], [1], [0, 0, 1, 1], [], []>} : vector<256x384xbf16>, vector<384x128xbf16>, vector<256x128xf32> -> vector<256x128xf32>
    %75 = arith.addf %69, %74 : vector<256x128xf32>
    %c0_59 = arith.constant 0 : index
    %c0_60 = arith.constant 0 : index
    %76 = vector.load %arg6[%c0_59, %c0_60] : memref<1x128xf32, #tpu.memory_space<vmem>>, vector<1x128xf32>
    %77 = vector.broadcast %76 : vector<1x128xf32> to vector<256x128xf32>
    %78 = arith.addf %75, %77 : vector<256x128xf32>
    %79 = vector.shape_cast %78 : vector<256x128xf32> to vector<16x16x128xf32>
    %c0_61 = arith.constant 0 : index
    %c0_62 = arith.constant 0 : index
    %c0_63 = arith.constant 0 : index
    %c0_64 = arith.constant 0 : index
    %80 = vector.load %arg7[%c0_61, %c0_62, %c0_63, %c0_64] : memref<1x16x16x128xf32, #tpu.memory_space<vmem>>, vector<1x16x16x128xf32>
    %81 = vector.shape_cast %80 : vector<1x16x16x128xf32> to vector<16x16x128xf32>
    %82 = vector.shape_cast %79 : vector<16x16x128xf32> to vector<1x16x16x128xf32>
    tpu.vector_store %arg7[%c0_61, %c0_62, %c0_63, %c0_64], %82 {strides = array<i32>} : memref<1x16x16x128xf32, #tpu.memory_space<vmem>>, vector<1x16x16x128xf32>,
    return
  }
  func.func @transform_0(%arg0: i32) -> (i32, i32, i32, i32) {
    %c0_i32 = arith.constant 0 : i32
    %c0_i32_0 = arith.constant 0 : i32
    %c0_i32_1 = arith.constant 0 : i32
    %c0_i32_2 = arith.constant 0 : i32
    return %arg0, %c0_i32, %c0_i32_0, %c0_i32_1 : i32, i32, i32, i32
  }
  func.func @transform_1(%arg0: i32) -> (i32, i32) {
    %c0_i32 = arith.constant 0 : i32
    %c0_i32_0 = arith.constant 0 : i32
    %c0_i32_1 = arith.constant 0 : i32
    return %c0_i32, %c0_i32_0 : i32, i32
  }
  func.func @transform_2(%arg0: i32) -> (i32, i32) {
    %c0_i32 = arith.constant 0 : i32
    %c0_i32_0 = arith.constant 0 : i32
    %c0_i32_1 = arith.constant 0 : i32
    return %c0_i32, %c0_i32_0 : i32, i32
  }
  func.func @transform_3(%arg0: i32) -> (i32, i32) {
    %c0_i32 = arith.constant 0 : i32
    %c0_i32_0 = arith.constant 0 : i32
    %c0_i32_1 = arith.constant 0 : i32
    return %c0_i32, %c0_i32_0 : i32, i32
  }
  func.func @transform_4(%arg0: i32) -> (i32, i32, i32) {
    %c0_i32 = arith.constant 0 : i32
    %c0_i32_0 = arith.constant 0 : i32
    %c0_i32_1 = arith.constant 0 : i32
    %c0_i32_2 = arith.constant 0 : i32
    return %c0_i32, %c0_i32_0, %c0_i32_1 : i32, i32, i32
  }
  func.func @transform_5(%arg0: i32) -> (i32, i32) {
    %c0_i32 = arith.constant 0 : i32
    %c0_i32_0 = arith.constant 0 : i32
    %c0_i32_1 = arith.constant 0 : i32
    return %c0_i32, %c0_i32_0 : i32, i32
  }
  func.func @transform_6(%arg0: i32) -> (i32, i32, i32, i32) {
    %c0_i32 = arith.constant 0 : i32
    %c0_i32_0 = arith.constant 0 : i32
    %c0_i32_1 = arith.constant 0 : i32
    %c0_i32_2 = arith.constant 0 : i32
    return %arg0, %c0_i32, %c0_i32_0, %c0_i32_1 : i32, i32, i32, i32
  }
}

</mosaic_0001>

<bundles_post_ra>
// kernel: tpu_custom_call.1
= control target key start
LH: loop header
LB: loop body
LE: loop exit
PB: predicated region body
PF: predicated region fallthrough
CT: control target
= control target key end

     0   :  { %11 = vsyncpa [#allocation4], 0  ;;  %s6577_s0 = inlined_call_operand.hbm [shape: bf16[2,16,16,128], index: 0, kind: input, shape index: {}]   ;;  %s6578_s1 = inlined_call_operand.hbm [shape: f32[128,128], index: 1, kind: input, shape index: {}]   ;;  %s6579_s2 = inlined_call_operand.hbm [shape: f32[1,128], index: 2, kind: input, shape index: {}]   ;;  %s6580_s3 = inlined_call_operand.hbm [shape: f32[1,128], index: 3, kind: input, shape index: {}]   ;;  %s6581_s4 = inlined_call_operand.hbm [shape: bf16[3,384,128], index: 4, kind: input, shape index: {}]   ;;  %s6582_s5 = inlined_call_operand.hbm [shape: f32[1,128], index: 5, kind: input, shape index: {}]   ;;  %s6583_s6 = inlined_call_operand.hbm [shape: f32[2,16,16,128], index: 6, kind: output, shape index: {}]  }
   0x1   :  { %13 = vsyncpa [#allocation4 + $0x1], 0 }
   0x2   :  { %14 = vsyncpa [#allocation7], 0 }
   0x3   :  { %15 = vsyncpa [#allocation10], 0 }
   0x4   :  { %16 = vsyncpa [#allocation13], 0 }
   0x5   :  { %17 = vsyncpa [#allocation5], 0 }
   0x6   :  { %19 = vsyncpa [#allocation5 + $0x1], 0  ;;  %s5007_s21 = smov 0   ;;  %s5009_s22 = smov 0  }
   0x7   :  { %s5011_s23 = smov 0   ;;  %s5013_s24 = smov 0  }
   0x8 LB: > { %s4955_s25 = smov [#allocation6]   ;;  %s5028_s27 = sadd.s32 4294967295, %s4953_s24   ;;  %s4953_s24 = sphi %s5013_s24, %s6632_s24   ;;  %s4949_s23 = sphi %s5011_s23, %s6631_s23   ;;  %s4945_s22 = sphi %s5009_s22, %s6630_s22   ;;  %s4941_s21 = sphi %s5007_s21, %s6629_s21  }
   0x9   : > { %s199_s26 = sshll.u32 %s4955_s25, 4  ;;  %p3321_p0 = scmp.ge.s32.totalorder %s4953_s24, 1  ;;  %s5033_s26 = int_to_ptr.vmem [resolvable:$true] %s199_s26 }
   0xa   : > { %p6584_p1 = scmp.eq.s32.totalorder %s5028_s27, 0  ;;  %p187_p2 = scmp.lt.s32.totalorder %s4953_s24, 3 }
   0xb   : > { %s4956_s29 = smov [#allocation9]   ;;  %s4957_s8 = smov [#allocation8]  }
   0xc   : > { %p5035_p3 = pnand %p3321_p0, %p187_p2  ;;  %s224_s30 = sshll.u32 %s4956_s29, 4  ;;  %s5048_s30 = int_to_ptr.vmem [resolvable:$true] %s224_s30 }
   0xd   : > { %s213_s9 = sshll.u32 %s4957_s8, 4  ;;  %s4705_s12 = scalar_lea.hbm %s6578_s1, 2048  ;;  %s5050_s9 = int_to_ptr.vmem [resolvable:$true] %s213_s9 }
   0xe   : > { %s6593_s28 = scalar_select %p5035_p3, 1, 0 }
   0xf   : > { %p4418_p5 = pneg %p5035_p3  ;;  %p4706_p7 = scmp.ne.s32.totalorder %s6578_s1, %s4705_s12 }
  0x10   : > { %p4712_p11 = scmp.lt.u32.totalorder %s4705_s12, %s6578_s1 }
  0x11   : > { %p5044_p6 = pnand %p4418_p5, %p6584_p1 }
  0x13   : > { %p5060_p8 = pneg %p5044_p6 }
  0x15   : > { %p4708_p9 = pnand %p5060_p8, %p4706_p7 }
  0x17   : > { %p4709_p10 = pneg %p4708_p9 }
  0x19   : > { %p4714_p12 = pnand %p4712_p11, %p4709_p10 }
  0x1b   : > { %4717 = shalt.err (!%p4714_p12)
}
  0x1c   : > { %s4718_s18 = scalar_lea.vmem %s5033_s26, 2048  ;;  %p4726_p5 = scmp.lt.s32.totalorder %s5033_s26, %s5033_s26 }
  0x1d   : > { %p4719_p13 = scmp.ne.s32.totalorder %s5033_s26, %s4718_s18  ;;  %p4727_p4 = scmp.lt.s32.totalorder %s4718_s18, %s4718_s18 }
  0x1f   : > { %p4721_p0 = pnand %p4719_p13, %p5060_p8  ;;  %p4728_p7 = por %p4727_p4, %p4726_p5 }
  0x21   : > { %p4722_p2 = pneg %p4721_p0 }
  0x23   : > { %p4729_p9 = pnand %p4728_p7, %p4722_p2 }
  0x25   : > { %4732 = shalt.err (!%p4729_p9)
}
  0x26   : > { %s4958_s19 = smov 128   ;;  %s4959_s20 = smov 8  }
  0x27   : > { %4421 = dma.hbm_to_vmem [thread:$0]  (!%p5044_p6), %s6578_s1, 2048, %s5033_s26, [#allocation7], %s4958_s19, %s4958_s19, %s4959_s20  }
  0x28   : > { %s4733_s11 = scalar_lea.hbm %s6580_s3, 16 }
  0x29   : > { %p4734_p4 = scmp.ne.s32.totalorder %s6580_s3, %s4733_s11  ;;  %p4740_p12 = scmp.lt.u32.totalorder %s4733_s11, %s6580_s3 }
  0x2b   : > { %p4736_p10 = pnand %p4734_p4, %p5060_p8 }
  0x2d   : > { %p4737_p11 = pneg %p4736_p10 }
  0x2f   : > { %p4742_p13 = pnand %p4740_p12, %p4737_p11 }
  0x31   : > { %4745 = shalt.err (!%p4742_p13)
}
  0x32   : > { %s4746_s26 = scalar_lea.vmem %s5048_s30, 16  ;;  %s4753_s17 = scalar_lea.vmem %s5048_s30, 32 }
  0x33   : > { %p4747_p0 = scmp.ne.s32.totalorder %s5048_s30, %s4746_s26  ;;  %p4754_p7 = scmp.lt.s32.totalorder %s5048_s30, %s5048_s30 }
  0x34   : > { %p4755_p9 = scmp.lt.s32.totalorder %s4753_s17, %s4746_s26 }
  0x35   : > { %p4749_p2 = pnand %p4747_p0, %p5060_p8 }
  0x36   : > { %p4756_p4 = por %p4755_p9, %p4754_p7 }
  0x37   : > { %p4750_p5 = pneg %p4749_p2 }
  0x39   : > { %p4757_p10 = pnand %p4756_p4, %p4750_p5 }
  0x3b   : > { %4760 = shalt.err (!%p4757_p10)
}
  0x3c   : > { %4427 = dma.hbm_to_vmem [thread:$0]  (!%p5044_p6), %s6580_s3, 16, %s5048_s30, [#allocation10]  }
  0x3d   : > { %s4761_s29 = scalar_lea.hbm %s6579_s2, 16 }
  0x3e   : > { %p4762_p11 = scmp.ne.s32.totalorder %s6579_s2, %s4761_s29  ;;  %p4768_p0 = scmp.lt.u32.totalorder %s4761_s29, %s6579_s2 }
  0x40   : > { %p4764_p12 = pnand %p4762_p11, %p5060_p8 }
  0x42   : > { %p4765_p13 = pneg %p4764_p12 }
  0x44   : > { %p4770_p2 = pnand %p4768_p0, %p4765_p13 }
  0x46   : > { %4773 = shalt.err (!%p4770_p2)
}
  0x47   : > { %s4774_s30 = scalar_lea.vmem %s5050_s9, 16  ;;  %s4781_s13 = scalar_lea.vmem %s5050_s9, 32 }
  0x48   : > { %p4775_p5 = scmp.ne.s32.totalorder %s5050_s9, %s4774_s30  ;;  %p4782_p4 = scmp.lt.s32.totalorder %s5050_s9, %s5050_s9 }
  0x49   : > { %p4783_p10 = scmp.lt.s32.totalorder %s4781_s13, %s4774_s30 }
  0x4a   : > { %p4777_p7 = pnand %p4775_p5, %p5060_p8 }
  0x4b   : > { %p4784_p11 = por %p4783_p10, %p4782_p4 }
  0x4c   : > { %p4778_p9 = pneg %p4777_p7 }
  0x4e   : > { %p4785_p12 = pnand %p4784_p11, %p4778_p9 }
  0x50   : > { %4788 = shalt.err (!%p4785_p12)
}
  0x51   : > { %4424 = dma.hbm_to_vmem [thread:$0]  (!%p5044_p6), %s6579_s2, 16, %s5050_s9, [#allocation7]  }
  0x52   : > { %s4960_s26 = smov [#allocation11]   ;;  %s4789_s20 = scalar_lea.hbm %s6581_s4, 9216 }
  0x53   : > { %s234_s17 = sshll.u32 %s4960_s26, 4  ;;  %p4790_p13 = scmp.ne.s32.totalorder %s6581_s4, %s4789_s20  ;;  %s235_s17 = int_to_ptr.vmem [resolvable:$true] %s234_s17 }
  0x54   : > { %p4796_p5 = scmp.lt.u32.totalorder %s4789_s20, %s6581_s4 }
  0x55   : > { %p4792_p0 = pnand %p4790_p13, %p5060_p8 }
  0x57   : > { %p4793_p2 = pneg %p4792_p0 }
  0x59   : > { %p4798_p7 = pnand %p4796_p5, %p4793_p2 }
  0x5b   : > { %4801 = shalt.err (!%p4798_p7)
}
  0x5c   : > { %s4802_s9 = scalar_lea.vmem %s235_s17, 9216  ;;  %p4810_p11 = scmp.lt.s32.totalorder %s235_s17, %s235_s17 }
  0x5d   : > { %p4803_p9 = scmp.ne.s32.totalorder %s235_s17, %s4802_s9  ;;  %p4811_p12 = scmp.lt.s32.totalorder %s4802_s9, %s4802_s9 }
  0x5f   : > { %p4805_p4 = pnand %p4803_p9, %p5060_p8  ;;  %p4812_p1 = por %p4811_p12, %p4810_p11 }
  0x61   : > { %p4806_p10 = pneg %p4805_p4 }
  0x63   : > { %p4813_p3 = pnand %p4812_p1, %p4806_p10 }
  0x65   : > { %4816 = shalt.err (!%p4813_p3)
}
  0x66   : > { %s4961_s11 = smov 64   ;;  %s4962_s12 = smov 4  }
  0x67   : > { %4430 = dma.hbm_to_vmem [thread:$0]  (!%p5044_p6), %s6581_s4, 9216, %s235_s17, [#allocation10], %s4961_s11, %s4961_s11, %s4962_s12  }
  0x68   : > { %s4963_s14 = smov [#allocation12]   ;;  %s4817_s19 = scalar_lea.hbm %s6582_s5, 16 }
  0x69   : > { %s248_s16 = sshll.u32 %s4963_s14, 4  ;;  %p4818_p1 = scmp.ne.s32.totalorder %s6582_s5, %s4817_s19  ;;  %s249_s16 = int_to_ptr.vmem [resolvable:$true] %s248_s16 }
  0x6a   : > { %p4824_p0 = scmp.lt.u32.totalorder %s4817_s19, %s6582_s5 }
  0x6b   : > { %p4820_p3 = pnand %p4818_p1, %p5060_p8 }
  0x6d   : > { %p4821_p13 = pneg %p4820_p3 }
  0x6f   : > { %p4826_p2 = pnand %p4824_p0, %p4821_p13 }
  0x71   : > { %4829 = shalt.err (!%p4826_p2)
}
  0x72   : > { %s4830_s17 = scalar_lea.vmem %s249_s16, 16  ;;  %s4837_s10 = scalar_lea.vmem %s249_s16, 32 }
  0x73   : > { %p4831_p5 = scmp.ne.s32.totalorder %s249_s16, %s4830_s17  ;;  %p4838_p4 = scmp.lt.s32.totalorder %s249_s16, %s249_s16 }
  0x74   : > { %p4839_p10 = scmp.lt.s32.totalorder %s4837_s10, %s4830_s17 }
  0x75   : > { %p4833_p7 = pnand %p4831_p5, %p5060_p8 }
  0x76   : > { %p4840_p11 = por %p4839_p10, %p4838_p4 }
  0x77   : > { %p4834_p9 = pneg %p4833_p7 }
  0x79   : > { %p4841_p12 = pnand %p4840_p11, %p4834_p9 }
  0x7b   : > { %4844 = shalt.err (!%p4841_p12)
}
  0x7c   : > { %4433 = dma.hbm_to_vmem [thread:$0]  (!%p5044_p6), %s6582_s5, 16, %s249_s16, [#allocation13]  }
  0x7d   : > { %s3320_s15 = sadd.s32 4294967294, %s4953_s24   ;;  %s5170_s7 = sadd.s32 1, %s4953_s24  }
  0x7e   : > { %s32_s13 = sadd.s32 1, %s4949_s23  ;;  %s29_s14 = ssub.s32 %s4953_s24, %s5170_s7 }
  0x7f   : > { %p39_p8 = scmp.ne.s32.totalorder %s4949_s23, %s4945_s22  ;;  %p30_p1 = scmp.eq.s32.totalorder %s29_s14, 0 }
  0x80   : > { %p40_p3 = scmp.eq.s32.totalorder %s4953_s24, 0  ;;  %p45_p13 = scmp.ne.s32.totalorder %s4945_s22, %s4941_s21 }
  0x81   : > { %p174_p0 = scmp.eq.s32.totalorder %s5028_s27, 1  ;;  %p6596_p5 = scmp.eq.s32.totalorder %s5028_s27, 0 }
  0x82   : > { %s5182_s26 = scalar_select %p30_p1, %s4949_s23, %s32_s13  }
  0x83   : > { %p41_p2 = por %p40_p3, %p39_p8  ;;  %p5186_p7 = por %p6596_p5, %p45_p13 }
  0x84   : > { %p5190_p6 = por %p174_p0, %p39_p8  ;;  %p180_p9 = scmp.eq.s32.totalorder %s3320_s15, 1 }
  0x85   : > { %p4447_p4 = scmp.lt.s32.totalorder %s4953_s24, 2  ;;  %s259_s19 = sand.u32 1, %s4949_s23  }
  0x86   : > { %s6598_s16 = scalar_select %p5190_p6, 1, 0 }
  0x87   : > { %p5196_p10 = por %p180_p9, %p45_p13  ;;  %s3328_s25 = sshll.u32 %s259_s19, 7 }
  0x88   : > { %s3449_s29 = sshll.u32 %s4953_s24, 11  ;;  %s263_s9 = scalar_lea.vmem [#allocation3], %s3328_s25 }
  0x89   : > { %s6599_s20 = scalar_select %p5196_p10, 1, 0 }
  0x8a   : > { %s5204_s10 = scalar_lea.hbm %s6577_s0, %s3449_s29  ;;  %s270_s30 = sshll.u32 %s263_s9, 4  ;;  %s5210_s30 = int_to_ptr.vmem [resolvable:$true] %s270_s30 }
  0x8b   : > { %p5206_p11 = pnand %p4447_p4, %p41_p2  ;;  %s5212_s13 = scalar_lea.sflag [#allocation4], %s259_s19 }
  0x8c   : > { %s4845_s14 = scalar_lea.hbm %s5204_s10, 2048  ;;  %s4850_s8 = scalar_lea.hbm %s6577_s0, 4096 }
  0x8d   : > { %p4846_p12 = scmp.ne.s32.totalorder %s5204_s10, %s4845_s14  ;;  %p4847_p8 = pneg %p5206_p11 }
  0x8e   : > { %p4851_p13 = scmp.lt.u32.totalorder %s5204_s10, %s6577_s0  ;;  %p4852_p0 = scmp.lt.u32.totalorder %s4850_s8, %s4845_s14 }
  0x8f   : > { %p4848_p1 = pnand %p4847_p8, %p4846_p12  ;;  %p4854_p5 = scmp.lt.u32.totalorder %s4845_s14, %s5204_s10 }
  0x90   : > { %p4853_p2 = por %p4852_p0, %p4851_p13 }
  0x91   : > { %p4849_p3 = pneg %p4848_p1 }
  0x92   : > { %p4855_p9 = por %p4854_p5, %p4853_p2 }
  0x94   : > { %p4856_p4 = pnand %p4855_p9, %p4849_p3 }
  0x96   : > { %4859 = shalt.err (!%p4856_p4)
}
  0x97   : > { %s4860_s19 = scalar_lea.vmem %s5210_s30, 2048  ;;  %s4964_s25 = smov [#allocation3]  }
  0x98   : > { %p4861_p12 = scmp.ne.s32.totalorder %s5210_s30, %s4860_s19  ;;  %s4865_s29 = sshll.u32 %s4964_s25, 4  ;;  %s4866_s29 = int_to_ptr.vmem [resolvable:$false] %s4865_s29 }
  0x99   : > { %s4867_s17 = scalar_lea.vmem %s4866_s29, 4096  ;;  %p4868_p6 = scmp.lt.s32.totalorder %s5210_s30, %s4866_s29 }
  0x9a   : > { %p4863_p1 = pnand %p4861_p12, %p4847_p8  ;;  %p4869_p13 = scmp.lt.s32.totalorder %s4867_s17, %s4860_s19 }
  0x9c   : > { %p4864_p10 = pneg %p4863_p1  ;;  %p4870_p0 = por %p4869_p13, %p4868_p6 }
  0x9e   : > { %p4871_p2 = pnand %p4870_p0, %p4864_p10 }
  0xa0   : > { %4874 = shalt.err (!%p4871_p2)
}
  0xa1   : > { %4437 = dma.hbm_to_vmem [thread:$0]  (!%p5206_p11), %s5204_s10, 2048, %s5210_s30, %s5212_s13, %s4961_s11, %s4961_s11, %s4962_s12  }
  0xa2   : > { %p6601_p8 = scmp.ne.s32.totalorder %s6593_s28, 0 }
  0xa4   : > { %282 = sbr.rel (%p6601_p8) target bundleno = 1185 (0x4a1), region = 44 }
  0xab   : > { %s5246_s14 = sand.u32 1, %s4945_s22  }
  0xac   : > { %s3332_s8 = sshll.u32 %s5246_s14, 7  ;;  %s285_s9 = scalar_lea.sflag [#allocation4], %s5246_s14 }
  0xad   : > { %s5250_s19 = scalar_lea.vmem [#allocation3], %s3332_s8 }
  0xae   : > { %4920 = dma.done.wait (%p5186_p7), %s285_s9, 2048  }
  0xaf   : > { %4922 = vsyncadd (%p5186_p7), %s285_s9, 4294965248  ;;  %p6602_p6 = scmp.eq.s32.totalorder %s5028_s27, 0 }
  0xb1   : > { %4924 = dma.done.wait (%p6602_p6), [#allocation7], 2064   ;;  %p6603_p10 = pmov %p6602_p6 }
  0xb2   : > { %p6604_p11 = pmov %p6602_p6 }
  0xb3   : > { %4926 = vsyncadd (%p6603_p10), [#allocation7], 4294965232 }
  0xb4   : > { %4928 = dma.done.wait (%p6604_p11), [#allocation10], 9232   ;;  %p6605_p3 = pmov %p6602_p6 }
  0xb6   : > { %4930 = vsyncadd (%p6605_p3), [#allocation10], 4294958064  ;;  %p6606_p5 = pmov %p6605_p3 }
  0xb7   : > { %p6607_p9 = pmov %p6605_p3 }
  0xb8   : > { %4932 = dma.done.wait (%p6606_p5), [#allocation13], 16  }
  0xb9   : > { %4934 = vsyncadd (%p6607_p9), [#allocation13], 4294967280  ;;  %v4965_v0 = vmov 0.0|0.0   ;;  %vm4966_vm0 = vmmov 0   ;;  %v4967_v1 = vmov 0.0   ;;  %v508_v2 = vld [vmem:[#allocation6] sm:$0xff] }
  0xba   : > { %4186 = vmatprep.subr.bf16.mxu0 %v4965_v0  ;;  %4004 = vmatprep.mubr.msk.f32.mxu0 %vm4966_vm0, %v4967_v1  ;;  %v509_v3 = vld [vmem:[#allocation6 + $0x8] sm:$0xff]  ;;  %v510_v4 = vld [vmem:[#allocation6 + $0x10] sm:$0xff]  ;;  %v511_v6 = vld [vmem:[#allocation6 + $0x18] sm:$0xff]  ;;  %vm998_vm1 = vcmask 1040384   ;;  %vm999_vm2 = vsmask.f32 256 }
  0xbb   : > { %v5271_v5 = vpack.c.bf16 %v509_v3, %v508_v2  ;;  %v5274_v7 = vpack.c.bf16 %v511_v6, %v510_v4  ;;  %v512_v8 = vld [vmem:[#allocation6 + $0x20] sm:$0xff]  ;;  %v513_v9 = vld [vmem:[#allocation6 + $0x28] sm:$0xff]  ;;  %v514_v12 = vld [vmem:[#allocation6 + $0x30] sm:$0xff]  ;;  %vm1177_vm4 = vcmask 1047552   ;;  %vm1292_vm5 = vsmask.f32 7424 }
  0xbc   : > { %v5278_v10 = vpack.c.bf16 %v513_v9, %v512_v8  ;;  %v3452_v11 = vld [vmem:[%s5250_s19] sm:$0xff]   ;;  %v515_v13 = vld [vmem:[#allocation6 + $0x38] sm:$0xff]  ;;  %v3515_v14 = vld [vmem:[%s5250_s19 + $0x8] sm:$0xff]   ;;  %vm1342_vm6 = vcmask 1047559   ;;  %vm1343_vm7 = vsmask.f32 7966 }
  0xbd   : > { %4188 = vmatpush3.bf16.msra.mxu0 %v5271_v5  ;;  %vm5283_vm3 = vmand %vm998_vm1, %vm999_vm2  ;;  %v516_v16 = vld [vmem:[#allocation6 + $0x40] sm:$0xff]  ;;  %v517_v17 = vld [vmem:[#allocation6 + $0x48] sm:$0xff]  ;;  %v5287_v18 = vunpack.c.l.bf16 %v3452_v11  ;;  %v5289_v19 = vunpack.c.h.bf16 %v3452_v11  ;;  %v5292_v21 = vpack.c.bf16 %v515_v13, %v514_v12  ;;  %v5296_v23 = vunpack.c.l.bf16 %v3515_v14  ;;  %s3338_s28 = sshll.u32 %s5246_s14, 8  ;;  %s3450_s12 = sshll.u32 %s5028_s27, 12 }
  0xbe   : > { %4189 = vmatprep.subr.bf16.mxu0 %v4965_v0  ;;  %v1046_v20 = vld [vmem:[#allocation2 + $0x180] sm:$0x1]  ;;  %v519_v25 = vld [vmem:[#allocation6 + $0x58] sm:$0xff]  ;;  %v5298_v26 = vunpack.c.h.bf16 %v3515_v14  ;;  %v5305_v29 = vpack.c.bf16 %v517_v17, %v516_v16  ;;  %v520_v33 = vld [vmem:[#allocation6 + $0x60] sm:$0xff]  ;;  %vm1178_vm8 = vsmask.f32 7938  ;;  %s6527_s15 = scalar_lea.hbm %s6583_s6, %s3450_s12 }
  0xbf   : > { %v3516_v22 = vld [vmem:[%s5250_s19 + $0x10] sm:$0xff]   ;;  %v402_v27 = vadd.f32 %v5289_v19, %v5287_v18  ;;  %v1047_v28 = vsel %vm5283_vm3, 0, %v1046_v20  ;;  %v3517_v30 = vld [vmem:[%s5250_s19 + $0x18] sm:$0xff]   ;;  %v521_v34 = vld [vmem:[#allocation6 + $0x68] sm:$0xff]  ;;  %v439_v39 = vmul.f32 %v5287_v18, %v5287_v18  ;;  %v440_v40 = vmul.f32 %v5289_v19, %v5289_v19  ;;  %s6434_s11 = scalar_lea.vmem [#allocation14], %s3338_s28  ;;  %s3186_s27 = scalar_lea.sflag [#allocation5], %s5246_s14 }
  0xc0   : > { %v518_v24 = vld [vmem:[#allocation6 + $0x50] sm:$0xff]  ;;  %1048 = vst [vmem:[#allocation2 + $0x180] sm:$0x1] %v1047_v28  ;;  %v5309_v31 = vunpack.c.l.bf16 %v3516_v22  ;;  %v5312_v35 = vunpack.c.h.bf16 %v3516_v22  ;;  %v3518_v38 = vld [vmem:[%s5250_s19 + $0x20] sm:$0xff]   ;;  %v5324_v41 = vunpack.c.l.bf16 %v3517_v30  ;;  %v441_v43 = vmul.f32 %v5296_v23, %v5296_v23  ;;  %v523_v45 = vld [vmem:[#allocation6 + $0x78] sm:$0xff]  ;;  %s3199_s18 = sshll.u32 %s6434_s11, 4  ;;  %s6529_s18 = int_to_ptr.vmem [resolvable:$true] %s3199_s18 }
  0xc1   : > { %4191 = vmatpush3.bf16.msra.mxu0 %v5274_v7  ;;  %v403_v32 = vadd.f32 %v5296_v23, %v402_v27  ;;  %v5316_v37 = vpack.c.bf16 %v519_v25, %v518_v24  ;;  %v522_v44 = vld [vmem:[#allocation6 + $0x70] sm:$0xff]  ;;  %v5329_v46 = vunpack.c.h.bf16 %v3517_v30  ;;  %v5333_v48 = vpack.c.bf16 %v521_v34, %v520_v33  ;;  %v3519_v49 = vld [vmem:[%s5250_s19 + $0x28] sm:$0xff]   ;;  %v3521_v8 = vld [vmem:[%s5250_s19 + $0x38] sm:$0xff]   ;;  %s4875_s13 = scalar_lea.vmem %s6529_s18, 4096  ;;  %p6626_p4 = scmp.ne.s32.totalorder %s6598_s16, 0 }
  0xc2   : > { %4192 = vmatprep.subr.bf16.mxu0 %v4965_v0  ;;  %v442_v50 = vmul.f32 %v5298_v26, %v5298_v26  ;;  %v471_v51 = vadd.f32 %v440_v40, %v439_v39  ;;  %v5339_v52 = vunpack.c.l.bf16 %v3518_v38  ;;  %v443_v54 = vmul.f32 %v5309_v31, %v5309_v31  ;;  %v3520_v59 = vld [vmem:[%s5250_s19 + $0x30] sm:$0xff]   ;;  %v3522_v22 = vld [vmem:[%s5250_s19 + $0x40] sm:$0xff]   ;;  %vm5778_vm9 = vmand %vm1177_vm4, %vm1292_vm5  ;;  %p4876_p7 = scmp.ne.s32.totalorder %s6529_s18, %s4875_s13  ;;  %s4969_s25 = smov [#allocation14]  }
  0xc3   : > { %v404_v36 = vadd.f32 %v5298_v26, %v403_v32  ;;  %v5344_v56 = vunpack.c.h.bf16 %v3518_v38  ;;  %v5348_v58 = vpack.c.bf16 %v523_v45, %v522_v44  ;;  %v444_v60 = vmul.f32 %v5312_v35, %v5312_v35  ;;  %vm5810_vm10 = vmand %vm1342_vm6, %vm1343_vm7  ;;  %s4879_s29 = sshll.u32 %s4969_s25, 4  ;;  %s4880_s29 = int_to_ptr.vmem [resolvable:$false] %s4879_s29 }
  0xc4   : > { %v472_v55 = vadd.f32 %v471_v51, %v441_v43  ;;  %v5354_v62 = vunpack.c.l.bf16 %v3519_v49  ;;  %v445_v2 = vmul.f32 %v5324_v41, %v5324_v41  ;;  %v5359_v4 = vunpack.c.h.bf16 %v3519_v49  ;;  %v3524_v49 = vld [vmem:[%s5250_s19 + $0x50] sm:$0xff]   ;;  %vm5816_vm11 = vmand %vm1177_vm4, %vm1178_vm8  ;;  %p4877_p12 = pnand %p4876_p7, %p6626_p4  ;;  %s4881_s17 = scalar_lea.vmem %s4880_s29, 8192 }
  0xc5   : > { %4194 = vmatpush3.bf16.msra.mxu0 %v5278_v10  ;;  %v405_v42 = vadd.f32 %v5309_v31, %v404_v36  ;;  %v446_v9 = vmul.f32 %v5329_v46, %v5329_v46  ;;  %v5367_v12 = vunpack.c.l.bf16 %v3520_v59  ;;  %v447_v14 = vmul.f32 %v5339_v52, %v5339_v52  ;;  %v3523_v36 = vld [vmem:[%s5250_s19 + $0x48] sm:$0xff]   ;;  %p4882_p13 = scmp.lt.s32.totalorder %s6529_s18, %s4880_s29  ;;  %p4883_p0 = scmp.lt.s32.totalorder %s4881_s17, %s4875_s13 }
  0xc6   : > { %4195 = vmatprep.subr.bf16.mxu0 %v4965_v0  ;;  %v473_v61 = vadd.f32 %v472_v55, %v442_v50  ;;  %v5372_v17 = vunpack.c.h.bf16 %v3520_v59  ;;  %v448_v24 = vmul.f32 %v5344_v56, %v5344_v56  ;;  %v5378_v27 = vunpack.c.l.bf16 %v3521_v8  ;;  %p4878_p1 = pneg %p4877_p12 }
  0xc7   : > { %v406_v47 = vadd.f32 %v5312_v35, %v405_v42  ;;  %v449_v30 = vmul.f32 %v5354_v62, %v5354_v62  ;;  %v5383_v33 = vunpack.c.h.bf16 %v3521_v8  ;;  %v450_v38 = vmul.f32 %v5359_v4, %v5359_v4  ;;  %p4884_p2 = por %p4883_p0, %p4882_p13 }
  0xc8   : > { %v474_v3 = vadd.f32 %v473_v61, %v443_v54  ;;  %v5389_v40 = vunpack.c.l.bf16 %v3522_v22  ;;  %v451_v43 = vmul.f32 %v5367_v12, %v5367_v12  ;;  %v5394_v45 = vunpack.c.h.bf16 %v3522_v22  ;;  %v3525_v61 = vld [vmem:[%s5250_s19 + $0x58] sm:$0xff]  }
  0xc9   : > { %4197 = vmatpush3.bf16.msra.mxu0 %v5292_v21  ;;  %v407_v53 = vadd.f32 %v5324_v41, %v406_v47  ;;  %v452_v50 = vmul.f32 %v5372_v17, %v5372_v17  ;;  %v453_v55 = vmul.f32 %v5378_v27, %v5378_v27  ;;  %v5405_v59 = vunpack.c.h.bf16 %v3523_v36  ;;  %p4885_p8 = pnand %p4884_p2, %p4878_p1 }
  0xca   : > { %4198 = vmatprep.subr.bf16.mxu0 %v4965_v0  ;;  %v475_v11 = vadd.f32 %v474_v3, %v444_v60  ;;  %v5411_v3 = vunpack.c.l.bf16 %v3524_v49  ;;  %v455_v8 = vmul.f32 %v5389_v40, %v5389_v40  ;;  %v5422_v22 = vunpack.c.l.bf16 %v3525_v61 }
  0xcb   : > { %v408_v57 = vadd.f32 %v5329_v46, %v407_v53  ;;  %v5400_v53 = vunpack.c.l.bf16 %v3523_v36  ;;  %v458_v36 = vmul.f32 %v5405_v59, %v5405_v59 }
  0xcc   : > { %v476_v16 = vadd.f32 %v475_v11, %v445_v2  ;;  %v5416_v11 = vunpack.c.h.bf16 %v3524_v49 }
  0xcd   : > { %4200 = vmatpush3.bf16.msra.mxu0 %v5305_v29  ;;  %v409_v63 = vadd.f32 %v5339_v52, %v408_v57 }
  0xce   : > { %4201 = vmatprep.subr.bf16.mxu0 %v4965_v0  ;;  %v477_v25 = vadd.f32 %v476_v16, %v446_v9  ;;  %v456_v16 = vmul.f32 %v5394_v45, %v5394_v45 }
  0xcf   : > { %v410_v6 = vadd.f32 %v5344_v56, %v409_v63  ;;  %v454_v63 = vmul.f32 %v5383_v33, %v5383_v33 }
  0xd0   : > { %v478_v32 = vadd.f32 %v477_v25, %v447_v14  ;;  %v3526_v14 = vld [vmem:[%s5250_s19 + $0x60] sm:$0xff]   ;;  %v457_v25 = vmul.f32 %v5400_v53, %v5400_v53 }
  0xd1   : > { %4203 = vmatpush3.bf16.msra.mxu0 %v5316_v37  ;;  %v411_v13 = vadd.f32 %v5354_v62, %v410_v6 }
  0xd2   : > { %4204 = vmatprep.subr.bf16.mxu0 %v4965_v0  ;;  %v479_v39 = vadd.f32 %v478_v32, %v448_v24 }
  0xd3   : > { %v412_v20 = vadd.f32 %v5359_v4, %v411_v13 }
  0xd4   : > { %v480_v44 = vadd.f32 %v479_v39, %v449_v30  ;;  %v5427_v30 = vunpack.c.h.bf16 %v3525_v61  ;;  %v5433_v39 = vunpack.c.l.bf16 %v3526_v14 }
  0xd5   : > { %4206 = vmatpush3.bf16.msra.mxu0 %v5333_v48  ;;  %v413_v28 = vadd.f32 %v5367_v12, %v412_v20 }
  0xd6   : > { %4207 = vmatprep.subr.bf16.mxu0 %v4965_v0  ;;  %v481_v51 = vadd.f32 %v480_v44, %v450_v38 }
  0xd7   : > { %v414_v34 = vadd.f32 %v5372_v17, %v413_v28 }
  0xd8   : > { %v482_v57 = vadd.f32 %v481_v51, %v451_v43  ;;  %v459_v43 = vmul.f32 %v5411_v3, %v5411_v3 }
  0xd9   : > { %4209 = vmatpush3.bf16.msra.mxu0 %v5348_v58  ;;  %v415_v42 = vadd.f32 %v5378_v27, %v414_v34  ;;  %v3527_v34 = vld [vmem:[%s5250_s19 + $0x68] sm:$0xff]  }
  0xda   : > { %4210 = vmatprep.subr.bf16.mxu0 %v4965_v0  ;;  %v483_v2 = vadd.f32 %v482_v57, %v452_v50  ;;  %v460_v50 = vmul.f32 %v5416_v11, %v5416_v11  ;;  %v3528_v57 = vld [vmem:[%s5250_s19 + $0x70] sm:$0xff]  }
  0xdb   : > { %v416_v47 = vadd.f32 %v5383_v33, %v415_v42 }
  0xdc   : > { %v484_v9 = vadd.f32 %v483_v2, %v453_v55 }
  0xdd   : > { %v417_v54 = vadd.f32 %v5389_v40, %v416_v47  ;;  %v5438_v47 = vunpack.c.h.bf16 %v3526_v14  ;;  %v3529_v14 = vld [vmem:[%s5250_s19 + $0x78] sm:$0xff]  }
  0xde   : > { %v485_v20 = vadd.f32 %v484_v9, %v454_v63  ;;  %v5449_v63 = vunpack.c.h.bf16 %v3527_v34  ;;  %v5454_v9 = vunpack.c.l.bf16 %v3528_v57 }
  0xdf   : > { %v418_v60 = vadd.f32 %v5394_v45, %v417_v54  ;;  %v5443_v54 = vunpack.c.l.bf16 %v3527_v34  ;;  %v5465_v34 = vunpack.c.l.bf16 %v3529_v14 }
  0xe0   : > { %v486_v28 = vadd.f32 %v485_v20, %v455_v8 }
  0xe1   : > { %v419_v6 = vadd.f32 %v5400_v53, %v418_v60  ;;  %v461_v60 = vmul.f32 %v5422_v22, %v5422_v22 }
  0xe2   : > { %v487_v38 = vadd.f32 %v486_v28, %v456_v16  ;;  %v463_v16 = vmul.f32 %v5433_v39, %v5433_v39  ;;  %v464_v28 = vmul.f32 %v5438_v47, %v5438_v47 }
  0xe3   : > { %v420_v13 = vadd.f32 %v5405_v59, %v419_v6  ;;  %v462_v6 = vmul.f32 %v5427_v30, %v5427_v30 }
  0xe4   : > { %v488_v44 = vadd.f32 %v487_v38, %v457_v25  ;;  %v465_v38 = vmul.f32 %v5443_v54, %v5443_v54 }
  0xe5   : > { %v421_v24 = vadd.f32 %v5411_v3, %v420_v13 }
  0xe6   : > { %v489_v51 = vadd.f32 %v488_v44, %v458_v36 }
  0xe7   : > { %v422_v32 = vadd.f32 %v5416_v11, %v421_v24  ;;  %v5460_v24 = vunpack.c.h.bf16 %v3528_v57 }
  0xe8   : > { %v490_v61 = vadd.f32 %v489_v51, %v459_v43  ;;  %v5470_v43 = vunpack.c.h.bf16 %v3529_v14  ;;  %v466_v51 = vmul.f32 %v5449_v63, %v5449_v63 }
  0xe9   : > { %v423_v42 = vadd.f32 %v5422_v22, %v422_v32 }
  0xea   : > { %v491_v8 = vadd.f32 %v490_v61, %v460_v50  ;;  %v467_v61 = vmul.f32 %v5454_v9, %v5454_v9 }
  0xeb   : > { %v424_v49 = vadd.f32 %v5427_v30, %v423_v42 }
  0xec   : > { %v492_v20 = vadd.f32 %v491_v8, %v461_v60 }
  0xed   : > { %v425_v55 = vadd.f32 %v5433_v39, %v424_v49 }
  0xee   : > { %v493_v32 = vadd.f32 %v492_v20, %v462_v6 }
  0xef   : > { %v426_v2 = vadd.f32 %v5438_v47, %v425_v55 }
  0xf0   : > { %v494_v42 = vadd.f32 %v493_v32, %v463_v16 }
  0xf1   : > { %v427_v13 = vadd.f32 %v5443_v54, %v426_v2 }
  0xf2   : > { %v495_v49 = vadd.f32 %v494_v42, %v464_v28 }
  0xf3   : > { %v428_v25 = vadd.f32 %v5449_v63, %v427_v13  ;;  %v468_v13 = vmul.f32 %v5460_v24, %v5460_v24 }
  0xf4   : > { %v496_v55 = vadd.f32 %v495_v49, %v465_v38 }
  0xf5   : > { %v429_v36 = vadd.f32 %v5454_v9, %v428_v25  ;;  %v469_v25 = vmul.f32 %v5465_v34, %v5465_v34 }
  0xf6   : > { %v497_v2 = vadd.f32 %v496_v55, %v466_v51  ;;  %v4504_v51 = vld [vmem:[#allocation11 + $0xc8] sm:$0xff]   ;;  %v4506_v55 = vld [vmem:[#allocation11 + $0xd0] sm:$0xff]  }
  0xf7   : > { %v430_v44 = vadd.f32 %v5460_v24, %v429_v36  ;;  %v470_v36 = vmul.f32 %v5470_v43, %v5470_v43 }
  0xf8   : > { %v498_v14 = vadd.f32 %v497_v2, %v467_v61  ;;  %v4514_v61 = vld [vmem:[#allocation11 + $0x128] sm:$0xff]  }
  0xf9   : > { %v431_v50 = vadd.f32 %v5465_v34, %v430_v44  ;;  %v4515_v2 = vld [vmem:[#allocation11 + $0xe8] sm:$0xff]  }
  0xfa   : > { %v499_v28 = vadd.f32 %v498_v14, %v468_v13  ;;  %v4518_v13 = vld [vmem:[#allocation11 + $0xf0] sm:$0xff]  }
  0xfb   : > { %v432_v57 = vadd.f32 %v5470_v43, %v431_v50  ;;  %v4502_v50 = vld [vmem:[#allocation11 + $0xc0] sm:$0xff]   ;;  %v4513_v14 = vld [vmem:[#allocation11 + $0x150] sm:$0xff]  }
  0xfc   : > { %v500_v38 = vadd.f32 %v499_v28, %v469_v25  ;;  %v1004_v28 = vld [vmem:[#allocation2 + $0x30] sm:$0x1] }
  0xfd   : > { %v433_v60 = vrot.slane %v432_v57, 4 }
  0xfe   : > { %v501_v42 = vadd.f32 %v500_v38, %v470_v36  ;;  %v4520_v36 = vld [vmem:[#allocation11 + $0x138] sm:$0xff]   ;;  %v1007_v38 = vld [vmem:[#allocation2 + $0x48] sm:$0x1] }
  0xff   : > { %v434_v6 = vadd.f32 %v433_v60, %v432_v57  ;;  %v4508_v57 = vld [vmem:[#allocation11 + $0x118] sm:$0xff]   ;;  %v4512_v60 = vld [vmem:[#allocation11 + $0xe0] sm:$0xff]  }
 0x100   : > { %v502_v44 = vrot.slane %v501_v42, 4 }
 0x101   : > { %v435_v8 = vrot.slane %v434_v6, 2 }
 0x102   : > { %v503_v49 = vadd.f32 %v502_v44, %v501_v42  ;;  %v4521_v44 = vld [vmem:[#allocation11 + $0xf8] sm:$0xff]  }
 0x103   : > { %v436_v16 = vadd.f32 %v435_v8, %v434_v6  ;;  %v4510_v6 = vld [vmem:[#allocation11 + $0x148] sm:$0xff]   ;;  %v4517_v8 = vld [vmem:[#allocation11 + $0x130] sm:$0xff]  }
 0x105   : > { %v437_v20 = vrot.slane %v436_v16, 1 }
 0x107   : > { %v438_v32 = vadd.f32 %v437_v20, %v436_v16  ;;  %v4516_v16 = vld [vmem:[#allocation11 + $0x158] sm:$0xff]   ;;  %v1001_v20 = vld [vmem:[#allocation2 + $0x18] sm:$0x1] }
 0x108   : > { %v1002_v25 = vsel %vm5283_vm3, 0, %v1001_v20 }
 0x109   : > { %4005 = vmatmul.mubr.f32.vlgmr.msra.gmra.mrb[0].mxu0 %v438_v32  ;;  %1003 = vst [vmem:[#allocation2 + $0x18] sm:$0x1] %v1002_v25  ;;  %v1005_v32 = vsel %vm5283_vm3, 0, %v1004_v28  ;;  %v1034_v25 = vld [vmem:[#allocation2 + $0x120] sm:$0x1] }
 0x10a   : > { %4212 = vmatpush3.bf16.msra.mxu0 %v5271_v5  ;;  %4039 = vmatprep.mubr.msk.f32.mxu0 %vm4966_vm0, %v4967_v1  ;;  %v504_v5 = vrot.slane %v503_v49, 2  ;;  %1006 = vst [vmem:[#allocation2 + $0x30] sm:$0x1] %v1005_v32  ;;  %v1035_v32 = vsel %vm5283_vm3, 0, %v1034_v25 }
 0x10b   : > { %4213 = vmatprep.subr.bf16.mxu0 %v4965_v0  ;;  %1036 = vst [vmem:[#allocation2 + $0x120] sm:$0x1] %v1035_v32 }
 0x10c   : > { %v505_v1 = vadd.f32 %v504_v5, %v503_v49  ;;  %v1008_v49 = vsel %vm5283_vm3, 0, %v1007_v38  ;;  %v1040_v38 = vld [vmem:[#allocation2 + $0x150] sm:$0x1] }
 0x10d   : > { %1009 = vst [vmem:[#allocation2 + $0x48] sm:$0x1] %v1008_v49 }
 0x10e   : > { %4215 = vmatpush3.bf16.msra.mxu0 %v5274_v7  ;;  %v506_v7 = vrot.slane %v505_v1, 1 }
 0x10f   : > { %4216 = vmatprep.subr.bf16.mxu0 %v4965_v0 }
 0x112   : > { %4218 = vmatpush3.bf16.msra.mxu0 %v5278_v10  ;;  %v507_v10 = vadd.f32 %v506_v7, %v505_v1  ;;  %v4519_v1 = vld [vmem:[#allocation11 + $0x160] sm:$0xff]   ;;  %v4522_v7 = vld [vmem:[#allocation11 + $0x168] sm:$0xff]  }
 0x113   : > { %4219 = vmatprep.subr.bf16.mxu0 %v4965_v0 }
 0x116   : > { %4221 = vmatpush3.bf16.msra.mxu0 %v5292_v21  ;;  %v4501_v21 = vld [vmem:[#allocation11 + $0x100] sm:$0xff]  }
 0x117   : > { %4222 = vmatprep.subr.bf16.mxu0 %v4965_v0 }
 0x11a   : > { %4224 = vmatpush3.bf16.msra.mxu0 %v5305_v29  ;;  %v4503_v29 = vld [vmem:[#allocation11 + $0x108] sm:$0xff]  }
 0x11b   : > { %4225 = vmatprep.subr.bf16.mxu0 %v4965_v0 }
 0x11e   : > { %4227 = vmatpush3.bf16.msra.mxu0 %v5316_v37  ;;  %v4505_v37 = vld [vmem:[#allocation11 + $0x110] sm:$0xff]  }
 0x11f   : > { %4228 = vmatprep.subr.bf16.mxu0 %v4965_v0 }
 0x122   : > { %4230 = vmatpush3.bf16.msra.mxu0 %v5333_v48  ;;  %v4509_v48 = vld [vmem:[#allocation11 + $0xd8] sm:$0xff]  }
 0x123   : > { %4231 = vmatprep.subr.bf16.mxu0 %v4965_v0  ;;  %v4511_v0 = vld [vmem:[#allocation11 + $0x120] sm:$0xff]  }
 0x126   : > { %4233 = vmatpush3.bf16.msra.mxu0 %v5348_v58  ;;  %v4507_v58 = vld [vmem:[#allocation11 + $0x140] sm:$0xff]  }
 0x127   : > { %3564 = vmatprep.subr.bf16.mxu0 %v4501_v21  ;;  %4042 = vmatprep.subr.bf16.mxu1 %v4507_v58 }
 0x128   : > { %4043 = vmatpush3.bf16.msra.mxu1 %v4507_v58 }
 0x129   : > { %4040 = vmatmul.mubr.f32.vlgmr.msra.gmra.mrb[2].mxu0 %v507_v10  ;;  %4044 = vmatprep.subr.bf16.mxu1 %v4510_v6  ;;  %v1010_v10 = vld [vmem:[#allocation2 + $0x60] sm:$0x1] }
 0x12a   : > { %3565 = vmatpush3.bf16.msra.mxu0 %v4502_v50  ;;  %v1011_v21 = vsel %vm5283_vm3, 0, %v1010_v10  ;;  %v4523_v50 = vld [vmem:[#allocation11 + $0x170] sm:$0xff]  }
 0x12b   : > { %3566 = vmatprep.subr.bf16.mxu0 %v4503_v29  ;;  %1012 = vst [vmem:[#allocation2 + $0x60] sm:$0x1] %v1011_v21  ;;  %v4524_v29 = vld [vmem:[#allocation11 + $0x178] sm:$0xff]   ;;  %v1043_v10 = vld [vmem:[#allocation2 + $0x168] sm:$0x1] }
 0x12c   : > { %4045 = vmatpush3.bf16.msra.mxu1 %v4510_v6  ;;  %v1025_v6 = vld [vmem:[#allocation2 + $0xd8] sm:$0x1]  ;;  %v1044_v21 = vsel %vm5283_vm3, 0, %v1043_v10 }
 0x12d   : > { %4046 = vmatprep.subr.bf16.mxu1 %v4513_v14  ;;  %1045 = vst [vmem:[#allocation2 + $0x168] sm:$0x1] %v1044_v21 }
 0x12e   : > { %3567 = vmatpush3.bf16.msra.mxu0 %v4504_v51  ;;  %v4525_v51 = vld [vmem:[#allocation11 + $0x40] sm:$0xff]  }
 0x12f   : > { %3568 = vmatprep.subr.bf16.mxu0 %v4505_v37  ;;  %v1013_v37 = vld [vmem:[#allocation2 + $0x78] sm:$0x1] }
 0x130   : > { %4047 = vmatpush3.bf16.msra.mxu1 %v4513_v14  ;;  %v1031_v14 = vld [vmem:[#allocation2 + $0x108] sm:$0x1] }
 0x131   : > { %4048 = vmatprep.subr.bf16.mxu1 %v4516_v16  ;;  %v1032_v20 = vsel %vm5283_vm3, 0, %v1031_v14 }
 0x132   : > { %3569 = vmatpush3.bf16.msra.mxu0 %v4506_v55  ;;  %v1014_v55 = vsel %vm5283_vm3, 0, %v1013_v37  ;;  %1033 = vst [vmem:[#allocation2 + $0x108] sm:$0x1] %v1032_v20 }
 0x133   : > { %3570 = vmatprep.subr.bf16.mxu0 %v4508_v57  ;;  %1015 = vst [vmem:[#allocation2 + $0x78] sm:$0x1] %v1014_v55  ;;  %v1016_v57 = vld [vmem:[#allocation2 + $0x90] sm:$0x1] }
 0x134   : > { %4049 = vmatpush3.bf16.msra.mxu1 %v4516_v16  ;;  %v1017_v58 = vsel %vm5283_vm3, 0, %v1016_v57  ;;  %v671_v55 = vld [vmem:[#allocation8] sm:$0x1] }
 0x135   : > { %4050 = vmatprep.subr.bf16.mxu1 %v4519_v1  ;;  %1018 = vst [vmem:[#allocation2 + $0x90] sm:$0x1] %v1017_v58  ;;  %v673_v58 = vld [vmem:[#allocation9] sm:$0x1] }
 0x136   : > { %3571 = vmatpush3.bf16.msra.mxu0 %v4509_v48  ;;  %v1019_v48 = vld [vmem:[#allocation2 + $0xa8] sm:$0x1] }
 0x137   : > { %3572 = vmatprep.subr.bf16.mxu0 %v4511_v0  ;;  %v1022_v0 = vld [vmem:[#allocation2 + $0xc0] sm:$0x1] }
 0x138   : > { %4051 = vmatpush3.bf16.msra.mxu1 %v4519_v1  ;;  %v1041_v1 = vsel %vm5283_vm3, 0, %v1040_v38 }
 0x139   : > { %4052 = vmatprep.subr.bf16.mxu1 %v4522_v7  ;;  %1042 = vst [vmem:[#allocation2 + $0x150] sm:$0x1] %v1041_v1 }
 0x13a   : > { %3573 = vmatpush3.bf16.msra.mxu0 %v4512_v60 }
 0x13b   : > { %3574 = vmatprep.subr.bf16.mxu0 %v4514_v61  ;;  %v1020_v61 = vsel %vm5283_vm3, 0, %v1019_v48 }
 0x13c   : > { %4053 = vmatpush3.bf16.msra.mxu1 %v4522_v7  ;;  %1021 = vst [vmem:[#allocation2 + $0xa8] sm:$0x1] %v1020_v61 }
 0x13d   : > { %4054 = vmatprep.subr.bf16.mxu1 %v4523_v50 }
 0x13e   : > { %3575 = vmatpush3.bf16.msra.mxu0 %v4515_v2  ;;  %v1023_v2 = vsel %vm5283_vm3, 0, %v1022_v0 }
 0x13f   : > { %3576 = vmatprep.subr.bf16.mxu0 %v4517_v8  ;;  %1024 = vst [vmem:[#allocation2 + $0xc0] sm:$0x1] %v1023_v2  ;;  %v1026_v8 = vsel %vm5283_vm3, 0, %v1025_v6 }
 0x140   : > { %4055 = vmatpush3.bf16.msra.mxu1 %v4523_v50  ;;  %1027 = vst [vmem:[#allocation2 + $0xd8] sm:$0x1] %v1026_v8 }
 0x141   : > { %4056 = vmatprep.subr.bf16.mxu1 %v4524_v29 }
 0x142   : > { %3577 = vmatpush3.bf16.msra.mxu0 %v4518_v13  ;;  %v1028_v13 = vld [vmem:[#allocation2 + $0xf0] sm:$0x1] }
 0x143   : > { %3578 = vmatprep.subr.bf16.mxu0 %v4520_v36  ;;  %v1029_v16 = vsel %vm5283_vm3, 0, %v1028_v13  ;;  %v1037_v36 = vld [vmem:[#allocation2 + $0x138] sm:$0x1] }
 0x144   : > { %4057 = vmatpush3.bf16.msra.mxu1 %v4524_v29  ;;  %1030 = vst [vmem:[#allocation2 + $0xf0] sm:$0x1] %v1029_v16 }
 0x145   : > { %3700 = vmatprep.subr.bf16.mxu1 %v4525_v51  ;;  %v676_v51 = vlaneseq }
 0x146   : > { %3579 = vmatpush3.bf16.msra.mxu0 %v4521_v44 }
 0x147   : > { %v677_v37 = vshrl.u32 %v676_v51, 7 }
 0x149   : > { %v678_v57 = vsub.s32 0, %v677_v37 }
 0x1dc   : > { %v590_v42 = vpop.f32.mrb[0].mxu0 }
 0x1dd   : > { %v4006_v5 = vpop.f32.mrb[1].mxu0  ;;  %v594_v60 = vmul.f32 0.001953125, %v590_v42 }
 0x1de   : > { %v1038_v5 = vsel %vm5283_vm3, 0, %v1037_v36 }
 0x1df   : > { %v666_v42 = vmul.f32 %v594_v60, %v594_v60  ;;  %1039 = vst [vmem:[#allocation2 + $0x138] sm:$0x1] %v1038_v5 }
 0x1fc   : > { %v661_v28 = vpop.f32.mrb[2].mxu0 }
 0x1fd   : > { %v665_v44 = vmul.f32 0.001953125, %v661_v28  ;;  %v4041_v49 = vpop.f32.mrb[3].mxu0 }
 0x1ff   : > { %v667_v7 = vsub.f32 %v665_v44, %v666_v42 }
 0x201   : > { %v668_v50 = vmax.f32 %v667_v7, 0.0 }
 0x203   : > { %v669_v29 = vadd.f32 1e-05, %v668_v50 }
 0x205   : > { %4573 = vrsqrt.f32 %v669_v29 }
 0x20f   : > { %v4574_v48 = vpop.eup %4573 }
 0x210   : > { %v672_v0 = vmul.f32 %v4574_v48, %v671_v55 }
 0x212   : > { %v674_v61 = vmul.f32 %v672_v0, %v594_v60  ;;  %v5532_v2 = vrot.slane %v672_v0, %v678_v57 }
 0x214   : > { %v675_v6 = vsub.f32 %v673_v58, %v674_v61  ;;  %v697_v8 = vmul.f32 %v5394_v45, %v5532_v2  ;;  %v698_v15 = vmul.f32 %v5400_v53, %v5532_v2  ;;  %v699_v13 = vmul.f32 %v5405_v59, %v5532_v2 }
 0x215   : > { %v700_v14 = vmul.f32 %v5411_v3, %v5532_v2  ;;  %v701_v16 = vmul.f32 %v5416_v11, %v5532_v2  ;;  %v702_v60 = vmul.f32 %v5422_v22, %v5532_v2  ;;  %v703_v45 = vmul.f32 %v5427_v30, %v5532_v2 }
 0x216   : > { %v5544_v20 = vrot.slane %v675_v6, %v678_v57  ;;  %v704_v53 = vmul.f32 %v5433_v39, %v5532_v2  ;;  %v705_v59 = vmul.f32 %v5438_v47, %v5532_v2  ;;  %v706_v3 = vmul.f32 %v5443_v54, %v5532_v2 }
 0x217   : > { %v707_v11 = vmul.f32 %v5449_v63, %v5532_v2  ;;  %v708_v25 = vmul.f32 %v5454_v9, %v5532_v2  ;;  %v709_v22 = vmul.f32 %v5460_v24, %v5532_v2  ;;  %v710_v30 = vmul.f32 %v5465_v34, %v5532_v2 }
 0x218   : > { %v711_v39 = vmul.f32 %v5470_v43, %v5532_v2  ;;  %v5567_v47 = vadd.f32 %v5544_v20, %v697_v8  ;;  %v5570_v54 = vadd.f32 %v5544_v20, %v698_v15  ;;  %v5573_v63 = vadd.f32 %v5544_v20, %v699_v13 }
 0x219   : > { %v5576_v9 = vadd.f32 %v5544_v20, %v700_v14  ;;  %v5579_v24 = vadd.f32 %v5544_v20, %v701_v16  ;;  %v5582_v34 = vadd.f32 %v5544_v20, %v702_v60  ;;  %v5585_v43 = vadd.f32 %v5544_v20, %v703_v45 }
 0x21a   : > { %v5588_v28 = vadd.f32 %v5544_v20, %v704_v53  ;;  %v5591_v32 = vadd.f32 %v5544_v20, %v705_v59  ;;  %v5594_v36 = vadd.f32 %v5544_v20, %v706_v3  ;;  %v5597_v38 = vadd.f32 %v5544_v20, %v707_v11 }
 0x21b   : > { %v5600_v42 = vadd.f32 %v5544_v20, %v708_v25  ;;  %v5603_v44 = vadd.f32 %v5544_v20, %v709_v22  ;;  %v5606_v49 = vadd.f32 %v5544_v20, %v710_v30  ;;  %v5609_v5 = vadd.f32 %v5544_v20, %v711_v39 }
 0x21c   : > { %v3356_v1 = vmul.f32 -1.442695, %v5567_v47  ;;  %v3357_v7 = vmul.f32 -1.442695, %v5570_v54  ;;  %v3358_v10 = vmul.f32 -1.442695, %v5573_v63  ;;  %v680_v51 = vmul.f32 %v5287_v18, %v5532_v2 }
 0x21d   : > { %v3359_v21 = vmul.f32 -1.442695, %v5576_v9  ;;  %v3360_v50 = vmul.f32 -1.442695, %v5579_v24  ;;  %v3361_v29 = vmul.f32 -1.442695, %v5582_v34  ;;  %v681_v0 = vmul.f32 %v5289_v19, %v5532_v2 }
 0x21e   : > { %4575 = vpow2.f32 %v3356_v1  ;;  %v3362_v37 = vmul.f32 -1.442695, %v5585_v43  ;;  %v3363_v55 = vmul.f32 -1.442695, %v5588_v28  ;;  %v3364_v57 = vmul.f32 -1.442695, %v5591_v32 }
 0x21f   : > { %4577 = vpow2.f32 %v3357_v7  ;;  %v3365_v48 = vmul.f32 -1.442695, %v5594_v36  ;;  %v5626_v58 = vadd.f32 %v5544_v20, %v680_v51  ;;  %v682_v18 = vmul.f32 %v5296_v23, %v5532_v2 }
 0x220   : > { %4579 = vpow2.f32 %v3358_v10  ;;  %v683_v61 = vmul.f32 %v5298_v26, %v5532_v2  ;;  %v684_v6 = vmul.f32 %v5309_v31, %v5532_v2  ;;  %v3366_v8 = vmul.f32 -1.442695, %v5597_v38 }
 0x221   : > { %4581 = vpow2.f32 %v3359_v21  ;;  %v5636_v15 = vadd.f32 %v5544_v20, %v681_v0  ;;  %v685_v19 = vmul.f32 %v5312_v35, %v5532_v2  ;;  %v5641_v13 = vadd.f32 %v5544_v20, %v682_v18 }
 0x222   : > { %4583 = vpow2.f32 %v3360_v50  ;;  %v5644_v23 = vadd.f32 %v5544_v20, %v683_v61  ;;  %v5647_v26 = vadd.f32 %v5544_v20, %v684_v6  ;;  %v3367_v31 = vmul.f32 -1.442695, %v5600_v42 }
 0x223   : > { %4585 = vpow2.f32 %v3361_v29  ;;  %v5651_v14 = vadd.f32 %v5544_v20, %v685_v19  ;;  %v686_v16 = vmul.f32 %v5324_v41, %v5532_v2  ;;  %v3368_v35 = vmul.f32 -1.442695, %v5603_v44 }
 0x224   : > { %4587 = vpow2.f32 %v3362_v37  ;;  %v3369_v60 = vmul.f32 -1.442695, %v5606_v49  ;;  %v687_v45 = vmul.f32 %v5329_v46, %v5532_v2  ;;  %v3370_v3 = vmul.f32 -1.442695, %v5609_v5 }
 0x225   : > { %4589 = vpow2.f32 %v3363_v55  ;;  %v5660_v53 = vadd.f32 %v5544_v20, %v686_v16  ;;  %v688_v11 = vmul.f32 %v5339_v52, %v5532_v2  ;;  %v689_v41 = vmul.f32 %v5344_v56, %v5532_v2 }
 0x226   : > { %4591 = vpow2.f32 %v3364_v57  ;;  %v5668_v30 = vadd.f32 %v5544_v20, %v687_v45  ;;  %v690_v56 = vmul.f32 %v5354_v62, %v5532_v2  ;;  %v691_v21 = vmul.f32 %v5359_v4, %v5532_v2 }
 0x227   : > { %4593 = vpow2.f32 %v3365_v48  ;;  %v5671_v1 = vadd.f32 %v5544_v20, %v688_v11  ;;  %v5674_v7 = vadd.f32 %v5544_v20, %v689_v41  ;;  %v692_v62 = vmul.f32 %v5367_v12, %v5532_v2 }
 0x228   : > { %v4576_v59 = vpop.eup %4575  ;;  %4595 = vpow2.f32 %v3366_v8  ;;  %v5681_v55 = vadd.f32 %v5544_v20, %v690_v56  ;;  %v5684_v57 = vadd.f32 %v5544_v20, %v691_v21  ;;  %v693_v4 = vmul.f32 %v5372_v17, %v5532_v2  ;;  %v4541_v21 = vld [vmem:[#allocation11 + $0x1c0] sm:$0xff]  }
 0x229   : > { %v4578_v25 = vpop.eup %4577  ;;  %4597 = vpow2.f32 %v3367_v31  ;;  %v863_v22 = vadd.f32 1.0, %v4576_v59  ;;  %v695_v61 = vmul.f32 %v5383_v33, %v5532_v2  ;;  %v5693_v31 = vadd.f32 %v5544_v20, %v692_v62  ;;  %3836 = vmatprep.subr.bf16.mxu0 %v4541_v21 }
 0x22a   : > { %v4580_v46 = vpop.eup %4579  ;;  %4599 = vpow2.f32 %v3368_v35  ;;  %v864_v39 = vadd.f32 1.0, %v4578_v25  ;;  %v5696_v16 = vadd.f32 %v5544_v20, %v693_v4  ;;  %v694_v17 = vmul.f32 %v5378_v27, %v5532_v2 }
 0x22b   : > { %v4582_v10 = vpop.eup %4581  ;;  %4601 = vpow2.f32 %v3369_v60  ;;  %v865_v52 = vadd.f32 1.0, %v4580_v46  ;;  %v5701_v60 = vadd.f32 %v5544_v20, %v695_v61  ;;  %v696_v45 = vmul.f32 %v5389_v40, %v5532_v2 }
 0x22c   : > { %v4584_v50 = vpop.eup %4583  ;;  %4603 = vpow2.f32 %v3370_v3  ;;  %v866_v29 = vadd.f32 1.0, %v4582_v10  ;;  %v5706_v41 = vadd.f32 %v5544_v20, %v694_v17  ;;  %v3339_v10 = vmul.f32 -1.442695, %v5626_v58 }
 0x22d   : > { %v4586_v51 = vpop.eup %4585  ;;  %v867_v37 = vadd.f32 1.0, %v4584_v50  ;;  %4605 = vrcp.f32 %v863_v22  ;;  %6610 = vst [vmem:[#allocation20_spill] sm:$0xff] %v5701_v60  ;;  %v5709_v27 = vadd.f32 %v5544_v20, %v696_v45  ;;  %v3341_v56 = vmul.f32 -1.442695, %v5641_v13 }
 0x22e   : > { %v4588_v48 = vpop.eup %4587  ;;  %v868_v0 = vadd.f32 1.0, %v4586_v51  ;;  %4607 = vrcp.f32 %v864_v39  ;;  %v3342_v20 = vmul.f32 -1.442695, %v5644_v23  ;;  %v4968_v62 = vmov 0  }
 0x22f   : > { %v4590_v18 = vpop.eup %4589  ;;  %v869_v6 = vadd.f32 1.0, %v4588_v48  ;;  %4609 = vrcp.f32 %v865_v52  ;;  %6611 = vst [vmem:[#allocation21_spill] sm:$0xff] %v5709_v27  ;;  %v3340_v52 = vmul.f32 -1.442695, %v5636_v15  ;;  %v3344_v48 = vmul.f32 -1.442695, %v5651_v14 }
 0x230   : > { %v4592_v8 = vpop.eup %4591  ;;  %v870_v19 = vadd.f32 1.0, %v4590_v18  ;;  %4611 = vrcp.f32 %v866_v29  ;;  %991 = vst [vmem:[#allocation2 + $0x8] sm:$0xff] %v4968_v62  ;;  %v3346_v18 = vmul.f32 -1.442695, %v5668_v30  ;;  %v5722_v61 = vmul.f32 -1.442695, %v5671_v1 }
 0x231   : > { %v4594_v35 = vpop.eup %4593  ;;  %v871_v12 = vadd.f32 1.0, %v4592_v8  ;;  %4613 = vrcp.f32 %v867_v37  ;;  %v3343_v37 = vmul.f32 -1.442695, %v5647_v26  ;;  %v5734_v45 = vmul.f32 -1.442695, %v5684_v57 }
 0x232   : > { %v4596_v33 = vpop.eup %4595  ;;  %v872_v59 = vadd.f32 1.0, %v4594_v35  ;;  %4615 = vrcp.f32 %v868_v0  ;;  %v3345_v0 = vmul.f32 -1.442695, %v5660_v53  ;;  %v5727_v35 = vmul.f32 -1.442695, %v5674_v7 }
 0x233   : > { %v4598_v3 = vpop.eup %4597  ;;  %v873_v11 = vadd.f32 1.0, %v4596_v33  ;;  %4617 = vrcp.f32 %v869_v6 }
 0x234   : > { %v4600_v25 = vpop.eup %4599  ;;  %v874_v22 = vadd.f32 1.0, %v4598_v3  ;;  %4619 = vrcp.f32 %v870_v19 }
 0x235   : > { %v4602_v46 = vpop.eup %4601  ;;  %v875_v39 = vadd.f32 1.0, %v4600_v25  ;;  %4621 = vrcp.f32 %v871_v12  ;;  %v5730_v12 = vmul.f32 -1.442695, %v5681_v55 }
 0x236   : > { %v4604_v40 = vpop.eup %4603  ;;  %v876_v2 = vadd.f32 1.0, %v4602_v46  ;;  %4623 = vrcp.f32 %v872_v59  ;;  %v5737_v59 = vmul.f32 -1.442695, %v5693_v31  ;;  %v5750_v46 = vmul.f32 -1.442695, %v5701_v60 }
 0x237   : > { %v5714_v50 = vpop.eup %4605  ;;  %v877_v29 = vadd.f32 1.0, %v4604_v40  ;;  %4625 = vrcp.f32 %v873_v11 }
 0x238   : > { %6612 = vst [vmem:[#allocation22_spill] sm:$0xff] %v5714_v50  ;;  %v4608_v51 = vpop.eup %4607  ;;  %4627 = vrcp.f32 %v874_v22  ;;  %v1336_v50 = vld [vmem:[#allocation2 + $0x178] sm:$0xff] }
 0x239   : > { %v4610_v4 = vpop.eup %4609  ;;  %4629 = vrcp.f32 %v875_v39  ;;  %v960_v6 = vmul.f32 %v4608_v51, %v5570_v54 }
 0x23a   : > { %v4612_v8 = vpop.eup %4611  ;;  %4631 = vrcp.f32 %v876_v2  ;;  %v961_v19 = vmul.f32 %v4610_v4, %v5573_v63  ;;  %v5741_v63 = vmul.f32 -1.442695, %v5696_v16 }
 0x23b   : > { %v4614_v17 = vpop.eup %4613  ;;  %4633 = vrcp.f32 %v877_v29  ;;  %v962_v33 = vmul.f32 %v4612_v8, %v5576_v9  ;;  %v5747_v9 = vmul.f32 -1.442695, %v5706_v41 }
 0x23c   : > { %v4616_v54 = vpop.eup %4615  ;;  %v963_v3 = vmul.f32 %v4614_v17, %v5579_v24  ;;  %4635 = vpow2.f32 %v3339_v10  ;;  %v5743_v11 = vpack.c.bf16 %v961_v19, %v960_v6 }
 0x23d   : > { %v4618_v25 = vpop.eup %4617  ;;  %v964_v22 = vmul.f32 %v4616_v54, %v5582_v34  ;;  %4637 = vpow2.f32 %v3340_v52  ;;  %v5759_v52 = vmul.f32 -1.442695, %v5709_v27 }
 0x23e   : > { %v4620_v39 = vpop.eup %4619  ;;  %v965_v40 = vmul.f32 %v4618_v25, %v5585_v43  ;;  %v5753_v24 = vpack.c.bf16 %v963_v3, %v962_v33  ;;  %4639 = vpow2.f32 %v3341_v56  ;;  %v1113_v10 = vshrl.u32 %v5743_v11, 16  ;;  %1237 = vst [vmem:[#allocation2 + $0xf8] sm:$0xff] %v5743_v11 }
 0x23f   : > { %v4622_v2 = vpop.eup %4621  ;;  %v966_v34 = vmul.f32 %v4620_v39, %v5588_v28  ;;  %4641 = vpow2.f32 %v3342_v20  ;;  %v6588_v21 = vshll.u32 %v5743_v11, 16 }
 0x240   : > { %v4624_v29 = vpop.eup %4623  ;;  %v967_v51 = vmul.f32 %v4622_v2, %v5591_v32  ;;  %v5763_v43 = vpack.c.bf16 %v965_v40, %v964_v22  ;;  %1238 = vst [vmem:[#allocation2 + $0x110] sm:$0xff] %v5753_v24  ;;  %4643 = vpow2.f32 %v3343_v37  ;;  %v5766_v56 = vrot.slane %v1113_v10, 7  ;;  %v1321_v37 = vld [vmem:[#allocation2 + $0x100] sm:$0xff] }
 0x241   : > { %v4626_v62 = vpop.eup %4625  ;;  %v968_v4 = vmul.f32 %v4624_v29, %v5594_v36  ;;  %4645 = vpow2.f32 %v3344_v48  ;;  %v1262_v28 = vrot.slane %v6588_v21, 1  ;;  %v1120_v20 = vshrl.u32 %v5753_v24, 16  ;;  %v1333_v21 = vld [vmem:[#allocation2 + $0x160] sm:$0xff] }
 0x242   : > { %v4628_v6 = vpop.eup %4627  ;;  %v969_v32 = vmul.f32 %v4626_v62, %v5597_v38  ;;  %v5773_v8 = vpack.c.bf16 %v967_v51, %v966_v34  ;;  %1239 = vst [vmem:[#allocation2 + $0x128] sm:$0xff] %v5763_v43  ;;  %4647 = vpow2.f32 %v3345_v0  ;;  %v6587_v48 = vshll.u32 %v5753_v24, 16  ;;  %v4536_v36 = vld [vmem:[#allocation11 + $0x28] sm:$0xff]  }
 0x243   : > { %v4630_v19 = vpop.eup %4629  ;;  %v970_v17 = vmul.f32 %v4628_v6, %v5600_v42  ;;  %4649 = vpow2.f32 %v3346_v18  ;;  %v1263_v33 = vor.u32 %v1262_v28, %v1113_v10  ;;  %v5784_v38 = vrot.slane %v1120_v20, 7 }
 0x244   : > { %v4632_v54 = vpop.eup %4631  ;;  %v971_v3 = vmul.f32 %v4630_v19, %v5603_v44  ;;  %v987_v25 = vpack.c.bf16 %v969_v32, %v968_v4  ;;  %v6589_v22 = vshrl.u32 %v5773_v8, 16  ;;  %v6590_v39 = vshll.u32 %v5773_v8, 16  ;;  %1240 = vst [vmem:[#allocation2 + $0x140] sm:$0xff] %v5773_v8 }
 0x245   : > { %v4634_v0 = vpop.eup %4633  ;;  %v972_v40 = vmul.f32 %v4632_v54, %v5606_v49  ;;  %4651 = vpow2.f32 %v5722_v61  ;;  %v1322_v42 = vsel %vm5778_vm9, %v1263_v33, %v1321_v37  ;;  %v1264_v18 = vrot.slane %v6587_v48, 1 }
 0x246   : > { %v4636_v10 = vpop.eup %4635  ;;  %v973_v44 = vmul.f32 %v4634_v0, %v5609_v5  ;;  %v988_v2 = vpack.c.bf16 %v971_v3, %v970_v17  ;;  %v1136_v34 = vrot.slane %v6589_v22, 7  ;;  %v1141_v29 = vshrl.u32 %v987_v25, 16  ;;  %1241 = vst [vmem:[#allocation2 + $0x158] sm:$0xff] %v987_v25  ;;  %1323 = vst [vmem:[#allocation2 + $0x100] sm:$0xff] %v1322_v42 }
 0x247   : > { %v4638_v51 = vpop.eup %4637  ;;  %v1144_v49 = vshll.u32 %v987_v25, 16  ;;  %v846_v62 = vadd.f32 1.0, %v4636_v10  ;;  %4653 = vpow2.f32 %v5727_v35  ;;  %v1265_v61 = vor.u32 %v1264_v18, %v1120_v20 }
 0x248   : > { %v4640_v4 = vpop.eup %4639  ;;  %v989_v28 = vpack.c.bf16 %v973_v44, %v972_v40  ;;  %v5802_v6 = vor.u32 %v6590_v39, %v1136_v34  ;;  %v1143_v5 = vrot.slane %v1141_v29, 7  ;;  %v1148_v32 = vshrl.u32 %v988_v2, 16  ;;  %1242 = vst [vmem:[#allocation2 + $0x170] sm:$0xff] %v988_v2 }
 0x249   : > { %v4642_v37 = vpop.eup %4641  ;;  %v1151_v19 = vshll.u32 %v988_v2, 16  ;;  %v1270_v17 = vrot.slane %v1144_v49, 1  ;;  %v847_v33 = vadd.f32 1.0, %v4638_v51  ;;  %4655 = vrcp.f32 %v846_v62 }
 0x24a   : > { %v4644_v54 = vpop.eup %4643  ;;  %v5804_v3 = vor.u32 %v1144_v49, %v1143_v5  ;;  %v1150_v25 = vrot.slane %v1148_v32, 7  ;;  %v1155_v35 = vshrl.u32 %v989_v28, 16  ;;  %v1158_v20 = vshll.u32 %v989_v28, 16  ;;  %1243 = vst [vmem:[#allocation2 + $0x188] sm:$0xff] %v989_v28  ;;  %v1324_v49 = vld [vmem:[#allocation2 + $0x118] sm:$0xff] }
 0x24b   : > { %v4646_v0 = vpop.eup %4645  ;;  %v1271_v40 = vor.u32 %v1270_v17, %v1141_v29  ;;  %v1272_v42 = vrot.slane %v1151_v19, 1  ;;  %4657 = vrcp.f32 %v847_v33  ;;  %v848_v18 = vadd.f32 1.0, %v4640_v4  ;;  %v1225_v4 = vld [vmem:[#allocation2 + $0x180] sm:$0xff] }
 0x24c   : > { %v4648_v10 = vpop.eup %4647  ;;  %v5806_v44 = vor.u32 %v1151_v19, %v1150_v25  ;;  %v1157_v34 = vrot.slane %v1155_v35, 7  ;;  %v1274_v2 = vrot.slane %v1158_v20, 1  ;;  %v849_v48 = vadd.f32 1.0, %v4642_v37 }
 0x24d   : > { %v4650_v62 = vpop.eup %4649  ;;  %v1273_v28 = vor.u32 %v1272_v42, %v1148_v32  ;;  %4659 = vrcp.f32 %v848_v18  ;;  %v850_v5 = vadd.f32 1.0, %v4644_v54  ;;  %v851_v19 = vadd.f32 1.0, %v4646_v0  ;;  %v1372_v37 = vld [vmem:[#allocation2 + $0x100] sm:$0x80] }
 0x24e   : > { %v1160_v17 = vor.u32 %v1158_v20, %v1157_v34  ;;  %v1275_v33 = vor.u32 %v1274_v2, %v1155_v35  ;;  %4661 = vrcp.f32 %v849_v48  ;;  %v852_v25 = vadd.f32 1.0, %v4648_v10  ;;  %v1339_v35 = vld [vmem:[#allocation2 + $0x190] sm:$0xff] }
 0x24f   : > { %v4652_v22 = vpop.eup %4651  ;;  %4663 = vrcp.f32 %v850_v5  ;;  %v853_v39 = vadd.f32 1.0, %v4650_v62  ;;  %v1373_v27 = vsel %vm5810_vm10, 0, %v1372_v37  ;;  %v1325_v60 = vsel %vm5778_vm9, %v1265_v61, %v1324_v49  ;;  %v1216_v37 = vld [vmem:[#allocation2 + $0x138] sm:$0xff] }
 0x250   : > { %v1226_v32 = vsel %vm5816_vm11, %v1160_v17, %v1225_v4  ;;  %4665 = vrcp.f32 %v851_v19  ;;  %v854_v54 = vadd.f32 1.0, %v4652_v22  ;;  %1374 = vst [vmem:[#allocation2 + $0x100] sm:$0x80] %v1373_v27  ;;  %1326 = vst [vmem:[#allocation2 + $0x118] sm:$0xff] %v1325_v60  ;;  %v1127_v48 = vshrl.u32 %v5763_v43, 16  ;;  %v1330_v22 = vld [vmem:[#allocation2 + $0x148] sm:$0xff] }
 0x251   : > { %v4654_v20 = vpop.eup %4653  ;;  %1227 = vst [vmem:[#allocation2 + $0x180] sm:$0xff] %v1226_v32  ;;  %4667 = vrcp.f32 %v852_v25  ;;  %v1130_v0 = vshll.u32 %v5763_v43, 16  ;;  %v6619_v42 = vshll.u32 %v5773_v8, 16  ;;  %v1334_v61 = vsel %vm5778_vm9, %v1271_v40, %v1333_v21  ;;  %v1207_v4 = vld [vmem:[#allocation2 + $0xf0] sm:$0xff]  ;;  %v1210_v21 = vld [vmem:[#allocation2 + $0x108] sm:$0xff]  ;;  %v1213_v19 = vld [vmem:[#allocation2 + $0x120] sm:$0xff] }
 0x252   : > { %4669 = vrcp.f32 %v853_v39  ;;  %v855_v10 = vadd.f32 1.0, %v4654_v20  ;;  %v1129_v34 = vrot.slane %v1127_v48, 7  ;;  %1335 = vst [vmem:[#allocation2 + $0x160] sm:$0xff] %v1334_v61  ;;  %v1337_v60 = vsel %vm5778_vm9, %v1273_v28, %v1336_v50  ;;  %v1327_v40 = vld [vmem:[#allocation2 + $0x130] sm:$0xff] }
 0x253   : > { %v1268_v18 = vrot.slane %v6619_v42, 1  ;;  %v4656_v27 = vpop.eup %4655  ;;  %4671 = vrcp.f32 %v854_v54  ;;  %v1266_v2 = vrot.slane %v1130_v0, 1  ;;  %v6620_v49 = vshrl.u32 %v5773_v8, 16  ;;  %1338 = vst [vmem:[#allocation2 + $0x178] sm:$0xff] %v1337_v60 }
 0x254   : > { %v1340_v62 = vsel %vm5778_vm9, %v1275_v33, %v1339_v35  ;;  %v942_v39 = vmul.f32 %v4656_v27, %v5626_v58  ;;  %4673 = vrcp.f32 %v855_v10  ;;  %v6621_v50 = vshll.u32 %v5743_v11, 16 }
 0x255   : > { %v1269_v43 = vor.u32 %v1268_v18, %v6620_v49  ;;  %1341 = vst [vmem:[#allocation2 + $0x190] sm:$0xff] %v1340_v62  ;;  %v6622_v5 = vshll.u32 %v5753_v24, 16  ;;  %v4658_v17 = vpop.eup %4657  ;;  %4675 = vpow2.f32 %v5730_v12  ;;  %v1267_v33 = vor.u32 %v1266_v2, %v1127_v48  ;;  %v1222_v12 = vld [vmem:[#allocation2 + $0x168] sm:$0xff] }
 0x256   : > { %v1118_v28 = vor.u32 %v6621_v50, %v5766_v56  ;;  %v1132_v25 = vor.u32 %v1130_v0, %v1129_v34  ;;  %v943_v32 = vmul.f32 %v4658_v17, %v5636_v15  ;;  %4677 = vpow2.f32 %v5734_v45 }
 0x257   : > { %v1125_v8 = vor.u32 %v6622_v5, %v5784_v38  ;;  %v1331_v58 = vsel %vm5778_vm9, %v1269_v43, %v1330_v22  ;;  %v1219_v38 = vld [vmem:[#allocation2 + $0x150] sm:$0xff]  ;;  %v4660_v54 = vpop.eup %4659  ;;  %4679 = vpow2.f32 %v5737_v59  ;;  %v1375_v48 = vld [vmem:[#allocation2 + $0x118] sm:$0x80]  ;;  %v1328_v15 = vsel %vm5778_vm9, %v1267_v33, %v1327_v40 }
 0x258   : > { %1332 = vst [vmem:[#allocation2 + $0x148] sm:$0xff] %v1331_v58  ;;  %v5852_v56 = vsel %vm5816_vm11, %v1118_v28, %v1207_v4  ;;  %v5865_v45 = vsel %vm5816_vm11, %v1132_v25, %v1213_v19  ;;  %v5870_v35 = vsel %vm5816_vm11, %v5802_v6, %v1216_v37  ;;  %v4662_v20 = vpop.eup %4661  ;;  %v974_v0 = vpack.c.bf16 %v943_v32, %v942_v39  ;;  %v1180_v4 = vld [vmem:[#allocation2 + $0x18] sm:$0xff]  ;;  %v1294_v39 = vld [vmem:[#allocation2 + $0x28] sm:$0xff] }
 0x259   : > { %v5856_v24 = vsel %vm5816_vm11, %v1125_v8, %v1210_v21  ;;  %1209 = vst [vmem:[#allocation2 + $0xf0] sm:$0xff] %v5852_v56  ;;  %v944_v59 = vmul.f32 %v4660_v54, %v5641_v13  ;;  %4681 = vpow2.f32 %v5741_v63  ;;  %v1376_v42 = vsel %vm5810_vm10, 0, %v1375_v48  ;;  %1329 = vst [vmem:[#allocation2 + $0x130] sm:$0xff] %v1328_v15  ;;  %v4664_v18 = vpop.eup %4663  ;;  %v1384_v6 = vld [vmem:[#allocation2 + $0x160] sm:$0x80]  ;;  %v4542_v37 = vld [vmem:[#allocation11 + $0x180] sm:$0xff]  }
 0x25a   : > { %1212 = vst [vmem:[#allocation2 + $0x108] sm:$0xff] %v5856_v24  ;;  %1215 = vst [vmem:[#allocation2 + $0x120] sm:$0xff] %v5865_v45  ;;  %v945_v61 = vmul.f32 %v4662_v20, %v5644_v23  ;;  %4683 = vpow2.f32 %v5747_v9  ;;  %v5883_v13 = vsel %vm5816_vm11, %v5804_v3, %v1219_v38  ;;  %v5888_v63 = vsel %vm5816_vm11, %v5806_v44, %v1222_v12  ;;  %v4666_v10 = vpop.eup %4665  ;;  %v1387_v9 = vld [vmem:[#allocation2 + $0x178] sm:$0x80]  ;;  %v1297_v48 = vld [vmem:[#allocation2 + $0x40] sm:$0xff] }
 0x25b   : > { %1218 = vst [vmem:[#allocation2 + $0x138] sm:$0xff] %v5870_v35  ;;  %1377 = vst [vmem:[#allocation2 + $0x118] sm:$0x80] %v1376_v42  ;;  %v1050_v34 = vshrl.u32 %v974_v0, 16  ;;  %v1053_v22 = vshll.u32 %v974_v0, 16  ;;  %1762 = vmatprep.mubr.bf16.mxu0 %v974_v0  ;;  %v946_v23 = vmul.f32 %v4664_v18, %v5647_v26  ;;  %4685 = vpow2.f32 %v5750_v46  ;;  %v4668_v3 = vpop.eup %4667  ;;  %v4544_v32 = vld [vmem:[#allocation11 + $0x1c8] sm:$0xff]  }
 0x25c   : > { %1228 = vst [vmem:[#allocation2 + $0x20] sm:$0xff] %v974_v0  ;;  %1221 = vst [vmem:[#allocation2 + $0x150] sm:$0xff] %v5883_v13  ;;  %v5894_v60 = vpack.c.bf16 %v945_v61, %v944_v59  ;;  %v947_v44 = vmul.f32 %v4666_v10, %v5651_v14  ;;  %4687 = vpow2.f32 %v5759_v52  ;;  %v1385_v27 = vsel %vm5810_vm10, 0, %v1384_v6  ;;  %v4670_v2 = vpop.eup %4669  ;;  %v1300_v10 = vld [vmem:[#allocation2 + $0x58] sm:$0xff] }
 0x25d   : > { %1224 = vst [vmem:[#allocation2 + $0x168] sm:$0xff] %v5888_v63  ;;  %v1052_v49 = vrot.slane %v1050_v34, 7  ;;  %v1244_v26 = vrot.slane %v1053_v22, 1  ;;  %v948_v46 = vmul.f32 %v4668_v3, %v5660_v53  ;;  %1386 = vst [vmem:[#allocation2 + $0x160] sm:$0x80] %v1385_v27  ;;  %v1388_v43 = vsel %vm5810_vm10, 0, %v1387_v9  ;;  %v4672_v62 = vpop.eup %4671 }
 0x25e   : > { %v1057_v21 = vshrl.u32 %v5894_v60, 16  ;;  %v1060_v14 = vshll.u32 %v5894_v60, 16  ;;  %1229 = vst [vmem:[#allocation2 + $0x38] sm:$0xff] %v5894_v60  ;;  %v5906_v52 = vpack.c.bf16 %v947_v44, %v946_v23  ;;  %v949_v40 = vmul.f32 %v4670_v2, %v5668_v30  ;;  %1389 = vst [vmem:[#allocation2 + $0x178] sm:$0x80] %v1388_v43  ;;  %v4674_v53 = vpop.eup %4673  ;;  %v4545_v3 = vld [vmem:[#allocation11 + $0x188] sm:$0xff]  }
 0x25f   : > { %v1381_v50 = vld [vmem:[#allocation2 + $0x148] sm:$0x80]  ;;  %v1055_v28 = vor.u32 %v1053_v22, %v1052_v49  ;;  %v1245_v5 = vor.u32 %v1244_v26, %v1050_v34  ;;  %v950_v8 = vmul.f32 %v4672_v62, %v5671_v1  ;;  %v4676_v17 = vpop.eup %4675  ;;  %v1183_v1 = vld [vmem:[#allocation2 + $0x30] sm:$0xff]  ;;  %v951_v20 = vmul.f32 %v4674_v53, %v5674_v7 }
 0x260   : > { %v1382_v19 = vsel %vm5810_vm10, 0, %v1381_v50  ;;  %v1059_v33 = vrot.slane %v1057_v21, 7  ;;  %v1067_v58 = vshll.u32 %v5906_v52, 16  ;;  %1230 = vst [vmem:[#allocation2 + $0x50] sm:$0xff] %v5906_v52  ;;  %v1246_v25 = vrot.slane %v1060_v14, 1  ;;  %v4678_v38 = vpop.eup %4677  ;;  %v1186_v34 = vld [vmem:[#allocation2 + $0x48] sm:$0xff] }
 0x261   : > { %v1064_v30 = vshrl.u32 %v5906_v52, 16  ;;  %1383 = vst [vmem:[#allocation2 + $0x148] sm:$0x80] %v1382_v19  ;;  %v1181_v12 = vsel %vm5816_vm11, %v1055_v28, %v1180_v4  ;;  %v1295_v54 = vsel %vm5778_vm9, %v1245_v5, %v1294_v39  ;;  %v5919_v15 = vpack.c.bf16 %v949_v40, %v948_v46  ;;  %v4680_v0 = vpop.eup %4679  ;;  %v4547_v46 = vld [vmem:[#allocation11 + $0x1d0] sm:$0xff]   ;;  %v1303_v53 = vld [vmem:[#allocation2 + $0x70] sm:$0xff] }
 0x262   : > { %1182 = vst [vmem:[#allocation2 + $0x18] sm:$0xff] %v1181_v12  ;;  %1763 = vmatmul.mubr.bf16.vlgmr.msra.gmra.mrb[4].mxu0 %v1181_v12  ;;  %v1062_v59 = vor.u32 %v1060_v14, %v1059_v33  ;;  %1296 = vst [vmem:[#allocation2 + $0x28] sm:$0xff] %v1295_v54  ;;  %v1247_v42 = vor.u32 %v1246_v25, %v1057_v21  ;;  %v1248_v61 = vrot.slane %v1067_v58, 1  ;;  %v856_v9 = vadd.f32 1.0, %v4676_v17  ;;  %v1189_v28 = vld [vmem:[#allocation2 + $0x60] sm:$0xff]  ;;  %v1306_v17 = vld [vmem:[#allocation2 + $0x88] sm:$0xff] }
 0x263   : > { %v1066_v18 = vrot.slane %v1064_v30, 7  ;;  %v4682_v6 = vpop.eup %4681  ;;  %1770 = vmatprep.mubr.bf16.mxu0 %v5894_v60  ;;  %v1074_v22 = vshll.u32 %v5919_v15, 16  ;;  %1231 = vst [vmem:[#allocation2 + $0x68] sm:$0xff] %v5919_v15  ;;  %v1071_v23 = vshrl.u32 %v5919_v15, 16  ;;  %v5926_v7 = vpack.c.bf16 %v951_v20, %v950_v8  ;;  %3837 = vmatpush3.bf16.msra.mxu0 %v4542_v37  ;;  %v4548_v25 = vld [vmem:[#allocation11 + $0x190] sm:$0xff]   ;;  %v4550_v54 = vld [vmem:[#allocation11 + $0x1d8] sm:$0xff]  }
 0x264   : > { %v4684_v44 = vpop.eup %4683  ;;  %v1184_v27 = vsel %vm5816_vm11, %v1062_v59, %v1183_v1  ;;  %v1298_v2 = vsel %vm5778_vm9, %v1247_v42, %v1297_v48  ;;  %v1249_v49 = vor.u32 %v1248_v61, %v1064_v30  ;;  %3838 = vmatprep.subr.bf16.mxu0 %v4544_v32  ;;  %v857_v5 = vadd.f32 1.0, %v4678_v38  ;;  %v1378_v1 = vld [vmem:[#allocation2 + $0x130] sm:$0x80] }
 0x265   : > { %v1069_v26 = vor.u32 %v1067_v58, %v1066_v18  ;;  %v4686_v43 = vpop.eup %4685  ;;  %1185 = vst [vmem:[#allocation2 + $0x30] sm:$0xff] %v1184_v27  ;;  %1299 = vst [vmem:[#allocation2 + $0x40] sm:$0xff] %v1298_v2  ;;  %v1073_v62 = vrot.slane %v1071_v23, 7  ;;  %v1250_v4 = vrot.slane %v1074_v22, 1  ;;  %v1078_v21 = vshrl.u32 %v5926_v7, 16  ;;  %v1192_v58 = vld [vmem:[#allocation2 + $0x78] sm:$0xff] }
 0x266   : > { %v1081_v14 = vshll.u32 %v5926_v7, 16  ;;  %v4688_v39 = vpop.eup %4687  ;;  %v1301_v40 = vsel %vm5778_vm9, %v1249_v49, %v1300_v10  ;;  %4689 = vrcp.f32 %v856_v9  ;;  %v858_v30 = vadd.f32 1.0, %v4680_v0  ;;  %v1390_v18 = vld [vmem:[#allocation2 + $0x190] sm:$0x80] }
 0x267   : > { %v5938_v50 = vsel %vm5816_vm11, %v1069_v26, %v1186_v34  ;;  %1302 = vst [vmem:[#allocation2 + $0x58] sm:$0xff] %v1301_v40  ;;  %v1251_v8 = vor.u32 %v1250_v4, %v1071_v23  ;;  %v1080_v19 = vrot.slane %v1078_v21, 7  ;;  %v1076_v33 = vor.u32 %v1074_v22, %v1073_v62  ;;  %3839 = vmatpush3.bf16.msra.mxu0 %v4545_v3  ;;  %v4551_v23 = vld [vmem:[#allocation11 + $0x198] sm:$0xff]   ;;  %v4554_v4 = vld [vmem:[#allocation11 + $0x1e8] sm:$0xff]   ;;  %v4526_v40 = vld [vmem:[#allocation11] sm:$0xff]  }
 0x268   : > { %1188 = vst [vmem:[#allocation2 + $0x48] sm:$0xff] %v5938_v50  ;;  %v1252_v37 = vrot.slane %v1081_v14, 1  ;;  %4691 = vrcp.f32 %v857_v5  ;;  %v859_v32 = vadd.f32 1.0, %v4682_v6  ;;  %v860_v12 = vadd.f32 1.0, %v4684_v44  ;;  %3840 = vmatprep.subr.bf16.mxu0 %v4547_v46  ;;  %v4552_v44 = vld [vmem:[#allocation11 + $0x1e0] sm:$0xff]  }
 0x269   : > { %v1345_v38 = vld [vmem:[#allocation2 + $0x28] sm:$0x80]  ;;  %v1304_v48 = vsel %vm5778_vm9, %v1251_v8, %v1303_v53  ;;  %v5945_v59 = vsel %vm5816_vm11, %v1076_v33, %v1189_v28  ;;  %v1083_v42 = vor.u32 %v1081_v14, %v1080_v19  ;;  %4693 = vrcp.f32 %v858_v30  ;;  %v4553_v46 = vld [vmem:[#allocation11 + $0x1a0] sm:$0xff]   ;;  %v4527_v8 = vld [vmem:[#allocation11 + $0x48] sm:$0xff]  }
 0x26a   : > { %v1253_v20 = vor.u32 %v1252_v37, %v1078_v21  ;;  %1771 = vmatmul.mubr.bf16.gmra.mrb[8].mxu0 %v1184_v27  ;;  %v1346_v0 = vsel %vm5810_vm10, 0, %v1345_v38  ;;  %1305 = vst [vmem:[#allocation2 + $0x70] sm:$0xff] %v1304_v48  ;;  %1191 = vst [vmem:[#allocation2 + $0x60] sm:$0xff] %v5945_v59  ;;  %v861_v61 = vadd.f32 1.0, %v4686_v43  ;;  %v862_v6 = vadd.f32 1.0, %v4688_v39 }
 0x26b   : > { %1778 = vmatprep.mubr.bf16.mxu0 %v5906_v52  ;;  %1347 = vst [vmem:[#allocation2 + $0x28] sm:$0x80] %v1346_v0  ;;  %4695 = vrcp.f32 %v859_v32  ;;  %v5955_v34 = vsel %vm5816_vm11, %v1083_v42, %v1192_v58  ;;  %v1379_v22 = vsel %vm5810_vm10, 0, %v1378_v1  ;;  %3841 = vmatpush3.bf16.msra.mxu0 %v4548_v25  ;;  %v1391_v3 = vsel %vm5810_vm10, 0, %v1390_v18  ;;  %v4555_v58 = vld [vmem:[#allocation11 + $0x1a8] sm:$0xff]   ;;  %v4529_v18 = vld [vmem:[#allocation11 + $0x50] sm:$0xff]  }
 0x26c   : > { %v1307_v10 = vsel %vm5778_vm9, %v1253_v20, %v1306_v17  ;;  %v1348_v9 = vld [vmem:[#allocation2 + $0x40] sm:$0x80]  ;;  %1194 = vst [vmem:[#allocation2 + $0x78] sm:$0xff] %v5955_v34  ;;  %4697 = vrcp.f32 %v860_v12  ;;  %1380 = vst [vmem:[#allocation2 + $0x130] sm:$0x80] %v1379_v22  ;;  %3842 = vmatprep.subr.bf16.mxu0 %v4550_v54  ;;  %v4528_v1 = vld [vmem:[#allocation11 + $0x8] sm:$0xff]  }
 0x26d   : > { %1308 = vst [vmem:[#allocation2 + $0x88] sm:$0xff] %v1307_v10  ;;  %v1349_v27 = vsel %vm5810_vm10, 0, %v1348_v9  ;;  %4699 = vrcp.f32 %v861_v61  ;;  %1392 = vst [vmem:[#allocation2 + $0x190] sm:$0x80] %v1391_v3  ;;  %v6623_v20 = vld [vmem:[#allocation22_spill] sm:$0xff]  ;;  %v6625_v22 = vld [vmem:[#allocation21_spill] sm:$0xff] }
 0x26e   : > { %1350 = vst [vmem:[#allocation2 + $0x40] sm:$0x80] %v1349_v27  ;;  %v1351_v2 = vld [vmem:[#allocation2 + $0x58] sm:$0x80]  ;;  %4701 = vrcp.f32 %v862_v6  ;;  %v4558_v9 = vld [vmem:[#allocation11 + $0x1b0] sm:$0xff]   ;;  %v1195_v27 = vld [vmem:[#allocation2 + $0x90] sm:$0xff] }
 0x26f   : > { %v1352_v49 = vsel %vm5810_vm10, 0, %v1351_v2  ;;  %3843 = vmatpush3.bf16.msra.mxu0 %v4551_v23  ;;  %v4559_v2 = vld [vmem:[#allocation11 + $0x1f8] sm:$0xff]  }
 0x270   : > { %v4690_v26 = vpop.eup %4689  ;;  %1353 = vst [vmem:[#allocation2 + $0x58] sm:$0x80] %v1352_v49  ;;  %3844 = vmatprep.subr.bf16.mxu0 %v4552_v44 }
 0x271   : > { %v1354_v43 = vld [vmem:[#allocation2 + $0x70] sm:$0x80]  ;;  %v952_v62 = vmul.f32 %v4690_v26, %v5681_v55  ;;  %v4530_v26 = vld [vmem:[#allocation11 + $0x10] sm:$0xff]  }
 0x272   : > { %v4692_v21 = vpop.eup %4691  ;;  %v1491_v14 = vld [vmem:[#allocation2 + $0x28] sm:$0xff]  ;;  %1779 = vmatmul.mubr.bf16.gmra.mrb[12].mxu0 %v5938_v50  ;;  %v1355_v39 = vsel %vm5810_vm10, 0, %v1354_v43 }
 0x273   : > { %4058 = vmatprep.mubr.bf16.mxu1 %v1491_v14  ;;  %1786 = vmatprep.mubr.bf16.mxu0 %v5919_v15  ;;  %1356 = vst [vmem:[#allocation2 + $0x70] sm:$0x80] %v1355_v39  ;;  %v953_v28 = vmul.f32 %v4692_v21, %v5684_v57  ;;  %v4694_v5 = vpop.eup %4693  ;;  %v4556_v57 = vld [vmem:[#allocation11 + $0x1f0] sm:$0xff]   ;;  %v1312_v21 = vld [vmem:[#allocation2 + $0xb8] sm:$0xff]  ;;  %v4531_v14 = vld [vmem:[#allocation11 + $0x58] sm:$0xff]  }
 0x274   : > { %v1357_v53 = vld [vmem:[#allocation2 + $0x88] sm:$0x80]  ;;  %3845 = vmatpush3.bf16.msra.mxu0 %v4553_v46  ;;  %v954_v33 = vmul.f32 %v4694_v5, %v5693_v31  ;;  %v959_v31 = vmul.f32 %v6623_v20, %v5567_v47 }
 0x275   : > { %v1358_v55 = vsel %vm5810_vm10, 0, %v1357_v53  ;;  %v4696_v19 = vpop.eup %4695  ;;  %v1494_v37 = vld [vmem:[#allocation2 + $0x40] sm:$0xff]  ;;  %v5974_v17 = vpack.c.bf16 %v953_v28, %v952_v62  ;;  %3846 = vmatprep.subr.bf16.mxu0 %v4554_v4 }
 0x276   : > { %1359 = vst [vmem:[#allocation2 + $0x88] sm:$0x80] %v1358_v55  ;;  %v4698_v25 = vpop.eup %4697  ;;  %4059 = vmatmul.mubr.bf16.vlgmr.msra.gmra.mrb[0].mxu1 %v1494_v37  ;;  %v955_v30 = vmul.f32 %v4696_v19, %v5696_v16  ;;  %v6624_v16 = vld [vmem:[#allocation20_spill] sm:$0xff]  ;;  %v1198_v19 = vld [vmem:[#allocation2 + $0xa8] sm:$0xff] }
 0x277   : > { %v4700_v32 = vpop.eup %4699  ;;  %3701 = vmatpush3.bf16.msra.mxu1 %v4526_v40  ;;  %v1497_v12 = vld [vmem:[#allocation2 + $0x58] sm:$0xff]  ;;  %v1085_v54 = vshrl.u32 %v5974_v17, 16  ;;  %v1088_v38 = vshll.u32 %v5974_v17, 16  ;;  %v956_v48 = vmul.f32 %v4698_v25, %v5706_v41  ;;  %v1309_v41 = vld [vmem:[#allocation2 + $0xa0] sm:$0xff]  ;;  %v4560_v37 = vld [vmem:[#allocation11 + $0x1b8] sm:$0xff]  }
 0x278   : > { %v4702_v42 = vpop.eup %4701  ;;  %4062 = vmatprep.mubr.bf16.mxu1 %v1497_v12  ;;  %3702 = vmatprep.subr.bf16.mxu1 %v4527_v8  ;;  %v5983_v0 = vpack.c.bf16 %v955_v30, %v954_v33  ;;  %v957_v61 = vmul.f32 %v4700_v32, %v6624_v16  ;;  %v1315_v32 = vld [vmem:[#allocation2 + $0xd0] sm:$0xff] }
 0x279   : > { %v1087_v6 = vrot.slane %v1085_v54, 7  ;;  %v1254_v10 = vrot.slane %v1088_v38, 1  ;;  %v958_v23 = vmul.f32 %v4702_v42, %v6625_v22  ;;  %3847 = vmatpush3.bf16.msra.mxu0 %v4555_v58  ;;  %v4532_v12 = vld [vmem:[#allocation11 + $0x18] sm:$0xff]   ;;  %v4533_v42 = vld [vmem:[#allocation11 + $0x60] sm:$0xff]  }
 0x27a   : > { %1787 = vmatmul.mubr.bf16.gmra.mrb[16].mxu0 %v5945_v59  ;;  %v1092_v3 = vshrl.u32 %v5983_v0, 16  ;;  %v1095_v47 = vshll.u32 %v5983_v0, 16  ;;  %v5990_v44 = vpack.c.bf16 %v957_v61, %v956_v48  ;;  %3848 = vmatprep.subr.bf16.mxu0 %v4556_v57  ;;  %v1500_v53 = vld [vmem:[#allocation2 + $0x70] sm:$0xff]  ;;  %v1204_v61 = vld [vmem:[#allocation2 + $0xd8] sm:$0xff] }
 0x27b   : > { %3703 = vmatpush3.bf16.msra.mxu1 %v4528_v1  ;;  %1794 = vmatprep.mubr.bf16.mxu0 %v5926_v7  ;;  %v1255_v49 = vor.u32 %v1254_v10, %v1085_v54  ;;  %v5993_v46 = vpack.c.bf16 %v959_v31, %v958_v23  ;;  %v1090_v43 = vor.u32 %v1088_v38, %v1087_v6  ;;  %v1201_v38 = vld [vmem:[#allocation2 + $0xc0] sm:$0xff]  ;;  %v1318_v31 = vld [vmem:[#allocation2 + $0xe8] sm:$0xff] }
 0x27c   : > { %3704 = vmatprep.subr.bf16.mxu1 %v4529_v18  ;;  %v1094_v62 = vrot.slane %v1092_v3, 7  ;;  %v1256_v4 = vrot.slane %v1095_v47, 1  ;;  %v1099_v39 = vshrl.u32 %v5990_v44, 16  ;;  %v1102_v40 = vshll.u32 %v5990_v44, 16 }
 0x27d   : > { %v1310_v28 = vsel %vm5778_vm9, %v1255_v49, %v1309_v41  ;;  %v1106_v5 = vshrl.u32 %v5993_v46, 16  ;;  %v1109_v8 = vshll.u32 %v5993_v46, 16  ;;  %v6003_v55 = vsel %vm5816_vm11, %v1090_v43, %v1195_v27  ;;  %3849 = vmatpush3.bf16.msra.mxu0 %v4558_v9  ;;  %v1503_v33 = vld [vmem:[#allocation2 + $0x88] sm:$0xff]  ;;  %v4534_v41 = vld [vmem:[#allocation11 + $0x20] sm:$0xff]  }
 0x27e   : > { %4063 = vmatmul.mubr.bf16.gmra.mrb[4].mxu1 %v1500_v53  ;;  %1311 = vst [vmem:[#allocation2 + $0xa0] sm:$0xff] %v1310_v28  ;;  %v1257_v58 = vor.u32 %v1256_v4, %v1092_v3  ;;  %v1101_v25 = vrot.slane %v1099_v39, 7  ;;  %v1258_v30 = vrot.slane %v1102_v40, 1  ;;  %1197 = vst [vmem:[#allocation2 + $0x90] sm:$0xff] %v6003_v55  ;;  %v1097_v57 = vor.u32 %v1095_v47, %v1094_v62  ;;  %v4535_v47 = vld [vmem:[#allocation11 + $0x68] sm:$0xff]   ;;  %v4540_v53 = vld [vmem:[#allocation11 + $0x38] sm:$0xff]  }
 0x27f   : > { %3850 = vmatprep.subr.bf16.mxu0 %v4559_v2  ;;  %4066 = vmatprep.mubr.bf16.mxu1 %v1503_v33  ;;  %v1108_v1 = vrot.slane %v1106_v5, 7  ;;  %v1260_v54 = vrot.slane %v1109_v8, 1  ;;  %v6051_v33 = vld [vmem:[#allocation2 + $0x130] sm:$0xff] }
 0x280   : > { %3705 = vmatpush3.bf16.msra.mxu1 %v4530_v26  ;;  %v1313_v48 = vsel %vm5778_vm9, %v1257_v58, %v1312_v21  ;;  %v1259_v20 = vor.u32 %v1258_v30, %v1099_v39  ;;  %v6010_v18 = vsel %vm5816_vm11, %v1097_v57, %v1198_v19  ;;  %v1104_v16 = vor.u32 %v1102_v40, %v1101_v25  ;;  %v4537_v26 = vld [vmem:[#allocation11 + $0x70] sm:$0xff]   ;;  %v4539_v39 = vld [vmem:[#allocation11 + $0x78] sm:$0xff]   ;;  %v6064_v57 = vld [vmem:[#allocation2 + $0x178] sm:$0xff] }
 0x281   : > { %3706 = vmatprep.subr.bf16.mxu1 %v4531_v14  ;;  %1314 = vst [vmem:[#allocation2 + $0xb8] sm:$0xff] %v1313_v48  ;;  %v1261_v6 = vor.u32 %v1260_v54, %v1106_v5  ;;  %1200 = vst [vmem:[#allocation2 + $0xa8] sm:$0xff] %v6010_v18  ;;  %v1111_v10 = vor.u32 %v1109_v8, %v1108_v1  ;;  %3851 = vmatpush3.bf16.msra.mxu0 %v4560_v37  ;;  %v4538_v14 = vld [vmem:[#allocation11 + $0x30] sm:$0xff]   ;;  %v4543_v5 = vld [vmem:[#allocation11 + $0x80] sm:$0xff]  }
 0x282   : > { %1795 = vmatmul.mubr.bf16.gmra.mrb[20].mxu0 %v5955_v34  ;;  %v1316_v22 = vsel %vm5778_vm9, %v1259_v20, %v1315_v32  ;;  %v6018_v23 = vsel %vm5816_vm11, %v1104_v16, %v1201_v38  ;;  %v6043_v19 = vld [vmem:[#allocation2 + $0x100] sm:$0xff]  ;;  %v6046_v37 = vld [vmem:[#allocation2 + $0x118] sm:$0xff]  ;;  %v6054_v58 = vld [vmem:[#allocation2 + $0x148] sm:$0xff] }
 0x283   : > { %1802 = vmatprep.mubr.bf16.mxu0 %v5974_v17  ;;  %1317 = vst [vmem:[#allocation2 + $0xd0] sm:$0xff] %v1316_v22  ;;  %v1319_v9 = vsel %vm5778_vm9, %v1261_v6, %v1318_v31  ;;  %1203 = vst [vmem:[#allocation2 + $0xc0] sm:$0xff] %v6018_v23  ;;  %v6026_v3 = vsel %vm5816_vm11, %v1111_v10, %v1204_v61  ;;  %v6058_v25 = vld [vmem:[#allocation2 + $0x110] sm:$0xff]  ;;  %v6061_v30 = vld [vmem:[#allocation2 + $0x160] sm:$0xff] }
 0x284   : > { %3707 = vmatpush3.bf16.msra.mxu1 %v4532_v12  ;;  %1320 = vst [vmem:[#allocation2 + $0xe8] sm:$0xff] %v1319_v9  ;;  %1206 = vst [vmem:[#allocation2 + $0xd8] sm:$0xff] %v6026_v3  ;;  %v1536_v32 = vld [vmem:[#allocation2 + $0x190] sm:$0xff]  ;;  %v6071_v12 = vld [vmem:[#allocation2 + $0x8] sm:$0xff] }
 0x285   : > { %3708 = vmatprep.subr.bf16.mxu1 %v4533_v42  ;;  %v1360_v27 = vld [vmem:[#allocation2 + $0xa0] sm:$0x80]  ;;  %v4546_v54 = vld [vmem:[#allocation11 + $0x88] sm:$0xff]   ;;  %v4557_v31 = vld [vmem:[#allocation11 + $0x98] sm:$0xff]  }
 0x286   : > { %v1361_v2 = vsel %vm5810_vm10, 0, %v1360_v27  ;;  %v6075_v1 = vld [vmem:[#allocation2 + $0x140] sm:$0xff]  ;;  %v6080_v20 = vld [vmem:[#allocation2 + $0x158] sm:$0xff]  ;;  %v6085_v61 = vld [vmem:[#allocation2 + $0x170] sm:$0xff] }
 0x287   : > { %1362 = vst [vmem:[#allocation2 + $0xa0] sm:$0x80] %v1361_v2  ;;  %v1397_v38 = vld [vmem:[#allocation2 + $0x20] sm:$0xff]  ;;  %v1396_v42 = vld [vmem:[#allocation2 + $0x18] sm:$0xff]  ;;  %v1399_v10 = vld [vmem:[#allocation2 + $0x30] sm:$0xff] }
 0x288   : > { %3709 = vmatpush3.bf16.msra.mxu1 %v4534_v41  ;;  %v1363_v49 = vld [vmem:[#allocation2 + $0xb8] sm:$0x80]  ;;  %v4549_v48 = vld [vmem:[#allocation11 + $0x90] sm:$0xff]   ;;  %v4561_v16 = vld [vmem:[#allocation11 + $0xa0] sm:$0xff]  }
 0x289   : > { %3710 = vmatprep.subr.bf16.mxu1 %v4535_v47  ;;  %v1364_v29 = vsel %vm5810_vm10, 0, %v1363_v49  ;;  %v4562_v6 = vld [vmem:[#allocation11 + $0xa8] sm:$0xff]   ;;  %v4563_v22 = vld [vmem:[#allocation11 + $0xb0] sm:$0xff]   ;;  %v4564_v9 = vld [vmem:[#allocation11 + $0xb8] sm:$0xff]  }
 0x28a   : > { %1365 = vst [vmem:[#allocation2 + $0xb8] sm:$0x80] %v1364_v29  ;;  %v1366_v43 = vld [vmem:[#allocation2 + $0xd0] sm:$0x80]  ;;  %1803 = vmatmul.mubr.bf16.gmra.mrb[24].mxu0 %v6003_v55  ;;  %v6095_v41 = vld [vmem:[#allocation2 + $0x180] sm:$0xff]  ;;  %v2520_v47 = vld [vmem:[#allocation2 + $0x38] sm:$0xff] }
 0x28b   : > { %v1367_v62 = vsel %vm5810_vm10, 0, %v1366_v43  ;;  %v1369_v4 = vld [vmem:[#allocation2 + $0xe8] sm:$0x80]  ;;  %1810 = vmatprep.mubr.bf16.mxu0 %v5983_v0  ;;  %v6157_v29 = vld [vmem:[#allocation2 + $0x58] sm:$0xff] }
 0x28c   : > { %3711 = vmatpush3.bf16.msra.mxu1 %v4536_v36  ;;  %1368 = vst [vmem:[#allocation2 + $0xd0] sm:$0x80] %v1367_v62  ;;  %v1370_v21 = vsel %vm5810_vm10, 0, %v1369_v4  ;;  %v2526_v27 = vld [vmem:[#allocation2 + $0x68] sm:$0xff]  ;;  %v6160_v62 = vld [vmem:[#allocation2 + $0x70] sm:$0xff] }
 0x28d   : > { %3712 = vmatprep.subr.bf16.mxu1 %v4537_v26  ;;  %1371 = vst [vmem:[#allocation2 + $0xe8] sm:$0x80] %v1370_v21  ;;  %v4567_v36 = vld [vmem:[#allocation11 + $0x210] sm:$0xff]   ;;  %v4568_v49 = vld [vmem:[#allocation11 + $0x218] sm:$0xff]  }
 0x28e   : > { %v1506_v40 = vld [vmem:[#allocation2 + $0xa0] sm:$0xff] }
 0x28f   : > { %4067 = vmatmul.mubr.bf16.gmra.mrb[8].mxu1 %v1506_v40 }
 0x290   : > { %3713 = vmatpush3.bf16.msra.mxu1 %v4538_v14 }
 0x291   : > { %v1509_v28 = vld [vmem:[#allocation2 + $0xb8] sm:$0xff]  ;;  %3714 = vmatprep.subr.bf16.mxu1 %v4539_v39 }
 0x292   : > { %4070 = vmatprep.mubr.bf16.mxu1 %v1509_v28  ;;  %1811 = vmatmul.mubr.bf16.gmra.mrb[28].mxu0 %v6010_v18  ;;  %v4569_v39 = vld [vmem:[#allocation11 + $0x220] sm:$0xff]   ;;  %v6169_v28 = vld [vmem:[#allocation2 + $0x88] sm:$0xff] }
 0x293   : > { %1818 = vmatprep.mubr.bf16.mxu0 %v5990_v44  ;;  %v1512_v51 = vld [vmem:[#allocation2 + $0xd0] sm:$0xff] }
 0x294   : > { %3715 = vmatpush3.bf16.msra.mxu1 %v4540_v53  ;;  %v1515_v8 = vld [vmem:[#allocation2 + $0xe8] sm:$0xff]  ;;  %v4570_v53 = vld [vmem:[#allocation11 + $0x228] sm:$0xff]  }
 0x295   : > { %4090 = vmatprep.subr.bf16.mxu1 %v4543_v5 }
 0x297   : > { %4071 = vmatmul.mubr.bf16.gmra.mrb[12].mxu1 %v1512_v51  ;;  %v6172_v51 = vld [vmem:[#allocation2 + $0xa0] sm:$0xff] }
 0x298   : > { %4074 = vmatprep.mubr.bf16.mxu1 %v1515_v8 }
 0x29a   : > { %1819 = vmatmul.mubr.bf16.gmra.mrb[32].mxu0 %v6018_v23 }
 0x29b   : > { %1826 = vmatprep.mubr.bf16.mxu0 %v5993_v46 }
 0x29f   : > { %4075 = vmatmul.mubr.bf16.gmra.mrb[16].mxu1 %v6043_v19 }
 0x2a0   : > { %4078 = vmatprep.mubr.bf16.mxu1 %v6046_v37 }
 0x2a2   : > { %1827 = vmatmul.mubr.bf16.gmra.mrb[36].mxu0 %v6026_v3 }
 0x2a3   : > { %1834 = vmatprep.mubr.bf16.mxu0 %v5743_v11  ;;  %v6068_v11 = vld [vmem:[#allocation2 + $0x128] sm:$0xff] }
 0x2a7   : > { %4079 = vmatmul.mubr.bf16.gmra.mrb[20].mxu1 %v6051_v33 }
 0x2a8   : > { %4082 = vmatprep.mubr.bf16.mxu1 %v6054_v58 }
 0x2aa   : > { %1835 = vmatmul.mubr.bf16.gmra.mrb[40].mxu0 %v5852_v56 }
 0x2ab   : > { %1842 = vmatprep.mubr.bf16.mxu0 %v6058_v25 }
 0x2af   : > { %4083 = vmatmul.mubr.bf16.gmra.mrb[24].mxu1 %v6061_v30 }
 0x2b0   : > { %4086 = vmatprep.mubr.bf16.mxu1 %v6064_v57 }
 0x2b2   : > { %1843 = vmatmul.mubr.bf16.gmra.mrb[44].mxu0 %v5856_v24 }
 0x2b3   : > { %1850 = vmatprep.mubr.bf16.mxu0 %v6068_v11 }
 0x2b7   : > { %4087 = vmatmul.mubr.bf16.gmra.mrb[28].mxu1 %v1536_v32  ;;  %v4571_v32 = vld [vmem:[#allocation11 + $0x230] sm:$0xff]  }
 0x2b8   : > { %2228 = vmatprep.mubr.bf16.mxu1 %v6071_v12 }
 0x2ba   : > { %1851 = vmatmul.mubr.bf16.gmra.mrb[48].mxu0 %v5865_v45 }
 0x2bb   : > { %1858 = vmatprep.mubr.bf16.mxu0 %v6075_v1 }
 0x2bf   : > { %2229 = vmatmul.mubr.bf16.vlgmr.msra.gmra.mrb[32].mxu1 %v6071_v12 }
 0x2c0   : > { %4091 = vmatpush3.bf16.msra.mxu1 %v4543_v5  ;;  %2236 = vmatprep.mubr.bf16.mxu1 %v1397_v38  ;;  %v6181_v38 = vld [vmem:[#allocation2 + $0xb8] sm:$0xff] }
 0x2c1   : > { %4092 = vmatprep.subr.bf16.mxu1 %v4546_v54 }
 0x2c2   : > { %1859 = vmatmul.mubr.bf16.gmra.mrb[52].mxu0 %v5870_v35 }
 0x2c3   : > { %1866 = vmatprep.mubr.bf16.mxu0 %v6080_v20 }
 0x2c4   : > { %4093 = vmatpush3.bf16.msra.mxu1 %v4546_v54  ;;  %v4572_v54 = vld [vmem:[#allocation11 + $0x238] sm:$0xff]  }
 0x2c5   : > { %4094 = vmatprep.subr.bf16.mxu1 %v4549_v48 }
 0x2c7   : > { %2237 = vmatmul.mubr.bf16.gmra.mrb[36].mxu1 %v1396_v42 }
 0x2c8   : > { %2244 = vmatprep.mubr.bf16.mxu1 %v5894_v60  ;;  %4095 = vmatpush3.bf16.msra.mxu1 %v4549_v48  ;;  %v6090_v60 = vld [vmem:[#allocation2 + $0x188] sm:$0xff] }
 0x2c9   : > { %4096 = vmatprep.subr.bf16.mxu1 %v4557_v31 }
 0x2ca   : > { %1867 = vmatmul.mubr.bf16.gmra.mrb[56].mxu0 %v5883_v13 }
 0x2cb   : > { %1874 = vmatprep.mubr.bf16.mxu0 %v6085_v61 }
 0x2cc   : > { %4097 = vmatpush3.bf16.msra.mxu1 %v4557_v31 }
 0x2cd   : > { %4098 = vmatprep.subr.bf16.mxu1 %v4561_v16 }
 0x2cf   : > { %2245 = vmatmul.mubr.bf16.gmra.mrb[40].mxu1 %v1399_v10 }
 0x2d0   : > { %2252 = vmatprep.mubr.bf16.mxu1 %v5906_v52  ;;  %4099 = vmatpush3.bf16.msra.mxu1 %v4561_v16  ;;  %v6097_v52 = vld [vmem:[#allocation11 + $0x200] sm:$0xff]  }
 0x2d1   : > { %4100 = vmatprep.subr.bf16.mxu1 %v4562_v6 }
 0x2d2   : > { %1875 = vmatmul.mubr.bf16.gmra.mrb[60].mxu0 %v5888_v63 }
 0x2d3   : > { %1882 = vmatprep.mubr.bf16.mxu0 %v6090_v60 }
 0x2d4   : > { %4101 = vmatpush3.bf16.msra.mxu1 %v4562_v6 }
 0x2d5   : > { %4102 = vmatprep.subr.bf16.mxu1 %v4563_v22 }
 0x2d7   : > { %2253 = vmatmul.mubr.bf16.gmra.mrb[44].mxu1 %v5938_v50  ;;  %v2523_v50 = vld [vmem:[#allocation2 + $0x50] sm:$0xff] }
 0x2d8   : > { %2260 = vmatprep.mubr.bf16.mxu1 %v5919_v15  ;;  %4103 = vmatpush3.bf16.msra.mxu1 %v4563_v22  ;;  %v2522_v15 = vld [vmem:[#allocation2 + $0x48] sm:$0xff] }
 0x2d9   : > { %4104 = vmatprep.subr.bf16.mxu1 %v4564_v9 }
 0x2da   : > { %1883 = vmatmul.mubr.bf16.gmra.mrb[64].mxu0 %v6095_v41 }
 0x2db   : > { %2792 = vmatprep.mubr.bf16.mxu0 %v2520_v47 }
 0x2dc   : > { %4105 = vmatpush3.bf16.msra.mxu1 %v4564_v9 }
 0x2dd   : > { %4138 = vmatprep.subr.bf16.mxu1 %v6097_v52 }
 0x2df   : > { %2261 = vmatmul.mubr.bf16.gmra.mrb[48].mxu1 %v5945_v59 }
 0x2e0   : > { %2268 = vmatprep.mubr.bf16.mxu1 %v5926_v7 }
 0x2e2   : > { %2793 = vmatmul.mubr.bf16.vlgmr.msra.gmra.mrb[68].mxu0 %v1399_v10  ;;  %v6192_v10 = vld [vmem:[#allocation2 + $0xe8] sm:$0xff] }
 0x2e3   : > { %2800 = vmatprep.mubr.bf16.mxu0 %v2523_v50 }
 0x2e7   : > { %2269 = vmatmul.mubr.bf16.gmra.mrb[52].mxu1 %v5955_v34 }
 0x2e8   : > { %2276 = vmatprep.mubr.bf16.mxu1 %v5974_v17 }
 0x2ea   : > { %2801 = vmatmul.mubr.bf16.gmra.mrb[72].mxu0 %v2522_v15 }
 0x2eb   : > { %2808 = vmatprep.mubr.bf16.mxu0 %v2526_v27 }
 0x2ef   : > { %2277 = vmatmul.mubr.bf16.gmra.mrb[56].mxu1 %v6003_v55 }
 0x2f0   : > { %2284 = vmatprep.mubr.bf16.mxu1 %v5983_v0 }
 0x2f2   : > { %2809 = vmatmul.mubr.bf16.gmra.mrb[76].mxu0 %v5945_v59  ;;  %v4704_v59 = vld [vmem:[#allocation2 + $0xf8] sm:$0xff] }
 0x2f3   : > { %2816 = vmatprep.mubr.bf16.mxu0 %v5926_v7 }
 0x2f7   : > { %2285 = vmatmul.mubr.bf16.gmra.mrb[60].mxu1 %v6010_v18 }
 0x2f8   : > { %2292 = vmatprep.mubr.bf16.mxu1 %v5990_v44 }
 0x2fa   : > { %2817 = vmatmul.mubr.bf16.gmra.mrb[80].mxu0 %v5955_v34 }
 0x2fb   : > { %2824 = vmatprep.mubr.bf16.mxu0 %v5974_v17 }
 0x2ff   : > { %2293 = vmatmul.mubr.bf16.gmra.mrb[64].mxu1 %v6018_v23 }
 0x300   : > { %2300 = vmatprep.mubr.bf16.mxu1 %v5993_v46 }
 0x302   : > { %2825 = vmatmul.mubr.bf16.gmra.mrb[84].mxu0 %v6003_v55 }
 0x303   : > { %2832 = vmatprep.mubr.bf16.mxu0 %v5983_v0 }
 0x307   : > { %2301 = vmatmul.mubr.bf16.gmra.mrb[68].mxu1 %v6026_v3 }
 0x308   : > { %2308 = vmatprep.mubr.bf16.mxu1 %v4704_v59 }
 0x30a   : > { %2833 = vmatmul.mubr.bf16.gmra.mrb[88].mxu0 %v6010_v18  ;;  %v6147_v18 = vld [vmem:[#allocation2 + $0x40] sm:$0xff] }
 0x30b   : > { %2840 = vmatprep.mubr.bf16.mxu0 %v5990_v44  ;;  %v4566_v44 = vld [vmem:[#allocation11 + $0x208] sm:$0xff]  }
 0x30f   : > { %2309 = vmatmul.mubr.bf16.gmra.mrb[72].mxu1 %v5852_v56 }
 0x310   : > { %2316 = vmatprep.mubr.bf16.mxu1 %v6058_v25 }
 0x312   : > { %2841 = vmatmul.mubr.bf16.gmra.mrb[92].mxu0 %v6018_v23 }
 0x313   : > { %2848 = vmatprep.mubr.bf16.mxu0 %v5993_v46  ;;  %v1398_v46 = vld [vmem:[#allocation2 + $0x28] sm:$0xff] }
 0x317   : > { %2317 = vmatmul.mubr.bf16.gmra.mrb[76].mxu1 %v5856_v24 }
 0x318   : > { %2324 = vmatprep.mubr.bf16.mxu1 %v6068_v11 }
 0x31a   : > { %2849 = vmatmul.mubr.bf16.gmra.mrb[96].mxu0 %v6026_v3 }
 0x31b   : > { %2856 = vmatprep.mubr.bf16.mxu0 %v4704_v59 }
 0x31f   : > { %2325 = vmatmul.mubr.bf16.gmra.mrb[80].mxu1 %v5865_v45 }
 0x320   : > { %2332 = vmatprep.mubr.bf16.mxu1 %v6075_v1 }
 0x322   : > { %2857 = vmatmul.mubr.bf16.gmra.mrb[100].mxu0 %v5852_v56 }
 0x323   : > { %2864 = vmatprep.mubr.bf16.mxu0 %v6058_v25 }
 0x327   : > { %2333 = vmatmul.mubr.bf16.gmra.mrb[84].mxu1 %v5870_v35 }
 0x328   : > { %2340 = vmatprep.mubr.bf16.mxu1 %v6080_v20 }
 0x32a   : > { %2865 = vmatmul.mubr.bf16.gmra.mrb[104].mxu0 %v5856_v24 }
 0x32b   : > { %2872 = vmatprep.mubr.bf16.mxu0 %v6068_v11 }
 0x32f   : > { %2341 = vmatmul.mubr.bf16.gmra.mrb[88].mxu1 %v5883_v13 }
 0x330   : > { %2348 = vmatprep.mubr.bf16.mxu1 %v6085_v61 }
 0x332   : > { %2873 = vmatmul.mubr.bf16.gmra.mrb[108].mxu0 %v5865_v45 }
 0x333   : > { %2880 = vmatprep.mubr.bf16.mxu0 %v6075_v1 }
 0x335   : > { %v3580_v7 = vpop.f32.mrb[4].mxu0 }
 0x336   : > { %v3581_v56 = vpop.f32.mrb[5].mxu0 }
 0x337   : > { %2349 = vmatmul.mubr.bf16.gmra.mrb[92].mxu1 %v5888_v63  ;;  %v6140_v34 = vadd.f32 %v3581_v56, %v3580_v7  ;;  %v3583_v17 = vpop.f32.mrb[6].mxu0 }
 0x338   : > { %4106 = vmatprep.mubr.bf16.mxu1 %v6071_v12  ;;  %v3584_v24 = vpop.f32.mrb[7].mxu0 }
 0x339   : > { %v6143_v0 = vadd.f32 %v3584_v24, %v3583_v17 }
 0x33a   : > { %2881 = vmatmul.mubr.bf16.gmra.mrb[112].mxu0 %v5870_v35 }
 0x33b   : > { %2888 = vmatprep.mubr.bf16.mxu0 %v6080_v20  ;;  %v6184_v20 = vld [vmem:[#allocation2 + $0xd0] sm:$0xff] }
 0x33d   : > { %v3586_v45 = vpop.f32.mrb[8].mxu0 }
 0x33e   : > { %v3587_v55 = vpop.f32.mrb[9].mxu0 }
 0x33f   : > { %4107 = vmatmul.mubr.bf16.vlgmr.msra.gmra.mrb[0].mxu1 %v1398_v46  ;;  %v6149_v23 = vadd.f32 %v3587_v55, %v3586_v45  ;;  %v3589_v3 = vpop.f32.mrb[10].mxu0 }
 0x340   : > { %4139 = vmatpush3.bf16.msra.mxu1 %v6097_v52  ;;  %4110 = vmatprep.mubr.bf16.mxu1 %v6147_v18  ;;  %v3590_v2 = vpop.f32.mrb[11].mxu0 }
 0x341   : > { %4140 = vmatprep.subr.bf16.mxu1 %v4566_v44  ;;  %v6153_v35 = vadd.f32 %v3590_v2, %v3589_v3 }
 0x342   : > { %2889 = vmatmul.mubr.bf16.gmra.mrb[116].mxu0 %v5883_v13 }
 0x343   : > { %2896 = vmatprep.mubr.bf16.mxu0 %v6085_v61 }
 0x344   : > { %4141 = vmatpush3.bf16.msra.mxu1 %v4566_v44 }
 0x345   : > { %4142 = vmatprep.subr.bf16.mxu1 %v4567_v36  ;;  %v3592_v26 = vpop.f32.mrb[12].mxu0 }
 0x346   : > { %v3593_v43 = vpop.f32.mrb[13].mxu0 }
 0x347   : > { %4111 = vmatmul.mubr.bf16.gmra.mrb[4].mxu1 %v6157_v29  ;;  %v6162_v4 = vadd.f32 %v3593_v43, %v3592_v26  ;;  %v3595_v21 = vpop.f32.mrb[14].mxu0 }
 0x348   : > { %4114 = vmatprep.mubr.bf16.mxu1 %v6160_v62  ;;  %4143 = vmatpush3.bf16.msra.mxu1 %v4567_v36  ;;  %v3596_v13 = vpop.f32.mrb[15].mxu0 }
 0x349   : > { %4144 = vmatprep.subr.bf16.mxu1 %v4568_v49  ;;  %v6165_v14 = vadd.f32 %v3596_v13, %v3595_v21 }
 0x34a   : > { %2897 = vmatmul.mubr.bf16.gmra.mrb[120].mxu0 %v5888_v63 }
 0x34b   : > { %2904 = vmatprep.mubr.bf16.mxu0 %v6090_v60 }
 0x34c   : > { %4145 = vmatpush3.bf16.msra.mxu1 %v4568_v49 }
 0x34d   : > { %4146 = vmatprep.subr.bf16.mxu1 %v4569_v39  ;;  %v3598_v40 = vpop.f32.mrb[16].mxu0 }
 0x34e   : > { %v3599_v5 = vpop.f32.mrb[17].mxu0 }
 0x34f   : > { %4115 = vmatmul.mubr.bf16.gmra.mrb[8].mxu1 %v6169_v28  ;;  %v6174_v8 = vadd.f32 %v3599_v5, %v3598_v40  ;;  %v3601_v25 = vpop.f32.mrb[18].mxu0 }
 0x350   : > { %4118 = vmatprep.mubr.bf16.mxu1 %v6172_v51  ;;  %4147 = vmatpush3.bf16.msra.mxu1 %v4569_v39  ;;  %v3602_v63 = vpop.f32.mrb[19].mxu0 }
 0x351   : > { %v6177_v11 = vadd.f32 %v3602_v63, %v3601_v25  ;;  %4148 = vmatprep.subr.bf16.mxu1 %v4570_v53 }
 0x352   : > { %2905 = vmatmul.mubr.bf16.gmra.mrb[124].mxu0 %v6095_v41 }
 0x353   : > { %2912 = vmatprep.mubr.bf16.mxu0 %v6071_v12 }
 0x354   : > { %4149 = vmatpush3.bf16.msra.mxu1 %v4570_v53 }
 0x355   : > { %v3604_v1 = vpop.f32.mrb[20].mxu0  ;;  %4150 = vmatprep.subr.bf16.mxu1 %v4571_v32 }
 0x356   : > { %v3605_v48 = vpop.f32.mrb[21].mxu0 }
 0x357   : > { %4119 = vmatmul.mubr.bf16.gmra.mrb[12].mxu1 %v6181_v38  ;;  %v6186_v31 = vadd.f32 %v3605_v48, %v3604_v1  ;;  %v3607_v42 = vpop.f32.mrb[22].mxu0 }
 0x358   : > { %4122 = vmatprep.mubr.bf16.mxu1 %v6184_v20  ;;  %v3608_v16 = vpop.f32.mrb[23].mxu0  ;;  %4151 = vmatpush3.bf16.msra.mxu1 %v4571_v32 }
 0x359   : > { %v6189_v61 = vadd.f32 %v3608_v16, %v3607_v42  ;;  %4152 = vmatprep.subr.bf16.mxu1 %v4572_v54 }
 0x35a   : > { %2913 = vmatmul.mubr.bf16.gmra.mrb[128].mxu0 %v6071_v12 }
 0x35c   : > { %4153 = vmatpush3.bf16.msra.mxu1 %v4572_v54 }
 0x35d   : > { %v3610_v6 = vpop.f32.mrb[24].mxu0 }
 0x35e   : > { %v3611_v22 = vpop.f32.mrb[25].mxu0 }
 0x35f   : > { %4123 = vmatmul.mubr.bf16.gmra.mrb[16].mxu1 %v6192_v10  ;;  %v6195_v60 = vadd.f32 %v3611_v22, %v3610_v6  ;;  %v3613_v9 = vpop.f32.mrb[26].mxu0 }
 0x360   : > { %4126 = vmatprep.mubr.bf16.mxu1 %v6043_v19  ;;  %v3614_v41 = vpop.f32.mrb[27].mxu0 }
 0x361   : > { %v6198_v52 = vadd.f32 %v3614_v41, %v3613_v9 }
 0x365   : > { %v3616_v47 = vpop.f32.mrb[28].mxu0 }
 0x366   : > { %v3617_v50 = vpop.f32.mrb[29].mxu0 }
 0x367   : > { %4127 = vmatmul.mubr.bf16.gmra.mrb[20].mxu1 %v6046_v37  ;;  %v6201_v15 = vadd.f32 %v3617_v50, %v3616_v47  ;;  %v3619_v27 = vpop.f32.mrb[30].mxu0 }
 0x368   : > { %4130 = vmatprep.mubr.bf16.mxu1 %v6051_v33  ;;  %v3620_v59 = vpop.f32.mrb[31].mxu0 }
 0x369   : > { %v6204_v7 = vadd.f32 %v3620_v59, %v3619_v27 }
 0x36d   : > { %v3622_v56 = vpop.f32.mrb[32].mxu0 }
 0x36e   : > { %v3623_v17 = vpop.f32.mrb[33].mxu0 }
 0x36f   : > { %4131 = vmatmul.mubr.bf16.gmra.mrb[24].mxu1 %v6054_v58  ;;  %v6207_v19 = vadd.f32 %v3623_v17, %v3622_v56  ;;  %v3625_v24 = vpop.f32.mrb[34].mxu0 }
 0x370   : > { %4134 = vmatprep.mubr.bf16.mxu1 %v6061_v30  ;;  %v3626_v44 = vpop.f32.mrb[35].mxu0 }
 0x371   : > { %v6210_v45 = vadd.f32 %v3626_v44, %v3625_v24  ;;  %v2548_v44 = vld [vmem:[#allocation2 + $0x118] sm:$0xff] }
 0x375   : > { %v3628_v37 = vpop.f32.mrb[36].mxu0 }
 0x376   : > { %v3629_v46 = vpop.f32.mrb[37].mxu0 }
 0x377   : > { %4135 = vmatmul.mubr.bf16.gmra.mrb[28].mxu1 %v6064_v57  ;;  %v6213_v33 = vadd.f32 %v3629_v46, %v3628_v37  ;;  %v3631_v55 = vpop.f32.mrb[38].mxu0  ;;  %v2551_v46 = vld [vmem:[#allocation2 + $0x130] sm:$0xff] }
 0x378   : > { %4154 = vmatprep.mubr.bf16.mxu1 %v6147_v18  ;;  %v3632_v3 = vpop.f32.mrb[39].mxu0 }
 0x379   : > { %v6216_v2 = vadd.f32 %v3632_v3, %v3631_v55 }
 0x37d   : > { %v3634_v58 = vpop.f32.mrb[40].mxu0 }
 0x37e   : > { %v3635_v36 = vpop.f32.mrb[41].mxu0 }
 0x37f   : > { %4155 = vmatmul.mubr.bf16.vlgmr.msra.gmra.mrb[0].mxu1 %v6157_v29  ;;  %v6219_v30 = vadd.f32 %v3635_v36, %v3634_v58  ;;  %v3637_v49 = vpop.f32.mrb[42].mxu0 }
 0x380   : > { %4158 = vmatprep.mubr.bf16.mxu1 %v6160_v62  ;;  %v3638_v26 = vpop.f32.mrb[43].mxu0 }
 0x381   : > { %v6222_v43 = vadd.f32 %v3638_v26, %v3637_v49 }
 0x385   : > { %v3640_v57 = vpop.f32.mrb[44].mxu0 }
 0x386   : > { %v3641_v21 = vpop.f32.mrb[45].mxu0 }
 0x387   : > { %4159 = vmatmul.mubr.bf16.gmra.mrb[4].mxu1 %v6169_v28  ;;  %v6225_v18 = vadd.f32 %v3641_v21, %v3640_v57  ;;  %v3643_v13 = vpop.f32.mrb[46].mxu0 }
 0x388   : > { %4162 = vmatprep.mubr.bf16.mxu1 %v6172_v51  ;;  %v3644_v39 = vpop.f32.mrb[47].mxu0 }
 0x389   : > { %v6228_v40 = vadd.f32 %v3644_v39, %v3643_v13 }
 0x38d   : > { %v3646_v29 = vpop.f32.mrb[48].mxu0 }
 0x38e   : > { %v3647_v53 = vpop.f32.mrb[49].mxu0 }
 0x38f   : > { %4163 = vmatmul.mubr.bf16.gmra.mrb[8].mxu1 %v6181_v38  ;;  %v6231_v62 = vadd.f32 %v3647_v53, %v3646_v29  ;;  %v3649_v5 = vpop.f32.mrb[50].mxu0  ;;  %v2545_v38 = vld [vmem:[#allocation2 + $0x100] sm:$0xff]  ;;  %v2554_v53 = vld [vmem:[#allocation2 + $0x148] sm:$0xff] }
 0x390   : > { %4166 = vmatprep.mubr.bf16.mxu1 %v6184_v20  ;;  %v3650_v25 = vpop.f32.mrb[51].mxu0 }
 0x391   : > { %v6234_v63 = vadd.f32 %v3650_v25, %v3649_v5  ;;  %v2557_v25 = vld [vmem:[#allocation2 + $0x160] sm:$0xff] }
 0x392   : > { %v3716_v28 = vpop.f32.mrb[32].mxu1 }
 0x393   : > { %v3717_v32 = vpop.f32.mrb[33].mxu1 }
 0x394   : > { %v3718_v1 = vadd.f32 %v3717_v32, %v3716_v28  ;;  %v3719_v54 = vpop.f32.mrb[34].mxu1 }
 0x395   : > { %v3720_v51 = vpop.f32.mrb[35].mxu1  ;;  %v3652_v48 = vpop.f32.mrb[52].mxu0 }
 0x396   : > { %v6237_v42 = vadd.f32 %v3718_v1, %v6140_v34  ;;  %v3721_v16 = vadd.f32 %v3720_v51, %v3719_v54  ;;  %v3653_v6 = vpop.f32.mrb[53].mxu0 }
 0x397   : > { %4167 = vmatmul.mubr.bf16.gmra.mrb[12].mxu1 %v6192_v10  ;;  %v6240_v22 = vadd.f32 %v3653_v6, %v3652_v48  ;;  %v3655_v20 = vpop.f32.mrb[54].mxu0 }
 0x398   : > { %v6243_v9 = vadd.f32 %v3721_v16, %v6143_v0  ;;  %4170 = vmatprep.mubr.bf16.mxu1 %v2545_v38  ;;  %v3656_v41 = vpop.f32.mrb[55].mxu0 }
 0x399   : > { %v6245_v47 = vadd.f32 %v3656_v41, %v3655_v20 }
 0x39a   : > { %v3722_v50 = vpop.f32.mrb[36].mxu1 }
 0x39b   : > { %v3723_v27 = vpop.f32.mrb[37].mxu1 }
 0x39c   : > { %v3724_v59 = vadd.f32 %v3723_v27, %v3722_v50  ;;  %v3725_v34 = vpop.f32.mrb[38].mxu1  ;;  %v2560_v50 = vld [vmem:[#allocation2 + $0x178] sm:$0xff] }
 0x39d   : > { %v3726_v56 = vpop.f32.mrb[39].mxu1  ;;  %v3658_v17 = vpop.f32.mrb[56].mxu0 }
 0x39e   : > { %v6248_v24 = vadd.f32 %v3724_v59, %v6149_v23  ;;  %v3727_v10 = vadd.f32 %v3726_v56, %v3725_v34  ;;  %v3659_v37 = vpop.f32.mrb[57].mxu0  ;;  %v2563_v59 = vld [vmem:[#allocation2 + $0x190] sm:$0xff] }
 0x39f   : > { %4171 = vmatmul.mubr.bf16.gmra.mrb[16].mxu1 %v2548_v44  ;;  %v6250_v0 = vadd.f32 %v3659_v37, %v3658_v17  ;;  %v3661_v55 = vpop.f32.mrb[58].mxu0 }
 0x3a0   : > { %v6253_v3 = vadd.f32 %v3727_v10, %v6153_v35  ;;  %4174 = vmatprep.mubr.bf16.mxu1 %v2551_v46  ;;  %v3662_v58 = vpop.f32.mrb[59].mxu0 }
 0x3a1   : > { %v6255_v36 = vadd.f32 %v3662_v58, %v3661_v55 }
 0x3a2   : > { %v3728_v49 = vpop.f32.mrb[40].mxu1 }
 0x3a3   : > { %v3729_v26 = vpop.f32.mrb[41].mxu1 }
 0x3a4   : > { %v3730_v57 = vadd.f32 %v3729_v26, %v3728_v49  ;;  %v3731_v23 = vpop.f32.mrb[42].mxu1 }
 0x3a5   : > { %v3732_v21 = vpop.f32.mrb[43].mxu1  ;;  %v3664_v13 = vpop.f32.mrb[60].mxu0 }
 0x3a6   : > { %v6258_v39 = vadd.f32 %v3730_v57, %v6162_v4  ;;  %v3733_v29 = vadd.f32 %v3732_v21, %v3731_v23  ;;  %v3665_v5 = vpop.f32.mrb[61].mxu0 }
 0x3a7   : > { %4175 = vmatmul.mubr.bf16.gmra.mrb[20].mxu1 %v2554_v53  ;;  %v6260_v35 = vadd.f32 %v3665_v5, %v3664_v13  ;;  %v3667_v28 = vpop.f32.mrb[62].mxu0 }
 0x3a8   : > { %v6263_v32 = vadd.f32 %v3733_v29, %v6165_v14  ;;  %4178 = vmatprep.mubr.bf16.mxu1 %v2557_v25  ;;  %v3668_v1 = vpop.f32.mrb[63].mxu0 }
 0x3a9   : > { %v6265_v54 = vadd.f32 %v3668_v1, %v3667_v28 }
 0x3aa   : > { %v3734_v51 = vpop.f32.mrb[44].mxu1 }
 0x3ab   : > { %v3735_v48 = vpop.f32.mrb[45].mxu1 }
 0x3ac   : > { %v3736_v16 = vadd.f32 %v3735_v48, %v3734_v51  ;;  %v3737_v4 = vpop.f32.mrb[46].mxu1 }
 0x3ad   : > { %v3738_v6 = vpop.f32.mrb[47].mxu1  ;;  %v3670_v38 = vpop.f32.mrb[64].mxu0 }
 0x3ae   : > { %v6268_v20 = vadd.f32 %v3736_v16, %v6174_v8  ;;  %v3739_v41 = vadd.f32 %v3738_v6, %v3737_v4  ;;  %v3671_v27 = vpop.f32.mrb[65].mxu0 }
 0x3af   : > { %4179 = vmatmul.mubr.bf16.gmra.mrb[24].mxu1 %v2560_v50  ;;  %v6270_v14 = vadd.f32 %v3671_v27, %v3670_v38  ;;  %v3673_v34 = vpop.f32.mrb[66].mxu0 }
 0x3b0   : > { %v6273_v56 = vadd.f32 %v3739_v41, %v6177_v11  ;;  %4182 = vmatprep.mubr.bf16.mxu1 %v2563_v59  ;;  %v3674_v17 = vpop.f32.mrb[67].mxu0 }
 0x3b1   : > { %v6275_v10 = vadd.f32 %v3674_v17, %v3673_v34 }
 0x3b2   : > { %v3740_v44 = vpop.f32.mrb[48].mxu1 }
 0x3b3   : > { %v3741_v37 = vpop.f32.mrb[49].mxu1 }
 0x3b4   : > { %v3742_v46 = vadd.f32 %v3741_v37, %v3740_v44  ;;  %v3743_v8 = vpop.f32.mrb[50].mxu1 }
 0x3b5   : > { %v3744_v55 = vpop.f32.mrb[51].mxu1  ;;  %v3852_v58 = vpop.f32.mrb[68].mxu0 }
 0x3b6   : > { %v6278_v49 = vadd.f32 %v3742_v46, %v6186_v31  ;;  %v3745_v26 = vadd.f32 %v3744_v55, %v3743_v8  ;;  %v3853_v57 = vpop.f32.mrb[69].mxu0 }
 0x3b7   : > { %4183 = vmatmul.mubr.bf16.gmra.mrb[28].mxu1 %v6071_v12  ;;  %v3854_v23 = vadd.f32 %v3853_v57, %v3852_v58  ;;  %v3855_v11 = vpop.f32.mrb[70].mxu0 }
 0x3b8   : > { %v6282_v21 = vadd.f32 %v3745_v26, %v6189_v61  ;;  %v3856_v13 = vpop.f32.mrb[71].mxu0 }
 0x3b9   : > { %v3857_v29 = vadd.f32 %v3856_v13, %v3855_v11  ;;  %v6285_v53 = vadd.f32 %v6237_v42, %v3854_v23 }
 0x3ba   : > { %v3746_v5 = vpop.f32.mrb[52].mxu1 }
 0x3bb   : > { %v3747_v25 = vpop.f32.mrb[53].mxu1  ;;  %v6288_v28 = vadd.f32 %v6243_v9, %v3857_v29 }
 0x3bc   : > { %v3748_v31 = vadd.f32 %v3747_v25, %v3746_v5  ;;  %v3749_v1 = vpop.f32.mrb[54].mxu1 }
 0x3bd   : > { %v3750_v51 = vpop.f32.mrb[55].mxu1  ;;  %v3858_v48 = vpop.f32.mrb[72].mxu0 }
 0x3be   : > { %v6291_v12 = vadd.f32 %v3748_v31, %v6195_v60  ;;  %v3751_v16 = vadd.f32 %v3750_v51, %v3749_v1  ;;  %v3859_v61 = vpop.f32.mrb[73].mxu0 }
 0x3bf   : > { %v3860_v4 = vadd.f32 %v3859_v61, %v3858_v48  ;;  %v3861_v6 = vpop.f32.mrb[74].mxu0 }
 0x3c0   : > { %v6294_v38 = vadd.f32 %v3751_v16, %v6198_v52  ;;  %v3862_v42 = vpop.f32.mrb[75].mxu0 }
 0x3c1   : > { %v3863_v41 = vadd.f32 %v3862_v42, %v3861_v6  ;;  %v6297_v50 = vadd.f32 %v6248_v24, %v3860_v4 }
 0x3c2   : > { %v3752_v9 = vpop.f32.mrb[56].mxu1 }
 0x3c3   : > { %v3753_v27 = vpop.f32.mrb[57].mxu1  ;;  %v6300_v59 = vadd.f32 %v6253_v3, %v3863_v41 }
 0x3c4   : > { %v3754_v34 = vadd.f32 %v3753_v27, %v3752_v9  ;;  %v3755_v60 = vpop.f32.mrb[58].mxu1 }
 0x3c5   : > { %v3756_v17 = vpop.f32.mrb[59].mxu1  ;;  %v3864_v44 = vpop.f32.mrb[76].mxu0 }
 0x3c6   : > { %v6303_v37 = vadd.f32 %v3754_v34, %v6201_v15  ;;  %v3757_v46 = vadd.f32 %v3756_v17, %v3755_v60  ;;  %v3865_v52 = vpop.f32.mrb[77].mxu0 }
 0x3c7   : > { %v3866_v8 = vadd.f32 %v3865_v52, %v3864_v44  ;;  %v3867_v55 = vpop.f32.mrb[78].mxu0 }
 0x3c8   : > { %v6306_v58 = vadd.f32 %v3757_v46, %v6204_v7  ;;  %v3868_v24 = vpop.f32.mrb[79].mxu0 }
 0x3c9   : > { %v3869_v26 = vadd.f32 %v3868_v24, %v3867_v55  ;;  %v6309_v57 = vadd.f32 %v6258_v39, %v3866_v8 }
 0x3ca   : > { %v3758_v3 = vpop.f32.mrb[60].mxu1 }
 0x3cb   : > { %v3759_v23 = vpop.f32.mrb[61].mxu1  ;;  %v6312_v11 = vadd.f32 %v6263_v32, %v3869_v26 }
 0x3cc   : > { %v3760_v13 = vadd.f32 %v3759_v23, %v3758_v3  ;;  %v3761_v15 = vpop.f32.mrb[62].mxu1 }
 0x3cd   : > { %v3762_v29 = vpop.f32.mrb[63].mxu1  ;;  %v3870_v5 = vpop.f32.mrb[80].mxu0 }
 0x3ce   : > { %v6315_v25 = vadd.f32 %v3760_v13, %v6207_v19  ;;  %v3763_v31 = vadd.f32 %v3762_v29, %v3761_v15  ;;  %v3871_v7 = vpop.f32.mrb[81].mxu0 }
 0x3cf   : > { %v3872_v1 = vadd.f32 %v3871_v7, %v3870_v5  ;;  %v3873_v51 = vpop.f32.mrb[82].mxu0 }
 0x3d0   : > { %v6318_v48 = vadd.f32 %v3763_v31, %v6210_v45  ;;  %v3874_v39 = vpop.f32.mrb[83].mxu0 }
 0x3d1   : > { %v3875_v16 = vadd.f32 %v3874_v39, %v3873_v51  ;;  %v6321_v61 = vadd.f32 %v6268_v20, %v3872_v1 }
 0x3d2   : > { %v3764_v32 = vpop.f32.mrb[64].mxu1 }
 0x3d3   : > { %v3765_v4 = vpop.f32.mrb[65].mxu1  ;;  %v6324_v6 = vadd.f32 %v6273_v56, %v3875_v16 }
 0x3d4   : > { %v3766_v42 = vadd.f32 %v3765_v4, %v3764_v32  ;;  %v3767_v19 = vpop.f32.mrb[66].mxu1 }
 0x3d5   : > { %v3768_v41 = vpop.f32.mrb[67].mxu1  ;;  %v3876_v9 = vpop.f32.mrb[84].mxu0 }
 0x3d6   : > { %v6327_v27 = vadd.f32 %v3766_v42, %v6213_v33  ;;  %v3769_v34 = vadd.f32 %v3768_v41, %v3767_v19  ;;  %v3877_v45 = vpop.f32.mrb[85].mxu0 }
 0x3d7   : > { %v3878_v60 = vadd.f32 %v3877_v45, %v3876_v9  ;;  %v3879_v17 = vpop.f32.mrb[86].mxu0 }
 0x3d8   : > { %v6330_v44 = vadd.f32 %v3769_v34, %v6216_v2  ;;  %v3880_v20 = vpop.f32.mrb[87].mxu0 }
 0x3d9   : > { %v3881_v46 = vadd.f32 %v3880_v20, %v3879_v17  ;;  %v6333_v52 = vadd.f32 %v6278_v49, %v3878_v60 }
 0x3da   : > { %v3770_v56 = vpop.f32.mrb[68].mxu1 }
 0x3db   : > { %v3771_v8 = vpop.f32.mrb[69].mxu1  ;;  %v6336_v55 = vadd.f32 %v6282_v21, %v3881_v46 }
 0x3dc   : > { %v3772_v24 = vadd.f32 %v3771_v8, %v3770_v56  ;;  %v3773_v33 = vpop.f32.mrb[70].mxu1 }
 0x3dd   : > { %v3774_v26 = vpop.f32.mrb[71].mxu1  ;;  %v3882_v3 = vpop.f32.mrb[88].mxu0 }
 0x3de   : > { %v6339_v23 = vadd.f32 %v3772_v24, %v6219_v30  ;;  %v3775_v13 = vadd.f32 %v3774_v26, %v3773_v33  ;;  %v3883_v2 = vpop.f32.mrb[89].mxu0 }
 0x3df   : > { %v3884_v15 = vadd.f32 %v3883_v2, %v3882_v3  ;;  %v3885_v29 = vpop.f32.mrb[90].mxu0 }
 0x3e0   : > { %v6342_v5 = vadd.f32 %v3775_v13, %v6222_v43  ;;  %v3886_v49 = vpop.f32.mrb[91].mxu0 }
 0x3e1   : > { %v3887_v31 = vadd.f32 %v3886_v49, %v3885_v29  ;;  %v6345_v7 = vadd.f32 %v6291_v12, %v3884_v15 }
 0x3e2   : > { %v3776_v21 = vpop.f32.mrb[72].mxu1 }
 0x3e3   : > { %v3777_v1 = vpop.f32.mrb[73].mxu1  ;;  %v6348_v51 = vadd.f32 %v6294_v38, %v3887_v31 }
 0x3e4   : > { %v3778_v39 = vadd.f32 %v3777_v1, %v3776_v21  ;;  %v3779_v30 = vpop.f32.mrb[74].mxu1 }
 0x3e5   : > { %v3780_v16 = vpop.f32.mrb[75].mxu1  ;;  %v3888_v32 = vpop.f32.mrb[92].mxu0 }
 0x3e6   : > { %v6351_v4 = vadd.f32 %v3778_v39, %v6225_v18  ;;  %v3781_v42 = vadd.f32 %v3780_v16, %v3779_v30  ;;  %v3889_v43 = vpop.f32.mrb[93].mxu0 }
 0x3e7   : > { %v3890_v19 = vadd.f32 %v3889_v43, %v3888_v32  ;;  %v3891_v41 = vpop.f32.mrb[94].mxu0 }
 0x3e8   : > { %v6354_v9 = vadd.f32 %v3781_v42, %v6228_v40  ;;  %v3892_v12 = vpop.f32.mrb[95].mxu0 }
 0x3e9   : > { %v3893_v34 = vadd.f32 %v3892_v12, %v3891_v41  ;;  %v6357_v45 = vadd.f32 %v6303_v37, %v3890_v19 }
 0x3ea   : > { %v3782_v38 = vpop.f32.mrb[76].mxu1 }
 0x3eb   : > { %v3783_v60 = vpop.f32.mrb[77].mxu1  ;;  %v6360_v17 = vadd.f32 %v6306_v58, %v3893_v34 }
 0x3ec   : > { %v3784_v20 = vadd.f32 %v3783_v60, %v3782_v38  ;;  %v3785_v18 = vpop.f32.mrb[78].mxu1 }
 0x3ed   : > { %v3786_v46 = vpop.f32.mrb[79].mxu1  ;;  %v3894_v56 = vpop.f32.mrb[96].mxu0 }
 0x3ee   : > { %v6363_v8 = vadd.f32 %v3784_v20, %v6231_v62  ;;  %v3787_v24 = vadd.f32 %v3786_v46, %v3785_v18  ;;  %v3895_v40 = vpop.f32.mrb[97].mxu0 }
 0x3ef   : > { %v3896_v33 = vadd.f32 %v3895_v40, %v3894_v56  ;;  %v3897_v26 = vpop.f32.mrb[98].mxu0 }
 0x3f0   : > { %v6366_v3 = vadd.f32 %v3787_v24, %v6234_v63  ;;  %v3898_v37 = vpop.f32.mrb[99].mxu0 }
 0x3f1   : > { %v3899_v13 = vadd.f32 %v3898_v37, %v3897_v26  ;;  %v6369_v2 = vadd.f32 %v6315_v25, %v3896_v33 }
 0x3f2   : > { %v3788_v58 = vpop.f32.mrb[80].mxu1 }
 0x3f3   : > { %v3789_v15 = vpop.f32.mrb[81].mxu1  ;;  %v6372_v29 = vadd.f32 %v6318_v48, %v3899_v13 }
 0x3f4   : > { %v3790_v49 = vadd.f32 %v3789_v15, %v3788_v58  ;;  %v3791_v62 = vpop.f32.mrb[82].mxu1 }
 0x3f5   : > { %v3792_v31 = vpop.f32.mrb[83].mxu1  ;;  %v3900_v21 = vpop.f32.mrb[100].mxu0 }
 0x3f6   : > { %v6375_v1 = vadd.f32 %v3790_v49, %v6240_v22  ;;  %v3793_v39 = vadd.f32 %v3792_v31, %v3791_v62  ;;  %v3901_v63 = vpop.f32.mrb[101].mxu0 }
 0x3f7   : > { %v3902_v30 = vadd.f32 %v3901_v63, %v3900_v21  ;;  %v3903_v16 = vpop.f32.mrb[102].mxu0 }
 0x3f8   : > { %v4315_v32 = vadd.f32 %v3793_v39, %v6245_v47  ;;  %v3904_v25 = vpop.f32.mrb[103].mxu0 }
 0x3f9   : > { %v3905_v42 = vadd.f32 %v3904_v25, %v3903_v16  ;;  %v6379_v43 = vadd.f32 %v6327_v27, %v3902_v30 }
 0x3fa   : > { %v3794_v48 = vpop.f32.mrb[84].mxu1 }
 0x3fb   : > { %v3795_v19 = vpop.f32.mrb[85].mxu1  ;;  %v6382_v41 = vadd.f32 %v6330_v44, %v3905_v42 }
 0x3fc   : > { %v3796_v12 = vadd.f32 %v3795_v19, %v3794_v48  ;;  %v3797_v34 = vpop.f32.mrb[86].mxu1 }
 0x3fd   : > { %v3798_v22 = vpop.f32.mrb[87].mxu1  ;;  %v3906_v38 = vpop.f32.mrb[104].mxu0 }
 0x3fe   : > { %v4306_v60 = vadd.f32 %v3796_v12, %v6250_v0  ;;  %v3799_v20 = vadd.f32 %v3798_v22, %v3797_v34  ;;  %v3907_v18 = vpop.f32.mrb[105].mxu0 }
 0x3ff   : > { %v3908_v46 = vadd.f32 %v3907_v18, %v3906_v38  ;;  %v3909_v47 = vpop.f32.mrb[106].mxu0 }
 0x400   : > { %v4312_v56 = vadd.f32 %v3799_v20, %v6255_v36  ;;  %v3910_v24 = vpop.f32.mrb[107].mxu0 }
 0x401   : > { %v3911_v27 = vadd.f32 %v3910_v24, %v3909_v47  ;;  %v6387_v40 = vadd.f32 %v6339_v23, %v3908_v46 }
 0x402   : > { %v3800_v33 = vpop.f32.mrb[88].mxu1 }
 0x403   : > { %v3801_v44 = vpop.f32.mrb[89].mxu1  ;;  %v6390_v26 = vadd.f32 %v6342_v5, %v3911_v27 }
 0x404   : > { %v3802_v37 = vadd.f32 %v3801_v44, %v3800_v33  ;;  %v3803_v13 = vpop.f32.mrb[90].mxu1 }
 0x405   : > { %v3804_v58 = vpop.f32.mrb[91].mxu1  ;;  %v3912_v0 = vpop.f32.mrb[108].mxu0 }
 0x406   : > { %v4321_v15 = vadd.f32 %v3802_v37, %v6260_v35  ;;  %v3805_v49 = vadd.f32 %v3804_v58, %v3803_v13  ;;  %v3913_v62 = vpop.f32.mrb[109].mxu0 }
 0x407   : > { %v3914_v31 = vadd.f32 %v3913_v62, %v3912_v0  ;;  %v3915_v36 = vpop.f32.mrb[110].mxu0 }
 0x408   : > { %v4327_v21 = vadd.f32 %v3805_v49, %v6265_v54  ;;  %v3916_v39 = vpop.f32.mrb[111].mxu0 }
 0x409   : > { %v3917_v23 = vadd.f32 %v3916_v39, %v3915_v36  ;;  %v6395_v63 = vadd.f32 %v6351_v4, %v3914_v31 }
 0x40a   : > { %v3806_v30 = vpop.f32.mrb[92].mxu1 }
 0x40b   : > { %v3807_v5 = vpop.f32.mrb[93].mxu1  ;;  %v6398_v16 = vadd.f32 %v6354_v9, %v3917_v23 }
 0x40c   : > { %v3808_v25 = vadd.f32 %v3807_v5, %v3806_v30  ;;  %v3809_v42 = vpop.f32.mrb[94].mxu1 }
 0x40d   : > { %v3810_v48 = vpop.f32.mrb[95].mxu1  ;;  %v3918_v35 = vpop.f32.mrb[112].mxu0 }
 0x40e   : > { %v4318_v19 = vadd.f32 %v3808_v25, %v6270_v14  ;;  %v3811_v12 = vadd.f32 %v3810_v48, %v3809_v42  ;;  %v3919_v34 = vpop.f32.mrb[113].mxu0 }
 0x40f   : > { %v3920_v22 = vadd.f32 %v3919_v34, %v3918_v35  ;;  %v3921_v54 = vpop.f32.mrb[114].mxu0 }
 0x410   : > { %v4324_v38 = vadd.f32 %v3811_v12, %v6275_v10  ;;  %v3922_v20 = vpop.f32.mrb[115].mxu0 }
 0x411   : > { %v3923_v4 = vadd.f32 %v3922_v20, %v3921_v54  ;;  %v6403_v18 = vadd.f32 %v6363_v8, %v3920_v22  ;;  %v6426_v54 = vld [vmem:[#allocation12] ss:$0 sm:$0xff] }
 0x413   : > { %v6406_v9 = vadd.f32 %v6366_v3, %v3923_v4 }
 0x415   : > { %v3924_v46 = vpop.f32.mrb[116].mxu0 }
 0x416   : > { %v3925_v47 = vpop.f32.mrb[117].mxu0 }
 0x417   : > { %v3926_v24 = vadd.f32 %v3925_v47, %v3924_v46  ;;  %v3927_v27 = vpop.f32.mrb[118].mxu0 }
 0x418   : > { %v3928_v33 = vpop.f32.mrb[119].mxu0 }
 0x419   : > { %v3929_v14 = vadd.f32 %v3928_v33, %v3927_v27  ;;  %v6409_v44 = vadd.f32 %v6375_v1, %v3926_v24 }
 0x41b   : > { %v6411_v37 = vadd.f32 %v4315_v32, %v3929_v14 }
 0x41d   : > { %v3930_v10 = vpop.f32.mrb[120].mxu0 }
 0x41e   : > { %v3931_v13 = vpop.f32.mrb[121].mxu0 }
 0x41f   : > { %v3932_v58 = vadd.f32 %v3931_v13, %v3930_v10  ;;  %v3933_v0 = vpop.f32.mrb[122].mxu0 }
 0x420   : > { %v3934_v8 = vpop.f32.mrb[123].mxu0 }
 0x421   : > { %v3935_v49 = vadd.f32 %v3934_v8, %v3933_v0  ;;  %v6413_v62 = vadd.f32 %v4306_v60, %v3932_v58 }
 0x423   : > { %v6415_v3 = vadd.f32 %v4312_v56, %v3935_v49 }
 0x425   : > { %v3936_v31 = vpop.f32.mrb[124].mxu0 }
 0x426   : > { %v3937_v36 = vpop.f32.mrb[125].mxu0 }
 0x427   : > { %v3938_v39 = vadd.f32 %v3937_v36, %v3936_v31  ;;  %v3939_v23 = vpop.f32.mrb[126].mxu0 }
 0x428   : > { %v3940_v30 = vpop.f32.mrb[127].mxu0 }
 0x429   : > { %v3941_v1 = vadd.f32 %v3940_v30, %v3939_v23  ;;  %v6417_v5 = vadd.f32 %v4321_v15, %v3938_v39 }
 0x42b   : > { %v6419_v32 = vadd.f32 %v4327_v21, %v3941_v1 }
 0x42d   : > { %v3942_v25 = vpop.f32.mrb[128].mxu0 }
 0x42e   : > { %v3943_v42 = vpop.f32.mrb[129].mxu0 }
 0x42f   : > { %v3944_v48 = vadd.f32 %v3943_v42, %v3942_v25  ;;  %v3945_v35 = vpop.f32.mrb[130].mxu0 }
 0x430   : > { %v3946_v12 = vpop.f32.mrb[131].mxu0 }
 0x431   : > { %v3947_v60 = vadd.f32 %v3946_v12, %v3945_v35  ;;  %v6421_v34 = vadd.f32 %v4318_v19, %v3944_v48 }
 0x433   : > { %v6423_v56 = vadd.f32 %v4324_v38, %v3947_v60 }
 0x452   : > { %v4156_v22 = vpop.f32.mrb[0].mxu1 }
 0x453   : > { %v4236_v20 = vadd.f32 %v6297_v50, %v4156_v22  ;;  %v2955_v15 = vpop.f32.mrb[1].mxu1 }
 0x454   : > { %v4239_v21 = vadd.f32 %v6285_v53, %v2955_v15  ;;  %v4157_v4 = vpop.f32.mrb[2].mxu1 }
 0x455   : > { %v3123_v46 = vadd.f32 %v4236_v20, %v6426_v54  ;;  %v4242_v47 = vadd.f32 %v6300_v59, %v4157_v4  ;;  %v2958_v24 = vpop.f32.mrb[3].mxu1 }
 0x456   : > { %v3121_v19 = vadd.f32 %v4239_v21, %v6426_v54  ;;  %v4245_v38 = vadd.f32 %v6288_v28, %v2958_v24 }
 0x457   : > { %3155 = vst [vmem:[%s6434_s11 + $0x10] sm:$0xff] %v3123_v46  ;;  %v3124_v53 = vadd.f32 %v4242_v47, %v6426_v54 }
 0x458   : > { %3153 = vst [vmem:[%s6434_s11] sm:$0xff] %v3121_v19  ;;  %v3122_v50 = vadd.f32 %v4245_v38, %v6426_v54 }
 0x459   : > { %3156 = vst [vmem:[%s6434_s11 + $0x18] sm:$0xff] %v3124_v53 }
 0x45a   : > { %3154 = vst [vmem:[%s6434_s11 + $0x8] sm:$0xff] %v3122_v50  ;;  %v4160_v59 = vpop.f32.mrb[4].mxu1 }
 0x45b   : > { %v4248_v28 = vadd.f32 %v6321_v61, %v4160_v59  ;;  %v2971_v27 = vpop.f32.mrb[5].mxu1 }
 0x45c   : > { %v4251_v33 = vadd.f32 %v6309_v57, %v2971_v27  ;;  %v4161_v14 = vpop.f32.mrb[6].mxu1 }
 0x45d   : > { %v3127_v10 = vadd.f32 %v4248_v28, %v6426_v54  ;;  %v4254_v13 = vadd.f32 %v6324_v6, %v4161_v14  ;;  %v2974_v58 = vpop.f32.mrb[7].mxu1 }
 0x45e   : > { %v3125_v0 = vadd.f32 %v4251_v33, %v6426_v54  ;;  %v4257_v8 = vadd.f32 %v6312_v11, %v2974_v58 }
 0x45f   : > { %3159 = vst [vmem:[%s6434_s11 + $0x30] sm:$0xff] %v3127_v10  ;;  %v3128_v49 = vadd.f32 %v4254_v13, %v6426_v54 }
 0x460   : > { %3157 = vst [vmem:[%s6434_s11 + $0x20] sm:$0xff] %v3125_v0  ;;  %v3126_v61 = vadd.f32 %v4257_v8, %v6426_v54 }
 0x461   : > { %3160 = vst [vmem:[%s6434_s11 + $0x38] sm:$0xff] %v3128_v49 }
 0x462   : > { %3158 = vst [vmem:[%s6434_s11 + $0x28] sm:$0xff] %v3126_v61  ;;  %v4164_v57 = vpop.f32.mrb[8].mxu1 }
 0x463   : > { %v4260_v6 = vadd.f32 %v6345_v7, %v4164_v57  ;;  %v2987_v31 = vpop.f32.mrb[9].mxu1 }
 0x464   : > { %v4263_v36 = vadd.f32 %v6333_v52, %v2987_v31  ;;  %v4165_v39 = vpop.f32.mrb[10].mxu1 }
 0x465   : > { %v3131_v11 = vadd.f32 %v4260_v6, %v6426_v54  ;;  %v4266_v23 = vadd.f32 %v6348_v51, %v4165_v39  ;;  %v2990_v30 = vpop.f32.mrb[11].mxu1 }
 0x466   : > { %v3129_v1 = vadd.f32 %v4263_v36, %v6426_v54  ;;  %v4269_v25 = vadd.f32 %v6336_v55, %v2990_v30 }
 0x467   : > { %3163 = vst [vmem:[%s6434_s11 + $0x50] sm:$0xff] %v3131_v11  ;;  %v3132_v42 = vadd.f32 %v4266_v23, %v6426_v54 }
 0x468   : > { %3161 = vst [vmem:[%s6434_s11 + $0x40] sm:$0xff] %v3129_v1  ;;  %v3130_v7 = vadd.f32 %v4269_v25, %v6426_v54 }
 0x469   : > { %3164 = vst [vmem:[%s6434_s11 + $0x58] sm:$0xff] %v3132_v42 }
 0x46a   : > { %3162 = vst [vmem:[%s6434_s11 + $0x48] sm:$0xff] %v3130_v7  ;;  %v4168_v52 = vpop.f32.mrb[12].mxu1 }
 0x46b   : > { %v4272_v51 = vadd.f32 %v6369_v2, %v4168_v52  ;;  %v3003_v48 = vpop.f32.mrb[13].mxu1 }
 0x46c   : > { %v4275_v35 = vadd.f32 %v6357_v45, %v3003_v48  ;;  %v4169_v12 = vpop.f32.mrb[14].mxu1 }
 0x46d   : > { %v3135_v55 = vadd.f32 %v4272_v51, %v6426_v54  ;;  %v4278_v60 = vadd.f32 %v6372_v29, %v4169_v12  ;;  %v3006_v22 = vpop.f32.mrb[15].mxu1 }
 0x46e   : > { %v3133_v20 = vadd.f32 %v4275_v35, %v6426_v54  ;;  %v4281_v15 = vadd.f32 %v6360_v17, %v3006_v22 }
 0x46f   : > { %3167 = vst [vmem:[%s6434_s11 + $0x70] sm:$0xff] %v3135_v55  ;;  %v3136_v21 = vadd.f32 %v4278_v60, %v6426_v54 }
 0x470   : > { %3165 = vst [vmem:[%s6434_s11 + $0x60] sm:$0xff] %v3133_v20  ;;  %v3134_v2 = vadd.f32 %v4281_v15, %v6426_v54 }
 0x471   : > { %3168 = vst [vmem:[%s6434_s11 + $0x78] sm:$0xff] %v3136_v21 }
 0x472   : > { %3166 = vst [vmem:[%s6434_s11 + $0x68] sm:$0xff] %v3134_v2  ;;  %v4172_v45 = vpop.f32.mrb[16].mxu1 }
 0x473   : > { %v4284_v29 = vadd.f32 %v6387_v40, %v4172_v45  ;;  %v3019_v4 = vpop.f32.mrb[17].mxu1 }
 0x474   : > { %v4287_v46 = vadd.f32 %v6379_v43, %v3019_v4  ;;  %v4173_v47 = vpop.f32.mrb[18].mxu1 }
 0x475   : > { %v3139_v17 = vadd.f32 %v4284_v29, %v6426_v54  ;;  %v4290_v24 = vadd.f32 %v6390_v26, %v4173_v47  ;;  %v3022_v19 = vpop.f32.mrb[19].mxu1 }
 0x476   : > { %v3137_v38 = vadd.f32 %v4287_v46, %v6426_v54  ;;  %v4293_v53 = vadd.f32 %v6382_v41, %v3022_v19 }
 0x477   : > { %3171 = vst [vmem:[%s6434_s11 + $0x90] sm:$0xff] %v3139_v17  ;;  %v3140_v50 = vadd.f32 %v4290_v24, %v6426_v54 }
 0x478   : > { %3169 = vst [vmem:[%s6434_s11 + $0x80] sm:$0xff] %v3137_v38  ;;  %v3138_v40 = vadd.f32 %v4293_v53, %v6426_v54 }
 0x479   : > { %3172 = vst [vmem:[%s6434_s11 + $0x98] sm:$0xff] %v3140_v50 }
 0x47a   : > { %3170 = vst [vmem:[%s6434_s11 + $0x88] sm:$0xff] %v3138_v40  ;;  %v4176_v43 = vpop.f32.mrb[20].mxu1 }
 0x47b   : > { %v4296_v26 = vadd.f32 %v6403_v18, %v4176_v43  ;;  %v3035_v59 = vpop.f32.mrb[21].mxu1 }
 0x47c   : > { %v4299_v28 = vadd.f32 %v6395_v63, %v3035_v59  ;;  %v4177_v27 = vpop.f32.mrb[22].mxu1 }
 0x47d   : > { %v3143_v41 = vadd.f32 %v4296_v26, %v6426_v54  ;;  %v4302_v33 = vadd.f32 %v6406_v9, %v4177_v27  ;;  %v3038_v14 = vpop.f32.mrb[23].mxu1 }
 0x47e   : > { %v3141_v10 = vadd.f32 %v4299_v28, %v6426_v54  ;;  %v4305_v13 = vadd.f32 %v6398_v16, %v3038_v14 }
 0x47f   : > { %3175 = vst [vmem:[%s6434_s11 + $0xb0] sm:$0xff] %v3143_v41  ;;  %v3144_v58 = vadd.f32 %v4302_v33, %v6426_v54 }
 0x480   : > { %3173 = vst [vmem:[%s6434_s11 + $0xa0] sm:$0xff] %v3141_v10  ;;  %v3142_v18 = vadd.f32 %v4305_v13, %v6426_v54 }
 0x481   : > { %3176 = vst [vmem:[%s6434_s11 + $0xb8] sm:$0xff] %v3144_v58 }
 0x482   : > { %3174 = vst [vmem:[%s6434_s11 + $0xa8] sm:$0xff] %v3142_v18  ;;  %v4180_v63 = vpop.f32.mrb[24].mxu1 }
 0x483   : > { %v4308_v9 = vadd.f32 %v6413_v62, %v4180_v63  ;;  %v3051_v0 = vpop.f32.mrb[25].mxu1 }
 0x484   : > { %v4311_v8 = vadd.f32 %v6409_v44, %v3051_v0  ;;  %v4181_v49 = vpop.f32.mrb[26].mxu1 }
 0x485   : > { %v3147_v16 = vadd.f32 %v4308_v9, %v6426_v54  ;;  %v4314_v61 = vadd.f32 %v6415_v3, %v4181_v49  ;;  %v3054_v57 = vpop.f32.mrb[27].mxu1 }
 0x486   : > { %v3145_v6 = vadd.f32 %v4311_v8, %v6426_v54  ;;  %v4317_v31 = vadd.f32 %v6411_v37, %v3054_v57 }
 0x487   : > { %3179 = vst [vmem:[%s6434_s11 + $0xd0] sm:$0xff] %v3147_v16  ;;  %v3148_v36 = vadd.f32 %v4314_v61, %v6426_v54 }
 0x488   : > { %3177 = vst [vmem:[%s6434_s11 + $0xc0] sm:$0xff] %v3145_v6  ;;  %v3146_v62 = vadd.f32 %v4317_v31, %v6426_v54 }
 0x489   : > { %3180 = vst [vmem:[%s6434_s11 + $0xd8] sm:$0xff] %v3148_v36 }
 0x48a   : > { %3178 = vst [vmem:[%s6434_s11 + $0xc8] sm:$0xff] %v3146_v62  ;;  %v4184_v44 = vpop.f32.mrb[28].mxu1 }
 0x48b   : > { %v4320_v39 = vadd.f32 %v6421_v34, %v4184_v44  ;;  %v3067_v3 = vpop.f32.mrb[29].mxu1 }
 0x48c   : > { %v4323_v11 = vadd.f32 %v6417_v5, %v3067_v3  ;;  %v4185_v23 = vpop.f32.mrb[30].mxu1 }
 0x48d   : > { %v3151_v37 = vadd.f32 %v4320_v39, %v6426_v54  ;;  %v4326_v30 = vadd.f32 %v6423_v56, %v4185_v23  ;;  %v3070_v1 = vpop.f32.mrb[31].mxu1 }
 0x48e   : > { %v3149_v25 = vadd.f32 %v4323_v11, %v6426_v54  ;;  %v4329_v42 = vadd.f32 %v6419_v32, %v3070_v1 }
 0x48f   : > { %3183 = vst [vmem:[%s6434_s11 + $0xf0] sm:$0xff] %v3151_v37  ;;  %v3152_v34 = vadd.f32 %v4326_v30, %v6426_v54 }
 0x490   : > { %3181 = vst [vmem:[%s6434_s11 + $0xe0] sm:$0xff] %v3149_v25  ;;  %v3150_v5 = vadd.f32 %v4329_v42, %v6426_v54 }
 0x491   : > { %3184 = vst [vmem:[%s6434_s11 + $0xf8] sm:$0xff] %v3152_v34 }
 0x492   : > { %3182 = vst [vmem:[%s6434_s11 + $0xe8] sm:$0xff] %v3150_v5 }
 0x493   : > { %4888 = shalt.err (!%p4885_p8)
}
 0x494   : > { %s4889_s8 = scalar_lea.hbm %s6527_s15, 4096  ;;  %s4893_s28 = scalar_lea.hbm %s6583_s6, 8192 }
 0x495   : > { %p4890_p6 = scmp.ne.s32.totalorder %s6527_s15, %s4889_s8  ;;  %p4894_p3 = scmp.lt.u32.totalorder %s6527_s15, %s6583_s6 }
 0x496   : > { %p4895_p5 = scmp.lt.u32.totalorder %s4893_s28, %s4889_s8  ;;  %p4897_p7 = scmp.lt.u32.totalorder %s4889_s8, %s6527_s15 }
 0x497   : > { %p4891_p10 = pnand %p4890_p6, %p6626_p4 }
 0x498   : > { %p4896_p9 = por %p4895_p5, %p4894_p3 }
 0x499   : > { %p4892_p11 = pneg %p4891_p10 }
 0x49a   : > { %p4898_p12 = por %p4897_p7, %p4896_p9 }
 0x49c   : > { %p4899_p1 = pnand %p4898_p12, %p4892_p11 }
 0x49e   : > { %4902 = shalt.err (!%p4899_p1)
}
 0x49f   : > { %s4970_s10 = smov 128   ;;  %s4971_s30 = smov 8  }
 0x4a0   : > { %4416 = dma.vmem_to_hbm [thread:$0]  (%p6626_p4), %s6529_s18, 4096, %s6527_s15, %s3186_s27, %s4970_s10, %s4970_s10, %s4971_s30  }
 0x4a1 PF: > { %s3214_s13 = sand.u32 1, %s4941_s21   ;;  %p6627_p13 = scmp.ne.s32.totalorder %s6599_s20, 0 }
 0x4a2   : > { %p6628_p0 = scmp.ge.s32.totalorder %s4953_s24, 2  ;;  %s3215_s25 = scalar_lea.sflag [#allocation5], %s3214_s13 }
 0x4a4   : > { %p4439_p2 = pnand %p6628_p0, %p6627_p13 }
 0x4a6   : > { %4936 = dma.done.wait (!%p4439_p2), %s3215_s25, 4096  }
 0x4a7   : > { %4938 = vsyncadd (!%p4439_p2), %s3215_s25, 4294963200  ;;  %p22_p8 = scmp.ge.s32.totalorder %s5170_s7, 4   ;;  %s6629_s21 = smov %s4945_s22 }
 0x4a8   : > { %s6630_s22 = smov %s4949_s23  ;;  %s6631_s23 = smov %s5182_s26 }
 0x4a9   : > { %s6632_s24 = smov %s5170_s7  ;;  %24 = sbr.rel (!%p22_p8) target bundleno = 8 (0x8), region = 114 }
 0x4b0   :  { %3220 = vsyncpa [#allocation4], 1 }
 0x4b1   :  { %3222 = vsyncpa [#allocation4 + $0x1], 1 }
 0x4b2   :  { %3223 = vsyncpa [#allocation7], 1 }
 0x4b3   :  { %3224 = vsyncpa [#allocation10], 1 }
 0x4b4   :  { %3225 = vsyncpa [#allocation13], 1 }
 0x4b5   :  { %3226 = vsyncpa [#allocation5], 1 }
 0x4b6   :  { %3228 = vsyncpa [#allocation5 + $0x1], 1 }

</bundles_post_ra>
